<compile_context>
chip_gen: v7x
topology: tpu7x:2x2x1
jax: 0.10.0
libtpu: 0.0.40
codegen_flags: <defaults>
</compile_context>

<pallas_src>
import numpy as np
import jax
import jax.numpy as jnp
from jax import lax
from jax.experimental import pallas as pl
from jax.experimental.pallas import tpu as pltpu

FRAMES = 8
FEAT = 2048
LANE = 128


def _round_up(x, m):
    return (x + m - 1) // m * m


def _cdiv(a, b):
    return -(-a // b)


def _e_dist_kernel(q_ref, s_ref, sn_ref, w_ref, out_ref):
    """One query tile vs. all (VMEM-resident, frame-summed) supports.

    q_ref  : (TQ, FRAMES, FEAT)   streamed per grid step (bf16 or f32)
    s_ref  : (NS_pad, FEAT)       frame-summed supports, constant block -> resident
    sn_ref : (1, NS_pad)          f32 squared norms of frame-summed supports, resident
    w_ref  : (NS_pad, WAY_pad)    f32; column c carries -1/(count_c * FRAMES), resident
    out_ref: (TQ, WAY_pad)        f32, lane-dense
    """
    # Frame *sum* with f32 accumulation (the 1/FRAMES is folded into W).
    q = jnp.sum(q_ref[...], axis=1, dtype=jnp.float32)              # (TQ, FEAT)
    qn = jnp.sum(q * q, axis=-1, keepdims=True)                     # (TQ, 1), exact-ish f32

    # q . s^T without materializing s.T (transpose folded into the MXU matmul).
    qs = lax.dot_general(q.astype(s_ref.dtype), s_ref[...],
                         dimension_numbers=(((1,), (1,)), ((), ())),
                         preferred_element_type=jnp.float32)        # (TQ, NS)

    d2 = jnp.maximum(qn + sn_ref[...] - 2.0 * qs, 0.0)              # frame-sum scale
    dist = jnp.sqrt(d2)

    # Per-class mean, 1/FRAMES and the negation are all folded into W.
    out_ref[...] = lax.dot_general(dist, w_ref[...],
                                   dimension_numbers=(((1,), (0,)), ((), ())),
                                   preferred_element_type=jnp.float32)


def _vmem_budget_bytes():
    """~85% of per-core VMEM (generation-aware); conservative 64 MiB fallback."""
    cap = 64 << 20
    try:
        cap = int(pltpu.get_tpu_info().vmem_capacity_bytes)
    except Exception:
        pass
    return int(cap * 0.85)


def e_dist_forward(support_set, support_labels, queries, way, *,
                   tq=None, feature_dtype=jnp.bfloat16):
    supports = jnp.asarray(support_set, jnp.float32).reshape(-1, FRAMES, FEAT)
    q = jnp.asarray(queries, jnp.float32).reshape(-1, FRAMES, FEAT)
    labels = jnp.asarray(support_labels, jnp.int32)
    nq, ns = q.shape[0], supports.shape[0]
    feat_bytes = jnp.dtype(feature_dtype).itemsize

    # ---- padding ----------------------------------------------------------
    ns_pad = _round_up(ns, LANE)              # lane-dense NS (dist lanes / matmul-2 K)
    way_pad = _round_up(way, LANE)            # lane-dense output
    nq8 = _round_up(nq, 8)

    # ---- supports: frame-sum + exact squared norms, once, in the wrapper ---
    supports_p = jnp.pad(supports, ((0, ns_pad - ns), (0, 0), (0, 0)))
    s_sum = supports_p.sum(axis=1)                                   # (ns_pad, FEAT) f32
    sn = jnp.sum(s_sum * s_sum, axis=1).reshape(1, ns_pad)           # (1, ns_pad) f32
    s_in = s_sum.astype(feature_dtype)

    # ---- class-averaging weights (replaces unique / index_select / mean loop) --
    # W[i, c] = -1/(count_c * FRAMES) if labels[i] == c else 0.  Absent classes keep an
    # all-zero column -> logits column 0 (matches the torch.zeros init).
    # TODO(synk): labels outside [0, way) are silently dropped (PyTorch would index OOB).
    onehot = (labels[:, None] == jnp.arange(way_pad, dtype=jnp.int32)[None, :]
              ).astype(jnp.float32)                                  # (ns, way_pad)
    counts = onehot.sum(axis=0, keepdims=True)
    inv = jnp.where(counts > 0, 1.0 / (jnp.maximum(counts, 1.0) * FRAMES), 0.0)
    w_p = jnp.pad(-onehot * inv, ((0, ns_pad - ns), (0, 0)))         # (ns_pad, way_pad)

    # ---- generation-aware VMEM budget -> query tile size --------------------
    vmem_budget = _vmem_budget_bytes()
    resident = 2 * (ns_pad * FEAT * feat_bytes        # supports (double-buffer charged)
                    + ns_pad * way_pad * 4            # W
                    + ns_pad * 4)                     # sn row
    per_row = (2 * FRAMES * FEAT * feat_bytes         # double-buffered query block
               + 2 * way_pad * 4                      # double-buffered output block
               + FRAMES * FEAT * 4                    # possible f32 upcast temp of q block
               + 2 * FEAT * 4 + FEAT * feat_bytes     # q (f32) temps + q cast for MXU
               + 4 * ns_pad * 4)                      # qs / d2 / dist temporaries
    headroom = 4 << 20                                # Mosaic internal scratch
    avail = vmem_budget - resident - headroom
    if avail < 8 * per_row:
        raise ValueError("e_dist: support set too large to keep VMEM-resident")

    if tq is None:
        tq_eff = max(8, min(512, (avail // per_row) // 8 * 8, nq8))
        # Guarantee >=2 grid steps when possible so v7x can use both TensorCores.
        if _cdiv(nq8, tq_eff) < 2 and nq8 >= 16:
            tq_eff = _round_up(_cdiv(nq8, 2), 8)
    else:
        tq_eff = max(8, min(_round_up(int(tq), 8), nq8))

    nq_pad = _round_up(nq8, tq_eff)
    q_p = jnp.pad(q, ((0, nq_pad - nq), (0, 0), (0, 0))).astype(feature_dtype)
    grid = (nq_pad // tq_eff,)

    cost = pl.CostEstimate(
        flops=2 * nq_pad * ns_pad * FEAT + 2 * nq_pad * ns_pad * way_pad,
        transcendentals=nq_pad * ns_pad,
        bytes_accessed=(nq_pad * FRAMES * FEAT * feat_bytes
                        + ns_pad * FEAT * feat_bytes
                        + ns_pad * 4 + ns_pad * way_pad * 4
                        + nq_pad * way_pad * 4),
    )

    logits_p = pl.pallas_call(
        _e_dist_kernel,
        out_shape=jax.ShapeDtypeStruct((nq_pad, way_pad), jnp.float32),
        grid_spec=pltpu.PrefetchScalarGridSpec(
            num_scalar_prefetch=0,
            grid=grid,
            in_specs=[
                pl.BlockSpec((tq_eff, FRAMES, FEAT), lambda i: (i, 0, 0)),  # streamed
                pl.BlockSpec((ns_pad, FEAT), lambda i: (0, 0)),             # resident
                pl.BlockSpec((1, ns_pad), lambda i: (0, 0)),                # resident
                pl.BlockSpec((ns_pad, way_pad), lambda i: (0, 0)),          # resident
            ],
            out_specs=pl.BlockSpec((tq_eff, way_pad), lambda i: (i, 0)),
        ),
        compiler_params=pltpu.CompilerParams(
            dimension_semantics=("parallel",),
            vmem_limit_bytes=int(vmem_budget),
        ),
        cost_estimate=cost,
    )(q_p, s_in, sn, w_p)

    return {"logits": logits_p[:nq, :way]}


def e_dist_reference(support_set, support_labels, queries, way):
    """Pure numpy reference mirroring the PyTorch loop exactly."""
    supports = np.asarray(support_set, np.float32).reshape(-1, FRAMES, FEAT)
    q = np.asarray(queries, np.float32).reshape(-1, FRAMES, FEAT).mean(axis=1)
    labels = np.asarray(support_labels)
    nq = q.shape[0]
    dist_all = np.zeros((nq, way), np.float32)
    for c in np.unique(labels):
        idx = np.nonzero(labels == c)[0]
        sc = supports[idx].mean(axis=1)                              # (n_c, D)
        dm = np.sqrt(((q[:, None, :] - sc[None, :, :]) ** 2).sum(-1))
        dist_all[:, int(c)] = -dm.mean(axis=1)
    return dist_all


if __name__ == "__main__":
    key = jax.random.PRNGKey(0)

    # Case 1: standard tiny episode (5-way 2-shot, 8 queries), bf16 feature stream.
    way, shot, n_queries = 5, 2, 8
    n_support = way * shot
    k1, k2 = jax.random.split(key)
    support_set = jax.random.normal(k1, (n_support, FRAMES, FEAT), jnp.float32)
    queries = jax.random.normal(k2, (n_queries, FRAMES, FEAT), jnp.float32)
    support_labels = jnp.array(sum([[c] * shot for c in range(way)], []), jnp.int32)

    out = e_dist_forward(support_set, support_labels, queries, way)
    logits = jax.block_until_ready(out["logits"])
    ref = e_dist_reference(support_set, support_labels, queries, way)
    np.testing.assert_allclose(np.asarray(logits), ref, rtol=2e-3, atol=2e-2)

    # Case 2: force multiple pipelined query tiles (+ query padding) with tq=8, bf16.
    way2, shot2, n_queries2 = 4, 3, 20
    n_support2 = way2 * shot2
    k3, k4 = jax.random.split(k2)
    support_set2 = jax.random.normal(k3, (n_support2, FRAMES, FEAT), jnp.float32)
    queries2 = jax.random.normal(k4, (n_queries2, FRAMES, FEAT), jnp.float32)
    support_labels2 = jnp.array(sum([[c] * shot2 for c in range(way2)], []), jnp.int32)

    out2 = e_dist_forward(support_set2, support_labels2, queries2, way2, tq=8)
    logits2 = jax.block_until_ready(out2["logits"])
    ref2 = e_dist_reference(support_set2, support_labels2, queries2, way2)
    np.testing.assert_allclose(np.asarray(logits2), ref2, rtol=2e-3, atol=2e-2)

    # Case 3: exact f32 feature path at the original (tight) tolerance.
    out3 = e_dist_forward(support_set, support_labels, queries, way,
                          feature_dtype=jnp.float32)
    logits3 = jax.block_until_ready(out3["logits"])
    np.testing.assert_allclose(np.asarray(logits3), ref, rtol=1e-3, atol=1e-2)

    print("KERNEL_OK")
</pallas_src>

<mosaic_0001>
module attributes {stable_mosaic.version = 11 : i64} {
  func.func @_e_dist_kernel(%arg0: i32, %arg1: memref<8x8x2048xbf16, #tpu.memory_space<vmem>>, %arg2: memref<128x2048xbf16, #tpu.memory_space<vmem>>, %arg3: memref<1x128xf32, #tpu.memory_space<vmem>>, %arg4: memref<128x128xf32, #tpu.memory_space<vmem>>, %arg5: memref<8x128xf32, #tpu.memory_space<vmem>>) attributes {dimension_semantics = [#tpu.dimension_semantics<parallel>], iteration_bounds = array<i64: 1>, scalar_prefetch = 0 : i64, scratch_operands = 0 : i64, tpu.core_type = #tpu.core_type<tc>, window_params = [{transform_indices = @transform_0, window_bounds = array<i64: 8, 8, 2048>}, {pipeline_mode = #tpu.pipeline_mode<synchronous>, transform_indices = @transform_1, window_bounds = array<i64: 128, 2048>}, {pipeline_mode = #tpu.pipeline_mode<synchronous>, transform_indices = @transform_2, window_bounds = array<i64: 1, 128>}, {pipeline_mode = #tpu.pipeline_mode<synchronous>, transform_indices = @transform_3, window_bounds = array<i64: 128, 128>}, {transform_indices = @transform_4, window_bounds = array<i64: 8, 128>}]} {
    %c0 = arith.constant 0 : index
    %c0_0 = arith.constant 0 : index
    %c0_1 = arith.constant 0 : index
    %0 = vector.load %arg1[%c0, %c0_0, %c0_1] : memref<8x8x2048xbf16, #tpu.memory_space<vmem>>, vector<8x8x2048xbf16>
    %1 = arith.extf %0 : vector<8x8x2048xbf16> to vector<8x8x2048xf32>
    %cst = arith.constant dense<0.000000e+00> : vector<8x2048xf32>
    %2 = vector.multi_reduction <add>, %1, %cst [1] : vector<8x8x2048xf32> to vector<8x2048xf32>
    %3 = arith.mulf %2, %2 : vector<8x2048xf32>
    %cst_2 = arith.constant dense<0.000000e+00> : vector<8xf32>
    %4 = vector.multi_reduction <add>, %3, %cst_2 [1] : vector<8x2048xf32> to vector<8xf32>
    %5 = vector.shape_cast %4 : vector<8xf32> to vector<8x1xf32>
    %6 = arith.truncf %2 : vector<8x2048xf32> to vector<8x2048xbf16>
    %c0_3 = arith.constant 0 : index
    %c0_4 = arith.constant 0 : index
    %7 = vector.load %arg2[%c0_3, %c0_4] : memref<128x2048xbf16, #tpu.memory_space<vmem>>, vector<128x2048xbf16>
    %cst_5 = arith.constant dense<0.000000e+00> : vector<8x128xf32>
    %8 = tpu.matmul %6, %7, %cst_5 {dimension_numbers = #tpu.dot_dimension_numbers<[1], [1], [0], [0], [0, 0, 1, 0], [], []>} : vector<8x2048xbf16>, vector<128x2048xbf16>, vector<8x128xf32> -> vector<8x128xf32>
    %c0_6 = arith.constant 0 : index
    %c0_7 = arith.constant 0 : index
    %9 = vector.load %arg3[%c0_6, %c0_7] : memref<1x128xf32, #tpu.memory_space<vmem>>, vector<1x128xf32>
    %10 = vector.broadcast %5 : vector<8x1xf32> to vector<8x128xf32>
    %11 = vector.broadcast %9 : vector<1x128xf32> to vector<8x128xf32>
    %12 = arith.addf %10, %11 : vector<8x128xf32>
    %cst_8 = arith.constant 2.000000e+00 : f32
    %13 = vector.broadcast %cst_8 : f32 to vector<8x128xf32>
    %14 = arith.mulf %13, %8 : vector<8x128xf32>
    %15 = arith.subf %12, %14 : vector<8x128xf32>
    %cst_9 = arith.constant 0.000000e+00 : f32
    %16 = vector.broadcast %cst_9 : f32 to vector<8x128xf32>
    %17 = arith.maximumf %15, %16 : vector<8x128xf32>
    %18 = math.sqrt %17 : vector<8x128xf32>
    %c0_10 = arith.constant 0 : index
    %c0_11 = arith.constant 0 : index
    %19 = vector.load %arg4[%c0_10, %c0_11] : memref<128x128xf32, #tpu.memory_space<vmem>>, vector<128x128xf32>
    %cst_12 = arith.constant dense<0.000000e+00> : vector<8x128xf32>
    %20 = tpu.matmul %18, %19, %cst_12 {dimension_numbers = #tpu.dot_dimension_numbers<[1], [0], [0], [1], [0, 0, 1, 1], [], []>} : vector<8x128xf32>, vector<128x128xf32>, vector<8x128xf32> -> vector<8x128xf32>
    %c0_13 = arith.constant 0 : index
    %c0_14 = arith.constant 0 : index
    %21 = vector.load %arg5[%c0_13, %c0_14] : memref<8x128xf32, #tpu.memory_space<vmem>>, vector<8x128xf32>
    tpu.vector_store %arg5[%c0_13, %c0_14], %20 {strides = array<i32>} : memref<8x128xf32, #tpu.memory_space<vmem>>, vector<8x128xf32>,
    return
  }
  func.func @transform_0(%arg0: i32) -> (i32, i32, i32) {
    %c0_i32 = arith.constant 0 : i32
    %c0_i32_0 = arith.constant 0 : i32
    %c0_i32_1 = arith.constant 0 : i32
    return %arg0, %c0_i32, %c0_i32_0 : i32, i32, i32
  }
  func.func @transform_1(%arg0: i32) -> (i32, i32) {
    %c0_i32 = arith.constant 0 : i32
    %c0_i32_0 = arith.constant 0 : i32
    %c0_i32_1 = arith.constant 0 : i32
    return %c0_i32, %c0_i32_0 : i32, i32
  }
  func.func @transform_2(%arg0: i32) -> (i32, i32) {
    %c0_i32 = arith.constant 0 : i32
    %c0_i32_0 = arith.constant 0 : i32
    %c0_i32_1 = arith.constant 0 : i32
    return %c0_i32, %c0_i32_0 : i32, i32
  }
  func.func @transform_3(%arg0: i32) -> (i32, i32) {
    %c0_i32 = arith.constant 0 : i32
    %c0_i32_0 = arith.constant 0 : i32
    %c0_i32_1 = arith.constant 0 : i32
    return %c0_i32, %c0_i32_0 : i32, i32
  }
  func.func @transform_4(%arg0: i32) -> (i32, i32) {
    %c0_i32 = arith.constant 0 : i32
    %c0_i32_0 = arith.constant 0 : i32
    return %arg0, %c0_i32 : i32, i32
  }
}

</mosaic_0001>

<bundles_post_ra>
// kernel: tpu_custom_call.1
= control target key start
LH: loop header
LB: loop body
LE: loop exit
PB: predicated region body
PF: predicated region fallthrough
CT: control target
= control target key end

     0   :  { %9 = vsyncpa [#allocation3], 0  ;;  %s5642_s0 = inlined_call_operand.hbm [shape: bf16[8,8,2048], index: 0, kind: input, shape index: {}]   ;;  %s5643_s1 = inlined_call_operand.hbm [shape: bf16[128,2048], index: 1, kind: input, shape index: {}]   ;;  %s5644_s2 = inlined_call_operand.vmem [shape: f32[1,128], index: 2, kind: input, shape index: {}]   ;;  %s5645_s3 = inlined_call_operand.hbm [shape: f32[128,128], index: 3, kind: input, shape index: {}]   ;;  %s5646_s4 = inlined_call_operand.hbm [shape: f32[8,128], index: 4, kind: output, shape index: {}]  }
   0x1   :  { %10 = vsyncpa [#allocation6], 0 }
   0x2   :  { %11 = vsyncpa [#allocation4], 0  ;;  %s3502_s15 = smov [#allocation5]   ;;  %s3503_s17 = smov [#allocation2]  }
   0x3   :  { %s29_s16 = sshll.u32 %s3502_s15, 4  ;;  %s17_s18 = sshll.u32 %s3503_s17, 4  ;;  %s30_s16 = int_to_ptr.vmem [resolvable:$true] %s29_s16  ;;  %s3538_s18 = int_to_ptr.vmem [resolvable:$true] %s17_s18 }
   0x4   :  { %s3408_s21 = scalar_lea.hbm %s5643_s1, 16384 }
   0x5   :  { %p3409_p0 = scmp.ne.s32.totalorder %s5643_s1, %s3408_s21  ;;  %p3412_p1 = scmp.lt.u32.totalorder %s3408_s21, %s5643_s1 }
   0x7   :  { %p3414_p2 = pnand %p3412_p1, %p3409_p0 }
   0x9   :  { %3417 = shalt.err (!%p3414_p2)
}
   0xa   :  { %s3418_s26 = scalar_lea.vmem %s30_s16, 16384  ;;  %p3423_p4 = scmp.lt.s32.totalorder %s30_s16, %s30_s16 }
   0xb   :  { %p3419_p3 = scmp.ne.s32.totalorder %s30_s16, %s3418_s26  ;;  %p3424_p5 = scmp.lt.s32.totalorder %s3418_s26, %s3418_s26 }
   0xd   :  { %p3425_p6 = por %p3424_p5, %p3423_p4 }
   0xf   :  { %p3426_p7 = pnand %p3425_p6, %p3419_p3 }
  0x11   :  { %3429 = shalt.err (!%p3426_p7)
}
  0x12   :  { %s3504_s27 = smov 1024   ;;  %s3505_s28 = smov 64  }
  0x13   :  { %35 = dma.hbm_to_vmem [thread:$0]  %s5643_s1, 16384, %s30_s16, [#allocation6], %s3504_s27, %s3504_s27, %s3505_s28  }
  0x14   :  { %s3430_s7 = scalar_lea.hbm %s5642_s0, 8192 }
  0x15   :  { %p3431_p8 = scmp.ne.s32.totalorder %s5642_s0, %s3430_s7  ;;  %p3434_p9 = scmp.lt.u32.totalorder %s3430_s7, %s5642_s0 }
  0x17   :  { %p3436_p10 = pnand %p3434_p9, %p3431_p8 }
  0x19   :  { %3439 = shalt.err (!%p3436_p10)
}
  0x1a   :  { %s3440_s12 = scalar_lea.vmem %s3538_s18, 8192  ;;  %p3445_p12 = scmp.lt.s32.totalorder %s3538_s18, %s3538_s18 }
  0x1b   :  { %p3441_p11 = scmp.ne.s32.totalorder %s3538_s18, %s3440_s12  ;;  %p3446_p13 = scmp.lt.s32.totalorder %s3440_s12, %s3440_s12 }
  0x1d   :  { %p3447_p0 = por %p3446_p13, %p3445_p12 }
  0x1f   :  { %p3448_p1 = pnand %p3447_p0, %p3441_p11 }
  0x21   :  { %3451 = shalt.err (!%p3448_p1)
}
  0x22   :  { %23 = dma.hbm_to_vmem [thread:$0]  %s5642_s0, 8192, %s3538_s18, [#allocation3], %s3504_s27, %s3504_s27, %s3505_s28  }
  0x23   :  { %s3506_s14 = smov [#allocation7]   ;;  %s3452_s19 = scalar_lea.hbm %s5645_s3, 2048 }
  0x24   :  { %s43_s15 = sshll.u32 %s3506_s14, 4  ;;  %p3453_p2 = scmp.ne.s32.totalorder %s5645_s3, %s3452_s19  ;;  %s44_s15 = int_to_ptr.vmem [resolvable:$true] %s43_s15 }
  0x25   :  { %p3456_p3 = scmp.lt.u32.totalorder %s3452_s19, %s5645_s3 }
  0x27   :  { %p3458_p4 = pnand %p3456_p3, %p3453_p2 }
  0x29   :  { %3461 = shalt.err (!%p3458_p4)
}
  0x2a   :  { %s3462_s24 = scalar_lea.vmem %s44_s15, 2048  ;;  %p3467_p6 = scmp.lt.s32.totalorder %s44_s15, %s44_s15 }
  0x2b   :  { %p3463_p5 = scmp.ne.s32.totalorder %s44_s15, %s3462_s24  ;;  %p3468_p7 = scmp.lt.s32.totalorder %s3462_s24, %s3462_s24 }
  0x2d   :  { %p3469_p8 = por %p3468_p7, %p3467_p6 }
  0x2f   :  { %p3470_p9 = pnand %p3469_p8, %p3463_p5 }
  0x31   :  { %3473 = shalt.err (!%p3470_p9)
}
  0x32   :  { %s3507_s0 = smov 128   ;;  %s3508_s18 = smov 8  }
  0x33   :  { %49 = dma.hbm_to_vmem [thread:$0]  %s5645_s3, 2048, %s44_s15, [#allocation6], %s3507_s0, %s3507_s0, %s3508_s18  }
  0x34   :  { %3496 = dma.done.wait [#allocation3], 8192  }
  0x35   :  { %3497 = vsyncadd [#allocation3], 4294959104 }
  0x36   :  { %3498 = dma.done.wait [#allocation6], 18432  }
  0x37   :  { %3499 = vsyncadd [#allocation6], 4294948864  ;;  %v1556_v0 = vld [vmem:[#allocation5] sm:$0xff]  ;;  %vm1276_vm0 = vcmask 1041409   ;;  %vm1278_vm1 = vcmask 1042434   ;;  %vm1280_vm2 = vcmask 1043459  }
  0x38   :  { %v1564_v1 = vld [vmem:[#allocation5 + $0x40] sm:$0xff]  ;;  %vm1282_vm3 = vcmask 1044484   ;;  %vm1284_vm4 = vcmask 1045509   ;;  %vm1286_vm5 = vcmask 1046534   ;;  %vm1288_vm6 = vcmask 1047559   ;;  %s3512_s28 = smov [#allocation8]  }
  0x39   :  { %v1560_v2 = vld [vmem:[#allocation5 + $0x20] sm:$0xff]  ;;  %v3166_v3 = vcombine.high %v1556_v0, %v1564_v1  ;;  %v3165_v5 = vcombine.low %v1556_v0, %v1564_v1  ;;  %vm3510_vm7 = vmmov 0  }
  0x3a   :  { %v1568_v4 = vld [vmem:[#allocation5 + $0x60] sm:$0xff] }
  0x3b   :  { %v1572_v6 = vld [vmem:[#allocation5 + $0x80] sm:$0xff]  ;;  %v3174_v8 = vcombine.high %v1560_v2, %v1568_v4  ;;  %v3173_v9 = vcombine.low %v1560_v2, %v1568_v4  ;;  %2724 = vmatprep.subr.bf16.mxu1 %v3166_v3 }
  0x3c   :  { %v1580_v7 = vld [vmem:[#allocation5 + $0xc0] sm:$0xff]  ;;  %2725 = vmatpush1.bf16.xpose.msra.mxu1 %v3165_v5 }
  0x3d   :  { %v3182_v10 = vcombine.high %v1572_v6, %v1580_v7  ;;  %v3581_v11 = vld [vmem:[#allocation5 + $0xa0] sm:$0xff]  ;;  %2884 = vmatprep.subr.bf16.mxu0 %v3174_v8  ;;  %v3181_v27 = vcombine.low %v1572_v6, %v1580_v7 }
  0x3e   :  { %v3583_v12 = vld [vmem:[#allocation5 + $0xe0] sm:$0xff]  ;;  %2885 = vmatpush1.bf16.xpose.msra.mxu0 %v3173_v9 }
  0x3f   :  { %v3585_v13 = vld [vmem:[#allocation5 + $0x100] sm:$0xff]  ;;  %v3190_v14 = vcombine.high %v3581_v11, %v3583_v12  ;;  %2726 = vmatprep.subr.bf16.mxu1 %v3182_v10  ;;  %v3189_v28 = vcombine.low %v3581_v11, %v3583_v12 }
  0x40   :  { %v3589_v15 = vld [vmem:[#allocation5 + $0x140] sm:$0xff] }
  0x41   :  { %v3591_v16 = vld [vmem:[#allocation5 + $0x120] sm:$0xff]  ;;  %2886 = vmatprep.subr.bf16.mxu0 %v3190_v14  ;;  %v3198_v29 = vcombine.high %v3585_v13, %v3589_v15  ;;  %v3197_v34 = vcombine.low %v3585_v13, %v3589_v15 }
  0x42   :  { %v3593_v17 = vld [vmem:[#allocation5 + $0x160] sm:$0xff] }
  0x43   :  { %v3595_v18 = vld [vmem:[#allocation5 + $0x180] sm:$0xff]  ;;  %v3206_v30 = vcombine.high %v3591_v16, %v3593_v17  ;;  %v3205_v35 = vcombine.low %v3591_v16, %v3593_v17 }
  0x44   :  { %v3597_v19 = vld [vmem:[#allocation5 + $0x1c0] sm:$0xff]  ;;  %2727 = vmatpush1.bf16.xpose.msra.mxu1 %v3181_v27 }
  0x45   :  { %v3599_v20 = vld [vmem:[#allocation5 + $0x1a0] sm:$0xff]  ;;  %2728 = vmatprep.subr.bf16.mxu1 %v3198_v29 }
  0x46   :  { %v3601_v21 = vld [vmem:[#allocation5 + $0x1e0] sm:$0xff]  ;;  %2887 = vmatpush1.bf16.xpose.msra.mxu0 %v3189_v28 }
  0x47   :  { %v3603_v22 = vld [vmem:[#allocation5 + $0x200] sm:$0xff]  ;;  %2888 = vmatprep.subr.bf16.mxu0 %v3206_v30  ;;  %v5699_v13 = vcombine.high %v3599_v20, %v3601_v21 }
  0x48   :  { %v3605_v23 = vld [vmem:[#allocation5 + $0x240] sm:$0xff] }
  0x49   :  { %v3607_v24 = vld [vmem:[#allocation5 + $0x220] sm:$0xff] }
  0x4a   :  { %v3609_v25 = vld [vmem:[#allocation5 + $0x260] sm:$0xff] }
  0x4b   :  { %v3611_v26 = vld [vmem:[#allocation5 + $0x280] sm:$0xff] }
  0x4c   :  { %v3619_v31 = vld [vmem:[#allocation5 + $0x2c0] sm:$0xff]  ;;  %2729 = vmatpush1.bf16.xpose.msra.mxu1 %v3197_v34 }
  0x4d   :  { %v3621_v32 = vld [vmem:[#allocation5 + $0x2a0] sm:$0xff] }
  0x4e   :  { %v3623_v33 = vld [vmem:[#allocation5 + $0x2e0] sm:$0xff]  ;;  %2889 = vmatpush1.bf16.xpose.msra.mxu0 %v3205_v35 }
  0x4f   :  { %v3633_v38 = vld [vmem:[#allocation5 + $0x300] sm:$0xff]  ;;  %2890 = vmatprep.subr.bf16.mxu0 %v5699_v13 }
  0x50   :  { %v3635_v39 = vld [vmem:[#allocation5 + $0x340] sm:$0xff] }
  0x51   :  { %v3637_v40 = vld [vmem:[#allocation5 + $0x320] sm:$0xff] }
  0x52   :  { %v3647_v45 = vld [vmem:[#allocation5 + $0x360] sm:$0xff] }
  0x53   :  { %v3649_v46 = vld [vmem:[#allocation5 + $0x380] sm:$0xff] }
  0x54   :  { %v3651_v47 = vld [vmem:[#allocation5 + $0x3c0] sm:$0xff] }
  0x55   :  { %v3661_v52 = vld [vmem:[#allocation5 + $0x3a0] sm:$0xff] }
  0x56   :  { %v3663_v53 = vld [vmem:[#allocation5 + $0x3e0] sm:$0xff] }
  0x57   :  { %v3665_v54 = vld [vmem:[#allocation2] sm:$0xff] }
  0x58   :  { %v3673_v58 = vld [vmem:[#allocation2 + $0x40] sm:$0xff]  ;;  %v125_v61 = vunpack.c.h.bf16 %v3665_v54 }
  0x59   :  { %v3675_v59 = vld [vmem:[#allocation2 + $0x80] sm:$0xff]  ;;  %v141_v3 = vunpack.c.h.bf16 %v3673_v58 }
  0x5a   :  { %v3677_v60 = vld [vmem:[#allocation2 + $0xc0] sm:$0xff]  ;;  %v157_v4 = vunpack.c.h.bf16 %v3675_v59  ;;  %v258_v29 = vrot.slane %v125_v61, 4 }
  0x5b   :  { %v3684_v0 = vld [vmem:[#allocation2 + $0x100] sm:$0xff]  ;;  %v173_v8 = vunpack.c.h.bf16 %v3677_v60  ;;  %v354_v6 = vrot.slane %v141_v3, 4 }
  0x5c   :  { %v3686_v1 = vld [vmem:[#allocation2 + $0x140] sm:$0xff]  ;;  %v189_v9 = vunpack.c.h.bf16 %v3684_v0  ;;  %v450_v5 = vrot.slane %v157_v4, 4  ;;  %v259_v57 = vadd.f32 %v258_v29, %v125_v61  ;;  %v5698_v61 = vcombine.high %v3595_v18, %v3597_v19 }
  0x5d   :  { %v3688_v2 = vld [vmem:[#allocation2 + $0x180] sm:$0xff]  ;;  %v205_v12 = vunpack.c.h.bf16 %v3686_v1  ;;  %v546_v63 = vrot.slane %v173_v8, 4  ;;  %v355_v10 = vadd.f32 %v354_v6, %v141_v3 }
  0x5e   :  { %v3696_v7 = vld [vmem:[#allocation2 + $0x1c0] sm:$0xff]  ;;  %v221_v14 = vunpack.c.h.bf16 %v3688_v2  ;;  %v642_v30 = vrot.slane %v189_v9, 4  ;;  %v451_v11 = vadd.f32 %v450_v5, %v157_v4  ;;  %v260_v44 = vrot.slane %v259_v57, 2  ;;  %2730 = vmatprep.subr.bf16.mxu1 %v5698_v61 }
  0x5f   :  { %v237_v28 = vunpack.c.h.bf16 %v3696_v7  ;;  %v738_v62 = vrot.slane %v205_v12, 4  ;;  %v547_v51 = vadd.f32 %v546_v63, %v173_v8  ;;  %v356_v48 = vrot.slane %v355_v10, 2 }
  0x60   :  { %v834_v56 = vrot.slane %v221_v14, 4  ;;  %v643_v50 = vadd.f32 %v642_v30, %v189_v9  ;;  %v452_v42 = vrot.slane %v451_v11, 2  ;;  %v5701_v30 = vcombine.low %v3599_v20, %v3601_v21 }
  0x61   :  { %v930_v55 = vrot.slane %v237_v28, 4  ;;  %v739_v49 = vadd.f32 %v738_v62, %v205_v12  ;;  %v548_v37 = vrot.slane %v547_v51, 2  ;;  %v261_v62 = vadd.f32 %v260_v44, %v259_v57 }
  0x62   :  { %v835_v43 = vadd.f32 %v834_v56, %v221_v14  ;;  %v644_v41 = vrot.slane %v643_v50, 2  ;;  %v357_v56 = vadd.f32 %v356_v48, %v355_v10  ;;  %v453_v15 = vadd.f32 %v452_v42, %v451_v11  ;;  %2891 = vmatpush1.bf16.xpose.msra.mxu0 %v5701_v30  ;;  %v3762_v30 = vld [vmem:[#allocation2 + $0x160] sm:$0xff] }
  0x63   :  { %v931_v27 = vadd.f32 %v930_v55, %v237_v28  ;;  %v740_v36 = vrot.slane %v739_v49, 2  ;;  %v549_v34 = vadd.f32 %v548_v37, %v547_v51  ;;  %v262_v16 = vrot.slane %v261_v62, 1 }
  0x64   :  { %v836_v55 = vrot.slane %v835_v43, 2  ;;  %v645_v3 = vadd.f32 %v644_v41, %v643_v50  ;;  %v358_v17 = vrot.slane %v357_v56, 1  ;;  %v454_v6 = vrot.slane %v453_v15, 1 }
  0x65   :  { %v932_v63 = vrot.slane %v931_v27, 2  ;;  %v741_v4 = vadd.f32 %v740_v36, %v739_v49  ;;  %v550_v44 = vrot.slane %v549_v34, 1  ;;  %v263_v8 = vadd.f32 %v262_v16, %v261_v62 }
  0x66   :  { %v837_v35 = vadd.f32 %v836_v55, %v835_v43  ;;  %v646_v48 = vrot.slane %v645_v3, 1  ;;  %v359_v9 = vadd.f32 %v358_v17, %v357_v56  ;;  %v455_v42 = vadd.f32 %v454_v6, %v453_v15 }
  0x67   :  { %v933_v5 = vadd.f32 %v932_v63, %v931_v27  ;;  %v742_v57 = vrot.slane %v741_v4, 1  ;;  %v551_v37 = vadd.f32 %v550_v44, %v549_v34  ;;  %v1021_v51 = vmul.f32 %v263_v8, %v263_v8 }
  0x68   :  { %v838_v10 = vrot.slane %v837_v35, 1  ;;  %v647_v41 = vadd.f32 %v646_v48, %v645_v3  ;;  %v1037_v43 = vmul.f32 %v359_v9, %v359_v9  ;;  %v5700_v11 = vcombine.low %v3595_v18, %v3597_v19 }
  0x69   :  { %v934_v12 = vrot.slane %v933_v5, 1  ;;  %v743_v36 = vadd.f32 %v742_v57, %v741_v4  ;;  %v1053_v14 = vmul.f32 %v455_v42, %v455_v42  ;;  %v1069_v27 = vmul.f32 %v551_v37, %v551_v37 }
  0x6a   :  { %v839_v49 = vadd.f32 %v838_v10, %v837_v35  ;;  %2731 = vmatpush1.bf16.xpose.msra.mxu1 %v5700_v11  ;;  %v1085_v28 = vmul.f32 %v647_v41, %v647_v41  ;;  %v5702_v61 = vcombine.high %v3603_v22, %v3605_v23  ;;  %v1290_v55 = vsel %vm1276_vm0, %v1037_v43, %v1021_v51  ;;  %v3752_v51 = vld [vmem:[#allocation2 + $0xe0] sm:$0xff] }
  0x6b   :  { %v935_v50 = vadd.f32 %v934_v12, %v933_v5  ;;  %v1101_v29 = vmul.f32 %v743_v36, %v743_v36  ;;  %v5703_v18 = vcombine.high %v3607_v24, %v3609_v25  ;;  %v1291_v19 = vsel %vm1278_vm1, %v1053_v14, %v1290_v55  ;;  %v3741_v12 = vld [vmem:[#allocation2 + $0x20] sm:$0xff]  ;;  %v3773_v55 = vld [vmem:[#allocation5 + $0x48] sm:$0xff] }
  0x6c   :  { %2732 = vmatprep.subr.bf16.mxu1 %v5702_v61  ;;  %v1117_v62 = vmul.f32 %v839_v49, %v839_v49  ;;  %v1429_v63 = vpack.c.bf16 %v263_v8, %v263_v8  ;;  %v1445_v13 = vpack.c.bf16 %v359_v9, %v359_v9  ;;  %v1461_v15 = vpack.c.bf16 %v455_v42, %v455_v42  ;;  %v3743_v42 = vld [vmem:[#allocation2 + $0x60] sm:$0xff] }
  0x6d   :  { %v1133_v56 = vmul.f32 %v935_v50, %v935_v50  ;;  %2892 = vmatprep.subr.bf16.mxu0 %v5703_v18  ;;  %v1292_v20 = vsel %vm1280_vm2, %v1069_v27, %v1291_v19  ;;  %v1477_v21 = vpack.c.bf16 %v551_v37, %v551_v37  ;;  %v1493_v34 = vpack.c.bf16 %v647_v41, %v647_v41  ;;  %v3775_v18 = vld [vmem:[#allocation2 + $0x1a0] sm:$0xff] }
  0x6e   :  { %v1509_v3 = vpack.c.bf16 %v743_v36, %v743_v36  ;;  %v1293_v4 = vsel %vm1282_vm3, %v1085_v28, %v1292_v20  ;;  %v1525_v16 = vpack.c.bf16 %v839_v49, %v839_v49  ;;  %v1541_v17 = vpack.c.bf16 %v935_v50, %v935_v50  ;;  %v3750_v50 = vld [vmem:[#allocation2 + $0xa0] sm:$0xff] }
  0x6f   :  { %v1813_v35 = vunpack.c.l.b16 %v1429_v63  ;;  %v1294_v5 = vsel %vm1284_vm4, %v1101_v29, %v1293_v4  ;;  %v1829_v6 = vunpack.c.l.b16 %v1445_v13  ;;  %v1845_v44 = vunpack.c.l.b16 %v1461_v15  ;;  %v3760_v29 = vld [vmem:[#allocation2 + $0x120] sm:$0xff] }
  0x70   :  { %v1861_v48 = vunpack.c.l.b16 %v1477_v21  ;;  %v124_v57 = vunpack.c.l.bf16 %v3665_v54  ;;  %v140_v8 = vunpack.c.l.bf16 %v3673_v58  ;;  %v1295_v9 = vsel %vm1286_vm5, %v1117_v62, %v1294_v5  ;;  %v3784_v15 = vld [vmem:[#allocation2 + $0x1e0] sm:$0xff] }
  0x71   :  { %v1877_v10 = vunpack.c.l.b16 %v1493_v34  ;;  %v156_v37 = vunpack.c.l.bf16 %v3675_v59  ;;  %v3747_v41 = vsel %vm1288_vm6, %v1133_v56, %v1295_v9  ;;  %v1893_v36 = vunpack.c.l.b16 %v1509_v3  ;;  %v3771_v56 = vld [vmem:[#allocation5 + $0x8] sm:$0xff] }
  0x72   :  { %v1947_v49 = vsel %vm1276_vm0, %v1829_v6, %v1813_v35  ;;  %v5704_v43 = vcombine.low %v3603_v22, %v3605_v23  ;;  %v172_v11 = vunpack.c.l.bf16 %v3677_v60  ;;  %v188_v14 = vunpack.c.l.bf16 %v3684_v0 }
  0x73   :  { %v1909_v27 = vunpack.c.l.b16 %v1525_v16  ;;  %v1948_v28 = vsel %vm1278_vm1, %v1845_v44, %v1947_v49  ;;  %v5705_v61 = vcombine.low %v3607_v24, %v3609_v25  ;;  %v5706_v62 = vcombine.high %v3611_v26, %v3619_v31 }
  0x74   :  { %2733 = vmatpush1.bf16.xpose.msra.mxu1 %v5704_v43  ;;  %v1925_v22 = vunpack.c.l.b16 %v1541_v17  ;;  %v1949_v23 = vsel %vm1280_vm2, %v1861_v48, %v1948_v28  ;;  %v133_v19 = vunpack.c.h.bf16 %v3741_v12  ;;  %v149_v63 = vunpack.c.h.bf16 %v3743_v42 }
  0x75   :  { %2893 = vmatpush1.bf16.xpose.msra.mxu0 %v5705_v61  ;;  %2734 = vmatprep.subr.bf16.mxu1 %v5706_v62  ;;  %v5707_v24 = vcombine.high %v3621_v32, %v3623_v33  ;;  %v1950_v13 = vsel %vm1282_vm3, %v1877_v10, %v1949_v23  ;;  %v165_v20 = vunpack.c.h.bf16 %v3750_v50  ;;  %v181_v21 = vunpack.c.h.bf16 %v3752_v51 }
  0x76   :  { %v1951_v3 = vsel %vm1284_vm4, %v1893_v36, %v1950_v13  ;;  %v197_v4 = vunpack.c.h.bf16 %v3760_v29  ;;  %v213_v16 = vunpack.c.h.bf16 %v3762_v30  ;;  %v229_v6 = vunpack.c.h.bf16 %v3775_v18 }
  0x77   :  { %2894 = vmatprep.subr.bf16.mxu0 %v5707_v24  ;;  %v1952_v35 = vsel %vm1286_vm5, %v1909_v27, %v1951_v3  ;;  %v245_v48 = vunpack.c.h.bf16 %v3784_v15  ;;  %v306_v9 = vrot.slane %v133_v19, 4  ;;  %v402_v10 = vrot.slane %v149_v63, 4 }
  0x78   :  { %v1953_v44 = vsel %vm1288_vm6, %v1925_v22, %v1952_v35  ;;  %v498_v49 = vrot.slane %v165_v20, 4  ;;  %v594_v43 = vrot.slane %v181_v21, 4  ;;  %v690_v28 = vrot.slane %v197_v4, 4 }
  0x79   :  { %v2053_v36 = vpack.c.b16 %v1953_v44, %v1953_v44  ;;  %v307_v61 = vadd.f32 %v306_v9, %v133_v19  ;;  %v403_v62 = vadd.f32 %v402_v10, %v149_v63  ;;  %v786_v23 = vrot.slane %v213_v16, 4 }
  0x7a   :  { %v882_v24 = vrot.slane %v229_v6, 4  ;;  %v5708_v27 = vcombine.low %v3611_v26, %v3619_v31  ;;  %v499_v13 = vadd.f32 %v498_v49, %v165_v20  ;;  %v595_v3 = vadd.f32 %v594_v43, %v181_v21 }
  0x7b   :  { %2756 = vmatprep.mubr.bf16.mxu1 %v2053_v36  ;;  %v691_v22 = vadd.f32 %v690_v28, %v197_v4  ;;  %v978_v35 = vrot.slane %v245_v48, 4  ;;  %v5709_v5 = vcombine.low %v3621_v32, %v3623_v33  ;;  %v5710_v44 = vcombine.high %v3633_v38, %v3635_v39 }
  0x7c   :  { %2735 = vmatpush1.bf16.xpose.msra.mxu1 %v5708_v27  ;;  %v308_v19 = vrot.slane %v307_v61, 2  ;;  %v404_v63 = vrot.slane %v403_v62, 2  ;;  %v787_v9 = vadd.f32 %v786_v23, %v213_v16  ;;  %v883_v10 = vadd.f32 %v882_v24, %v229_v6 }
  0x7d   :  { %2895 = vmatpush1.bf16.xpose.msra.mxu0 %v5709_v5  ;;  %2736 = vmatprep.subr.bf16.mxu1 %v5710_v44  ;;  %v5711_v26 = vcombine.high %v3637_v40, %v3647_v45  ;;  %v500_v31 = vrot.slane %v499_v13, 2  ;;  %v596_v20 = vrot.slane %v595_v3, 2  ;;  %v692_v21 = vrot.slane %v691_v22, 2 }
  0x7e   :  { %v979_v4 = vadd.f32 %v978_v35, %v245_v48  ;;  %v309_v36 = vadd.f32 %v308_v19, %v307_v61  ;;  %v405_v49 = vadd.f32 %v404_v63, %v403_v62  ;;  %v788_v32 = vrot.slane %v787_v9, 2 }
  0x7f   :  { %2896 = vmatprep.subr.bf16.mxu0 %v5711_v26  ;;  %v884_v33 = vrot.slane %v883_v10, 2  ;;  %v501_v5 = vadd.f32 %v500_v31, %v499_v13  ;;  %v597_v43 = vadd.f32 %v596_v20, %v595_v3  ;;  %v693_v28 = vadd.f32 %v692_v21, %v691_v22 }
  0x80   :  { %v980_v27 = vrot.slane %v979_v4, 2  ;;  %v310_v44 = vrot.slane %v309_v36, 1  ;;  %v406_v17 = vrot.slane %v405_v49, 1  ;;  %v789_v16 = vadd.f32 %v788_v32, %v787_v9 }
  0x81   :  { %v885_v6 = vadd.f32 %v884_v33, %v883_v10  ;;  %v502_v23 = vrot.slane %v501_v5, 1  ;;  %v598_v24 = vrot.slane %v597_v43, 1  ;;  %v694_v34 = vrot.slane %v693_v28, 1 }
  0x82   :  { %v981_v26 = vadd.f32 %v980_v27, %v979_v4  ;;  %v3168_v25 = vcombine.high %v3771_v56, %v3773_v55  ;;  %v3813_v48 = vadd.f32 %v310_v44, %v309_v36  ;;  %v790_v61 = vrot.slane %v789_v16, 1 }
  0x83   :  { %v886_v62 = vrot.slane %v885_v6, 1  ;;  %v5713_v13 = vcombine.low %v3633_v38, %v3635_v39  ;;  %v3818_v3 = vadd.f32 %v406_v17, %v405_v49  ;;  %v3820_v22 = vadd.f32 %v502_v23, %v501_v5  ;;  %v3868_v23 = vld [vmem:[#allocation5 + $0x68] sm:$0xff] }
  0x84   :  { %5712 = vst [vmem:[#allocation12_spill] sm:$0xff] %v3813_v48  ;;  %v3822_v35 = vadd.f32 %v598_v24, %v597_v43  ;;  %v982_v19 = vrot.slane %v981_v26, 1  ;;  %v5717_v63 = vcombine.low %v3637_v40, %v3647_v45  ;;  %v5718_v9 = vcombine.high %v3649_v46, %v3651_v47 }
  0x85   :  { %2737 = vmatpush1.bf16.xpose.msra.mxu1 %v5713_v13  ;;  %5714 = vst [vmem:[#allocation13_spill] sm:$0xff] %v3818_v3  ;;  %5715 = vst [vmem:[#allocation14_spill] sm:$0xff] %v3820_v22  ;;  %v132_v10 = vunpack.c.l.bf16 %v3741_v12  ;;  %v3831_v31 = vadd.f32 %v694_v34, %v693_v28  ;;  %v3833_v38 = vadd.f32 %v790_v61, %v789_v16  ;;  %v148_v20 = vunpack.c.l.bf16 %v3743_v42 }
  0x86   :  { %5716 = vst [vmem:[#allocation15_spill] sm:$0xff] %v3822_v35  ;;  %2897 = vmatpush1.bf16.xpose.msra.mxu0 %v5717_v63  ;;  %2738 = vmatprep.subr.bf16.mxu1 %v5718_v9  ;;  %v3835_v39 = vadd.f32 %v886_v62, %v885_v6  ;;  %v5722_v17 = vcombine.high %v3661_v52, %v3663_v53  ;;  %v164_v40 = vunpack.c.l.bf16 %v3750_v50  ;;  %v180_v45 = vunpack.c.l.bf16 %v3752_v51  ;;  %v3866_v6 = vld [vmem:[#allocation5 + $0x28] sm:$0xff] }
  0x87   :  { %5719 = vst [vmem:[#allocation16_spill] sm:$0xff] %v3831_v31  ;;  %5720 = vst [vmem:[#allocation17_spill] sm:$0xff] %v3833_v38  ;;  %v3843_v21 = vadd.f32 %v982_v19, %v981_v26  ;;  %v1437_v49 = vpack.c.bf16 %v3813_v48, %v3813_v48  ;;  %v1453_v32 = vpack.c.bf16 %v3818_v3, %v3818_v3  ;;  %v252_v43 = vrot.slane %v124_v57, 4 }
  0x88   :  { %5721 = vst [vmem:[#allocation18_spill] sm:$0xff] %v3835_v39  ;;  %2898 = vmatprep.subr.bf16.mxu0 %v5722_v17  ;;  %v1469_v33 = vpack.c.bf16 %v3820_v22, %v3820_v22  ;;  %v1485_v5 = vpack.c.bf16 %v3822_v35, %v3822_v35  ;;  %v1501_v28 = vpack.c.bf16 %v3831_v31, %v3831_v31  ;;  %v244_v13 = vunpack.c.l.bf16 %v3784_v15 }
  0x89   :  { %5723 = vst [vmem:[#allocation19_spill] sm:$0xff] %v3843_v21  ;;  %v1517_v27 = vpack.c.bf16 %v3833_v38, %v3833_v38  ;;  %v1533_v44 = vpack.c.bf16 %v3835_v39, %v3835_v39  ;;  %v1549_v16 = vpack.c.bf16 %v3843_v21, %v3843_v21  ;;  %v1821_v24 = vunpack.c.l.b16 %v1437_v49 }
  0x8a   :  { %v1837_v26 = vunpack.c.l.b16 %v1453_v32  ;;  %v1853_v61 = vunpack.c.l.b16 %v1469_v33  ;;  %v1869_v62 = vunpack.c.l.b16 %v1485_v5  ;;  %v1885_v19 = vunpack.c.l.b16 %v1501_v28 }
  0x8b   :  { %v1901_v63 = vunpack.c.l.b16 %v1517_v27  ;;  %v1917_v9 = vunpack.c.l.b16 %v1533_v44  ;;  %v5724_v17 = vcombine.low %v3649_v46, %v3651_v47  ;;  %v1933_v36 = vunpack.c.l.b16 %v1549_v16 }
  0x8c   :  { %v2003_v34 = vsel %vm1276_vm0, %v1837_v26, %v1821_v24  ;;  %v3176_v4 = vcombine.high %v3866_v6, %v3868_v23  ;;  %v253_v49 = vadd.f32 %v252_v43, %v124_v57  ;;  %v5725_v32 = vcombine.low %v3661_v52, %v3663_v53 }
  0x8d   :  { %2739 = vmatpush1.bf16.xpose.msra.mxu1 %v5724_v17  ;;  %v2004_v33 = vsel %vm1278_vm1, %v1853_v61, %v2003_v34  ;;  %v348_v46 = vrot.slane %v140_v8, 4  ;;  %v444_v47 = vrot.slane %v156_v37, 4  ;;  %v540_v5 = vrot.slane %v172_v11, 4 }
  0x8e   :  { %2899 = vmatpush1.bf16.xpose.msra.mxu0 %v5725_v32  ;;  %2764 = vmatprep.subr.bf16.mxu1 %v3168_v25  ;;  %v2005_v28 = vsel %vm1280_vm2, %v1869_v62, %v2004_v33  ;;  %v254_v54 = vrot.slane %v253_v49, 2  ;;  %v636_v52 = vrot.slane %v188_v14, 4  ;;  %v5726_v53 = vunpack.c.l.bf16 %v3686_v1 }
  0x8f   :  { %2924 = vmatprep.subr.bf16.mxu0 %v3176_v4  ;;  %v2006_v25 = vsel %vm1282_vm3, %v1885_v19, %v2005_v28  ;;  %v349_v34 = vadd.f32 %v348_v46, %v140_v8  ;;  %v445_v43 = vadd.f32 %v444_v47, %v156_v37  ;;  %v541_v27 = vadd.f32 %v540_v5, %v172_v11 }
  0x90   :  { %v732_v57 = vrot.slane %v5726_v53, 4  ;;  %v2007_v4 = vsel %vm1284_vm4, %v1901_v63, %v2006_v25  ;;  %v255_v44 = vadd.f32 %v254_v54, %v253_v49  ;;  %v637_v16 = vadd.f32 %v636_v52, %v188_v14 }
  0x91   :  { %v5727_v24 = vmov %v5726_v53  ;;  %v2008_v61 = vsel %vm1286_vm5, %v1917_v9, %v2007_v4  ;;  %v350_v62 = vrot.slane %v349_v34, 2  ;;  %v446_v58 = vrot.slane %v445_v43, 2 }
  0x92   :  { %v733_v26 = vadd.f32 %v732_v57, %v5727_v24  ;;  %v542_v8 = vrot.slane %v541_v27, 2  ;;  %v2009_v59 = vsel %vm1288_vm6, %v1933_v36, %v2008_v61  ;;  %v256_v37 = vrot.slane %v255_v44, 1 }
  0x93   :  { %v638_v19 = vrot.slane %v637_v16, 2  ;;  %v2061_v11 = vpack.c.b16 %v2009_v59, %v2009_v59  ;;  %v351_v17 = vadd.f32 %v350_v62, %v349_v34  ;;  %v447_v63 = vadd.f32 %v446_v58, %v445_v43 }
  0x94   :  { %v734_v60 = vrot.slane %v733_v26, 2  ;;  %v543_v49 = vadd.f32 %v542_v8, %v541_v27  ;;  %v257_v32 = vadd.f32 %v256_v37, %v255_v44  ;;  %v5728_v1 = vunpack.c.l.bf16 %v3688_v2 }
  0x95   :  { %v639_v0 = vadd.f32 %v638_v19, %v637_v16  ;;  %2916 = vmatprep.mubr.bf16.mxu0 %v2061_v11  ;;  %v352_v9 = vrot.slane %v351_v17, 1  ;;  %v448_v46 = vrot.slane %v447_v63, 1  ;;  %v5729_v5 = vunpack.c.l.bf16 %v3696_v7 }
  0x96   :  { %v735_v14 = vadd.f32 %v734_v60, %v733_v26  ;;  %v828_v33 = vrot.slane %v5728_v1, 4  ;;  %v544_v47 = vrot.slane %v543_v49, 1  ;;  %v5730_v52 = vmov %v5728_v1 }
  0x97   :  { %v924_v36 = vrot.slane %v5729_v5, 4  ;;  %v640_v28 = vrot.slane %v639_v0, 1  ;;  %v1020_v57 = vmul.f32 %v257_v32, %v257_v32  ;;  %v353_v25 = vadd.f32 %v352_v9, %v351_v17 }
  0x98   :  { %v736_v54 = vrot.slane %v735_v14, 1  ;;  %v829_v53 = vadd.f32 %v828_v33, %v5730_v52  ;;  %v449_v34 = vadd.f32 %v448_v46, %v447_v63  ;;  %v545_v43 = vadd.f32 %v544_v47, %v543_v49 }
  0x99   :  { %v5731_v27 = vmov %v5729_v5  ;;  %v641_v44 = vadd.f32 %v640_v28, %v639_v0  ;;  %v1428_v26 = vpack.c.bf16 %v257_v32, %v257_v32  ;;  %v1036_v62 = vmul.f32 %v353_v25, %v353_v25 }
  0x9a   :  { %v925_v4 = vadd.f32 %v924_v36, %v5731_v27  ;;  %v737_v16 = vadd.f32 %v736_v54, %v735_v14  ;;  %v830_v24 = vrot.slane %v829_v53, 2  ;;  %v1052_v58 = vmul.f32 %v449_v34, %v449_v34 }
  0x9b   :  { %v1068_v8 = vmul.f32 %v545_v43, %v545_v43  ;;  %v1084_v37 = vmul.f32 %v641_v44, %v641_v44  ;;  %v1444_v2 = vpack.c.bf16 %v353_v25, %v353_v25  ;;  %v1277_v11 = vsel %vm1276_vm0, %v1036_v62, %v1020_v57 }
  0x9c   :  { %v926_v61 = vrot.slane %v925_v4, 2  ;;  %v831_v59 = vadd.f32 %v830_v24, %v829_v53  ;;  %v1100_v19 = vmul.f32 %v737_v16, %v737_v16  ;;  %v1460_v17 = vpack.c.bf16 %v449_v34, %v449_v34 }
  0x9d   :  { %v1476_v63 = vpack.c.bf16 %v545_v43, %v545_v43  ;;  %v1279_v7 = vsel %vm1278_vm1, %v1052_v58, %v1277_v11  ;;  %v1492_v0 = vpack.c.bf16 %v641_v44, %v641_v44  ;;  %v1508_v14 = vpack.c.bf16 %v737_v16, %v737_v16 }
  0x9e   :  { %v927_v60 = vadd.f32 %v926_v61, %v925_v4  ;;  %v832_v49 = vrot.slane %v831_v59, 1  ;;  %v1281_v32 = vsel %vm1280_vm2, %v1068_v8, %v1279_v7  ;;  %v1812_v33 = vunpack.c.l.b16 %v1428_v26 }
  0x9f   :  { %v1828_v9 = vunpack.c.l.b16 %v1444_v2  ;;  %v1283_v47 = vsel %vm1282_vm3, %v1084_v37, %v1281_v32  ;;  %v1844_v5 = vunpack.c.l.b16 %v1460_v17  ;;  %v1860_v36 = vunpack.c.l.b16 %v1476_v63 }
  0xa0   :  { %v928_v1 = vrot.slane %v927_v60, 1  ;;  %v833_v46 = vadd.f32 %v832_v49, %v831_v59  ;;  %v1285_v54 = vsel %vm1284_vm4, %v1100_v19, %v1283_v47  ;;  %v1876_v52 = vunpack.c.l.b16 %v1492_v0 }
  0xa1   :  { %v1892_v53 = vunpack.c.l.b16 %v1508_v14  ;;  %v1940_v34 = vsel %vm1276_vm0, %v1828_v9, %v1812_v33  ;;  %v300_v43 = vrot.slane %v132_v10, 4  ;;  %v396_v16 = vrot.slane %v148_v20, 4 }
  0xa2   :  { %v929_v28 = vadd.f32 %v928_v1, %v927_v60  ;;  %v1116_v57 = vmul.f32 %v833_v46, %v833_v46  ;;  %v1524_v25 = vpack.c.bf16 %v833_v46, %v833_v46  ;;  %v1941_v44 = vsel %vm1278_vm1, %v1844_v5, %v1940_v34 }
  0xa3   :  { %v1942_v61 = vsel %vm1280_vm2, %v1860_v36, %v1941_v44  ;;  %v301_v62 = vadd.f32 %v300_v43, %v132_v10  ;;  %v397_v37 = vadd.f32 %v396_v16, %v148_v20  ;;  %v492_v11 = vrot.slane %v164_v40, 4 }
  0xa4   :  { %v1132_v27 = vmul.f32 %v929_v28, %v929_v28  ;;  %v1540_v4 = vpack.c.bf16 %v929_v28, %v929_v28  ;;  %v1287_v24 = vsel %vm1286_vm5, %v1116_v57, %v1285_v54  ;;  %v1908_v26 = vunpack.c.l.b16 %v1524_v25 }
  0xa5   :  { %v1943_v59 = vsel %vm1282_vm3, %v1876_v52, %v1942_v61  ;;  %v302_v60 = vrot.slane %v301_v62, 2  ;;  %v398_v10 = vrot.slane %v397_v37, 2  ;;  %v588_v17 = vrot.slane %v180_v45, 4 }
  0xa6   :  { %v1289_v58 = vsel %vm1288_vm6, %v1132_v27, %v1287_v24  ;;  %v1924_v8 = vunpack.c.l.b16 %v1540_v4  ;;  %v1944_v2 = vsel %vm1284_vm4, %v1892_v53, %v1943_v59  ;;  %v5732_v63 = vunpack.c.l.bf16 %v3760_v29 }
  0xa7   :  { %v3936_v19 = vadd.f32 %v3747_v41, %v1289_v58  ;;  %v1945_v12 = vsel %vm1286_vm5, %v1908_v26, %v1944_v2  ;;  %v303_v20 = vadd.f32 %v302_v60, %v301_v62  ;;  %v493_v41 = vadd.f32 %v492_v11, %v164_v40 }
  0xa8   :  { %v684_v49 = vrot.slane %v5732_v63, 4  ;;  %v1946_v42 = vsel %vm1288_vm6, %v1924_v8, %v1945_v12  ;;  %v5733_v7 = vunpack.c.l.bf16 %v3762_v30  ;;  %v399_v1 = vadd.f32 %v398_v10, %v397_v37 }
  0xa9   :  { %v2052_v14 = vpack.c.b16 %v1946_v42, %v1946_v42  ;;  %v589_v32 = vadd.f32 %v588_v17, %v180_v45  ;;  %v5734_v33 = vmov %v5732_v63  ;;  %v304_v46 = vrot.slane %v303_v20, 1 }
  0xaa   :  { %v780_v0 = vrot.slane %v5733_v7, 4  ;;  %v685_v9 = vadd.f32 %v684_v49, %v5734_v33  ;;  %v494_v47 = vrot.slane %v493_v41, 2  ;;  %v5735_v5 = vmov %v5733_v7  ;;  %v1573_v7 = vld [vmem:[#allocation5 + $0x88] sm:$0xff] }
  0xab   :  { %v5736_v28 = vunpack.c.l.bf16 %v3775_v18  ;;  %2757 = vmatmul.mubr.bf16.vlgmr.msra.gmra.mrb[0].mxu1 %v2052_v14  ;;  %v400_v40 = vrot.slane %v399_v1, 1  ;;  %v590_v54 = vrot.slane %v589_v32, 2  ;;  %v972_v53 = vrot.slane %v244_v13, 4 }
  0xac   :  { %v781_v36 = vadd.f32 %v780_v0, %v5735_v5  ;;  %v686_v52 = vrot.slane %v685_v9, 2  ;;  %v5737_v51 = vcombine.low %v3771_v56, %v3773_v55  ;;  %v3964_v29 = vadd.f32 %v304_v46, %v303_v20  ;;  %v1581_v0 = vld [vmem:[#allocation5 + $0xc8] sm:$0xff] }
  0xad   :  { %v876_v50 = vrot.slane %v5736_v28, 4  ;;  %v495_v45 = vadd.f32 %v494_v47, %v493_v41  ;;  %v5739_v30 = vmov %v5736_v28  ;;  %v3968_v34 = vadd.f32 %v400_v40, %v399_v1  ;;  %v4001_v47 = vld [vmem:[#allocation5 + $0x108] sm:$0xff] }
  0xae   :  { %2765 = vmatpush1.bf16.xpose.msra.mxu1 %v5737_v51  ;;  %5738 = vst [vmem:[#allocation20_spill] sm:$0xff] %v3964_v29  ;;  %v782_v57 = vrot.slane %v781_v36, 2  ;;  %v591_v43 = vadd.f32 %v590_v54, %v589_v32  ;;  %v687_v27 = vadd.f32 %v686_v52, %v685_v9  ;;  %v973_v4 = vadd.f32 %v972_v53, %v244_v13  ;;  %v4003_v5 = vld [vmem:[#allocation5 + $0x148] sm:$0xff] }
  0xaf   :  { %v877_v25 = vadd.f32 %v876_v50, %v5739_v30  ;;  %5740 = vst [vmem:[#allocation21_spill] sm:$0xff] %v3968_v34  ;;  %v496_v44 = vrot.slane %v495_v45, 1  ;;  %v1436_v18 = vpack.c.bf16 %v3964_v29, %v3964_v29  ;;  %v1452_v15 = vpack.c.bf16 %v3968_v34, %v3968_v34  ;;  %v4006_v54 = vld [vmem:[#allocation5 + $0xa8] sm:$0xff] }
  0xb0   :  { %v783_v16 = vadd.f32 %v782_v57, %v781_v36  ;;  %v592_v26 = vrot.slane %v591_v43, 1  ;;  %v688_v56 = vrot.slane %v687_v27, 1  ;;  %v974_v55 = vrot.slane %v973_v4, 2  ;;  %v4008_v52 = vld [vmem:[#allocation5 + $0xe8] sm:$0xff] }
  0xb1   :  { %v878_v24 = vrot.slane %v877_v25, 2  ;;  %v3972_v61 = vadd.f32 %v496_v44, %v495_v45  ;;  %v1820_v42 = vunpack.c.l.b16 %v1436_v18  ;;  %v1836_v20 = vunpack.c.l.b16 %v1452_v15  ;;  %v4010_v53 = vld [vmem:[#allocation5 + $0x128] sm:$0xff] }
  0xb2   :  { %v784_v62 = vrot.slane %v783_v16, 1  ;;  %v3976_v8 = vadd.f32 %v592_v26, %v591_v43  ;;  %v3978_v59 = vadd.f32 %v688_v56, %v687_v27  ;;  %v975_v37 = vadd.f32 %v974_v55, %v973_v4  ;;  %v4013_v57 = vld [vmem:[#allocation5 + $0x168] sm:$0xff] }
  0xb3   :  { %5741 = vst [vmem:[#allocation22_spill] sm:$0xff] %v3972_v61  ;;  %v879_v58 = vadd.f32 %v878_v24, %v877_v25  ;;  %v1468_v60 = vpack.c.bf16 %v3972_v61, %v3972_v61  ;;  %v1996_v46 = vsel %vm1276_vm0, %v1836_v20, %v1820_v42  ;;  %v3183_v50 = vcombine.low %v1573_v7, %v1581_v0  ;;  %v4015_v30 = vld [vmem:[#allocation5 + $0x188] sm:$0xff] }
  0xb4   :  { %5742 = vst [vmem:[#allocation23_spill] sm:$0xff] %v3976_v8  ;;  %5743 = vst [vmem:[#allocation24_spill] sm:$0xff] %v3978_v59  ;;  %v3982_v13 = vadd.f32 %v784_v62, %v783_v16  ;;  %v976_v11 = vrot.slane %v975_v37, 1  ;;  %v1484_v12 = vpack.c.bf16 %v3976_v8, %v3976_v8  ;;  %v1500_v17 = vpack.c.bf16 %v3978_v59, %v3978_v59  ;;  %v4017_v25 = vld [vmem:[#allocation5 + $0x1c8] sm:$0xff] }
  0xb5   :  { %v880_v2 = vrot.slane %v879_v58, 1  ;;  %v1852_v41 = vunpack.c.l.b16 %v1468_v60  ;;  %v3184_v40 = vcombine.high %v1573_v7, %v1581_v0  ;;  %v3200_v27 = vcombine.high %v4001_v47, %v4003_v5  ;;  %v4022_v4 = vld [vmem:[#allocation5 + $0x1a8] sm:$0xff] }
  0xb6   :  { %5744 = vst [vmem:[#allocation25_spill] sm:$0xff] %v3982_v13  ;;  %v1516_v63 = vpack.c.bf16 %v3982_v13, %v3982_v13  ;;  %v3994_v49 = vadd.f32 %v976_v11, %v975_v37  ;;  %v1868_v1 = vunpack.c.l.b16 %v1484_v12  ;;  %v1884_v32 = vunpack.c.l.b16 %v1500_v17  ;;  %v4024_v44 = vld [vmem:[#allocation5 + $0x1e8] sm:$0xff] }
  0xb7   :  { %v3988_v10 = vadd.f32 %v880_v2, %v879_v58  ;;  %v1997_v28 = vsel %vm1278_vm1, %v1852_v41, %v1996_v46  ;;  %2766 = vmatprep.subr.bf16.mxu1 %v3184_v40  ;;  %v4026_v16 = vld [vmem:[#allocation5 + $0x208] sm:$0xff]  ;;  %v3175_v58 = vcombine.low %v3866_v6, %v3868_v23  ;;  %v3192_v12 = vcombine.high %v4006_v54, %v4008_v52 }
  0xb8   :  { %5746 = vst [vmem:[#allocation27_spill] sm:$0xff] %v3994_v49  ;;  %v1548_v33 = vpack.c.bf16 %v3994_v49, %v3994_v49  ;;  %v1900_v9 = vunpack.c.l.b16 %v1516_v63  ;;  %v1998_v45 = vsel %vm1280_vm2, %v1868_v1, %v1997_v28  ;;  %v4028_v24 = vld [vmem:[#allocation5 + $0x248] sm:$0xff]  ;;  %2767 = vmatpush1.bf16.xpose.msra.mxu1 %v3183_v50  ;;  %v3199_v6 = vcombine.low %v4001_v47, %v4003_v5 }
  0xb9   :  { %5745 = vst [vmem:[#allocation26_spill] sm:$0xff] %v3988_v10  ;;  %v1532_v14 = vpack.c.bf16 %v3988_v10, %v3988_v10  ;;  %v1999_v43 = vsel %vm1282_vm3, %v1884_v32, %v1998_v45  ;;  %v4031_v56 = vld [vmem:[#allocation5 + $0x228] sm:$0xff]  ;;  %2768 = vmatprep.subr.bf16.mxu1 %v3200_v27  ;;  %v3216_v0 = vcombine.high %v4015_v30, %v4017_v25 }
  0xba   :  { %v1932_v51 = vunpack.c.l.b16 %v1548_v33  ;;  %v2000_v26 = vsel %vm1284_vm4, %v1900_v9, %v1999_v43  ;;  %v4033_v55 = vld [vmem:[#allocation5 + $0x268] sm:$0xff]  ;;  %v5747_v21 = vcombine.low %v4006_v54, %v4008_v52  ;;  %v5748_v22 = vcombine.high %v4010_v53, %v4013_v57 }
  0xbb   :  { %v1916_v36 = vunpack.c.l.b16 %v1532_v14  ;;  %v4035_v62 = vld [vmem:[#allocation5 + $0x288] sm:$0xff]  ;;  %v5750_v52 = vcombine.high %v4026_v16, %v4028_v24 }
  0xbc   :  { %v4042_v15 = vld [vmem:[#allocation5 + $0x2c8] sm:$0xff] }
  0xbd   :  { %v2001_v18 = vsel %vm1286_vm5, %v1916_v36, %v2000_v26  ;;  %v4044_v2 = vld [vmem:[#allocation5 + $0x2a8] sm:$0xff] }
  0xbe   :  { %v4046_v60 = vld [vmem:[#allocation5 + $0x2e8] sm:$0xff]  ;;  %v2002_v11 = vsel %vm1288_vm6, %v1932_v51, %v2001_v18 }
  0xbf   :  { %v4055_v17 = vld [vmem:[#allocation5 + $0x308] sm:$0xff]  ;;  %v2060_v20 = vpack.c.b16 %v2002_v11, %v2002_v11 }
  0xc0   :  { %v4057_v63 = vld [vmem:[#allocation5 + $0x348] sm:$0xff]  ;;  %2769 = vmatpush1.bf16.xpose.msra.mxu1 %v3199_v6 }
  0xc1   :  { %v4059_v42 = vld [vmem:[#allocation5 + $0x328] sm:$0xff]  ;;  %2917 = vmatmul.mubr.bf16.vlgmr.msra.gmra.mrb[0].mxu0 %v2060_v20  ;;  %2770 = vmatprep.subr.bf16.mxu1 %v3216_v0 }
  0xc2   :  { %v4067_v14 = vld [vmem:[#allocation5 + $0x368] sm:$0xff]  ;;  %2925 = vmatpush1.bf16.xpose.msra.mxu0 %v3175_v58 }
  0xc3   :  { %v4069_v1 = vld [vmem:[#allocation2 + $0x8] sm:$0xff]  ;;  %2926 = vmatprep.subr.bf16.mxu0 %v3192_v12 }
  0xc4   :  { %v4071_v32 = vld [vmem:[#allocation2 + $0x48] sm:$0xff]  ;;  %v127_v33 = vunpack.c.h.bf16 %v4069_v1 }
  0xc5   :  { %v4081_v5 = vld [vmem:[#allocation2 + $0x88] sm:$0xff]  ;;  %v143_v11 = vunpack.c.h.bf16 %v4071_v32 }
  0xc6   :  { %v4083_v36 = vld [vmem:[#allocation2 + $0xc8] sm:$0xff]  ;;  %v159_v20 = vunpack.c.h.bf16 %v4081_v5  ;;  %v270_v7 = vrot.slane %v127_v33, 4 }
  0xc7   :  { %v4085_v28 = vld [vmem:[#allocation2 + $0x108] sm:$0xff]  ;;  %v175_v12 = vunpack.c.h.bf16 %v4083_v36  ;;  %v366_v41 = vrot.slane %v143_v11, 4 }
  0xc8   :  { %v4095_v43 = vld [vmem:[#allocation5 + $0x388] sm:$0xff]  ;;  %v191_v58 = vunpack.c.h.bf16 %v4085_v28  ;;  %v462_v9 = vrot.slane %v159_v20, 4  ;;  %v271_v0 = vadd.f32 %v270_v7, %v127_v33 }
  0xc9   :  { %v4097_v27 = vld [vmem:[#allocation5 + $0x3c8] sm:$0xff]  ;;  %v558_v37 = vrot.slane %v175_v12, 4  ;;  %v367_v59 = vadd.f32 %v366_v41, %v143_v11 }
  0xca   :  { %v4099_v26 = vld [vmem:[#allocation2 + $0x148] sm:$0xff]  ;;  %v654_v49 = vrot.slane %v191_v58, 4  ;;  %v463_v8 = vadd.f32 %v462_v9, %v159_v20  ;;  %2927 = vmatpush1.bf16.xpose.msra.mxu0 %v5747_v21  ;;  %v272_v39 = vrot.slane %v271_v0, 2 }
  0xcb   :  { %v4107_v50 = vld [vmem:[#allocation5 + $0x3a8] sm:$0xff]  ;;  %v207_v47 = vunpack.c.h.bf16 %v4099_v26  ;;  %v559_v61 = vadd.f32 %v558_v37, %v175_v12  ;;  %v368_v38 = vrot.slane %v367_v59, 2  ;;  %2928 = vmatprep.subr.bf16.mxu0 %v5748_v22 }
  0xcc   :  { %v4109_v51 = vld [vmem:[#allocation5 + $0x3e8] sm:$0xff]  ;;  %v655_v34 = vadd.f32 %v654_v49, %v191_v58  ;;  %v464_v31 = vrot.slane %v463_v8, 2 }
  0xcd   :  { %v4111_v40 = vld [vmem:[#allocation2 + $0x188] sm:$0xff]  ;;  %v750_v10 = vrot.slane %v207_v47, 4  ;;  %v560_v7 = vrot.slane %v559_v61, 2  ;;  %v369_v49 = vadd.f32 %v368_v38, %v367_v59 }
  0xce   :  { %v4118_v45 = vld [vmem:[#allocation2 + $0x1c8] sm:$0xff]  ;;  %v223_v6 = vunpack.c.h.bf16 %v4111_v40  ;;  %v656_v41 = vrot.slane %v655_v34, 2  ;;  %v465_v54 = vadd.f32 %v464_v31, %v463_v8 }
  0xcf   :  { %v239_v46 = vunpack.c.h.bf16 %v4118_v45  ;;  %v751_v23 = vadd.f32 %v750_v10, %v207_v47  ;;  %v5749_v10 = vcombine.low %v4015_v30, %v4017_v25  ;;  %v561_v37 = vadd.f32 %v560_v7, %v559_v61 }
  0xd0   :  { %v846_v13 = vrot.slane %v223_v6, 4  ;;  %v370_v11 = vrot.slane %v369_v49, 1  ;;  %v466_v20 = vrot.slane %v465_v54, 1  ;;  %v5752_v7 = vcombine.high %v4022_v4, %v4024_v44 }
  0xd1   :  { %v942_v18 = vrot.slane %v239_v46, 4  ;;  %v752_v33 = vrot.slane %v751_v23, 2  ;;  %2771 = vmatpush1.bf16.xpose.msra.mxu1 %v5749_v10  ;;  %v562_v12 = vrot.slane %v561_v37, 1 }
  0xd2   :  { %v847_v29 = vadd.f32 %v846_v13, %v223_v6  ;;  %v273_v13 = vadd.f32 %v272_v39, %v271_v0  ;;  %2772 = vmatprep.subr.bf16.mxu1 %v5750_v52  ;;  %v371_v38 = vadd.f32 %v370_v11, %v369_v49  ;;  %v467_v31 = vadd.f32 %v466_v20, %v465_v54 }
  0xd3   :  { %v943_v35 = vadd.f32 %v942_v18, %v239_v46  ;;  %v657_v46 = vadd.f32 %v656_v41, %v655_v34  ;;  %v753_v47 = vadd.f32 %v752_v33, %v751_v23  ;;  %v563_v59 = vadd.f32 %v562_v12, %v561_v37 }
  0xd4   :  { %v848_v9 = vrot.slane %v847_v29, 2  ;;  %v274_v18 = vrot.slane %v273_v13, 1  ;;  %v5751_v34 = vcombine.low %v4010_v53, %v4013_v57  ;;  %v1039_v23 = vmul.f32 %v371_v38, %v371_v38 }
  0xd5   :  { %v944_v21 = vrot.slane %v943_v35, 2  ;;  %v658_v6 = vrot.slane %v657_v46, 1  ;;  %v754_v30 = vrot.slane %v753_v47, 1  ;;  %v1071_v41 = vmul.f32 %v563_v59, %v563_v59 }
  0xd6   :  { %v849_v22 = vadd.f32 %v848_v9, %v847_v29  ;;  %v275_v39 = vadd.f32 %v274_v18, %v273_v13  ;;  %2929 = vmatpush1.bf16.xpose.msra.mxu0 %v5751_v34  ;;  %v5753_v49 = vcombine.low %v4026_v16, %v4028_v24  ;;  %v5754_v37 = vcombine.high %v4035_v62, %v4042_v15  ;;  %v4171_v34 = vld [vmem:[#allocation2 + $0x68] sm:$0xff] }
  0xd7   :  { %v945_v58 = vadd.f32 %v944_v21, %v943_v35  ;;  %v659_v0 = vadd.f32 %v658_v6, %v657_v46  ;;  %v755_v10 = vadd.f32 %v754_v30, %v753_v47  ;;  %v1055_v35 = vmul.f32 %v467_v31, %v467_v31  ;;  %2930 = vmatprep.subr.bf16.mxu0 %v5752_v7 }
  0xd8   :  { %v850_v25 = vrot.slane %v849_v22, 1  ;;  %v1023_v61 = vmul.f32 %v275_v39, %v275_v39  ;;  %v1431_v57 = vpack.c.bf16 %v275_v39, %v275_v39  ;;  %v1447_v21 = vpack.c.bf16 %v371_v38, %v371_v38 }
  0xd9   :  { %v946_v8 = vrot.slane %v945_v58, 1  ;;  %v1087_v33 = vmul.f32 %v659_v0, %v659_v0  ;;  %v1103_v9 = vmul.f32 %v755_v10, %v755_v10  ;;  %2773 = vmatpush1.bf16.xpose.msra.mxu1 %v5753_v49  ;;  %v1463_v47 = vpack.c.bf16 %v467_v31, %v467_v31 }
  0xda   :  { %v851_v52 = vadd.f32 %v850_v25, %v849_v22  ;;  %v1304_v53 = vsel %vm1276_vm0, %v1039_v23, %v1023_v61  ;;  %2774 = vmatprep.subr.bf16.mxu1 %v5754_v37  ;;  %v1479_v22 = vpack.c.bf16 %v563_v59, %v563_v59  ;;  %v1495_v18 = vpack.c.bf16 %v659_v0, %v659_v0 }
  0xdb   :  { %v947_v29 = vadd.f32 %v946_v8, %v945_v58  ;;  %v1305_v46 = vsel %vm1278_vm1, %v1055_v35, %v1304_v53  ;;  %v1511_v20 = vpack.c.bf16 %v755_v10, %v755_v10  ;;  %v1815_v12 = vunpack.c.l.b16 %v1431_v57  ;;  %v4193_v53 = vld [vmem:[#allocation2 + $0x168] sm:$0xff] }
  0xdc   :  { %v1119_v13 = vmul.f32 %v851_v52, %v851_v52  ;;  %v1306_v11 = vsel %vm1280_vm2, %v1071_v41, %v1305_v46  ;;  %v1527_v58 = vpack.c.bf16 %v851_v52, %v851_v52  ;;  %v1831_v6 = vunpack.c.l.b16 %v1447_v21  ;;  %v4169_v52 = vld [vmem:[#allocation2 + $0x28] sm:$0xff]  ;;  %v4200_v46 = vld [vmem:[#allocation5 + $0x10] sm:$0xff] }
  0xdd   :  { %v1135_v54 = vmul.f32 %v947_v29, %v947_v29  ;;  %v1543_v16 = vpack.c.bf16 %v947_v29, %v947_v29  ;;  %v1307_v24 = vsel %vm1282_vm3, %v1087_v33, %v1306_v11  ;;  %v1847_v30 = vunpack.c.l.b16 %v1463_v47  ;;  %v4181_v41 = vld [vmem:[#allocation2 + $0xa8] sm:$0xff]  ;;  %v4202_v47 = vld [vmem:[#allocation5 + $0x50] sm:$0xff] }
  0xde   :  { %v3288_v25 = vcombine.high %v4107_v50, %v4109_v51  ;;  %v1308_v39 = vsel %vm1284_vm4, %v1103_v9, %v1307_v24  ;;  %v1863_v38 = vunpack.c.l.b16 %v1479_v22  ;;  %v1879_v8 = vunpack.c.l.b16 %v1495_v18  ;;  %v4183_v33 = vld [vmem:[#allocation2 + $0xe8] sm:$0xff] }
  0xdf   :  { %v126_v31 = vunpack.c.l.bf16 %v4069_v1  ;;  %v1309_v59 = vsel %vm1286_vm5, %v1119_v13, %v1308_v39  ;;  %v1895_v0 = vunpack.c.l.b16 %v1511_v20  ;;  %v1961_v10 = vsel %vm1276_vm0, %v1831_v6, %v1815_v12  ;;  %v4204_v22 = vld [vmem:[#allocation2 + $0x1a8] sm:$0xff] }
  0xe0   :  { %v5755_v29 = vcombine.low %v4022_v4, %v4024_v44  ;;  %v4178_v23 = vsel %vm1288_vm6, %v1135_v54, %v1309_v59  ;;  %v1911_v35 = vunpack.c.l.b16 %v1527_v58  ;;  %v1962_v7 = vsel %vm1278_vm1, %v1847_v30, %v1961_v10  ;;  %v4191_v54 = vld [vmem:[#allocation2 + $0x128] sm:$0xff] }
  0xe1   :  { %5756 = vst [vmem:[#allocation28_spill] sm:$0xff] %v4178_v23  ;;  %v5757_v9 = vcombine.high %v4031_v56, %v4033_v55  ;;  %v1927_v44 = vunpack.c.l.b16 %v1543_v16  ;;  %v1963_v49 = vsel %vm1280_vm2, %v1863_v38, %v1962_v7  ;;  %v5758_v57 = vcombine.low %v4035_v62, %v4042_v15  ;;  %v4213_v58 = vld [vmem:[#allocation2 + $0x1e8] sm:$0xff] }
  0xe2   :  { %2931 = vmatpush1.bf16.xpose.msra.mxu0 %v5755_v29  ;;  %v1964_v37 = vsel %vm1282_vm3, %v1879_v8, %v1963_v49  ;;  %v135_v18 = vunpack.c.h.bf16 %v4169_v52  ;;  %v151_v11 = vunpack.c.h.bf16 %v4171_v34  ;;  %v5759_v20 = vcombine.high %v4055_v17, %v4057_v63 }
  0xe3   :  { %2932 = vmatprep.subr.bf16.mxu0 %v5757_v9  ;;  %2775 = vmatpush1.bf16.xpose.msra.mxu1 %v5758_v57  ;;  %v1965_v15 = vsel %vm1284_vm4, %v1895_v0, %v1964_v37  ;;  %v167_v16 = vunpack.c.h.bf16 %v4181_v41  ;;  %v183_v24 = vunpack.c.h.bf16 %v4183_v33  ;;  %v199_v30 = vunpack.c.h.bf16 %v4191_v54 }
  0xe4   :  { %2776 = vmatprep.subr.bf16.mxu1 %v5759_v20  ;;  %v1966_v6 = vsel %vm1286_vm5, %v1911_v35, %v1965_v15  ;;  %v215_v39 = vunpack.c.h.bf16 %v4193_v53  ;;  %v3170_v59 = vcombine.high %v4200_v46, %v4202_v47  ;;  %v231_v0 = vunpack.c.h.bf16 %v4204_v22 }
  0xe5   :  { %v1967_v8 = vsel %vm1288_vm6, %v1927_v44, %v1966_v6  ;;  %v247_v29 = vunpack.c.h.bf16 %v4213_v58  ;;  %v318_v7 = vrot.slane %v135_v18, 4  ;;  %v414_v9 = vrot.slane %v151_v11, 4 }
  0xe6   :  { %v2055_v10 = vpack.c.b16 %v1967_v8, %v1967_v8  ;;  %v510_v49 = vrot.slane %v167_v16, 4  ;;  %v606_v35 = vrot.slane %v183_v24, 4  ;;  %v702_v57 = vrot.slane %v199_v30, 4 }
  0xe7   :  { %v798_v37 = vrot.slane %v215_v39, 4  ;;  %v5760_v20 = vcombine.low %v4031_v56, %v4033_v55  ;;  %v319_v44 = vadd.f32 %v318_v7, %v135_v18  ;;  %v415_v15 = vadd.f32 %v414_v9, %v151_v11 }
  0xe8   :  { %2796 = vmatprep.mubr.bf16.mxu1 %v2055_v10  ;;  %v894_v6 = vrot.slane %v231_v0, 4  ;;  %v990_v38 = vrot.slane %v247_v29, 4  ;;  %v5761_v8 = vcombine.high %v4044_v2, %v4046_v60  ;;  %v511_v12 = vadd.f32 %v510_v49, %v167_v16 }
  0xe9   :  { %v607_v62 = vadd.f32 %v606_v35, %v183_v24  ;;  %v703_v21 = vadd.f32 %v702_v57, %v199_v30  ;;  %v799_v4 = vadd.f32 %v798_v37, %v215_v39  ;;  %v5762_v13 = vcombine.low %v4055_v17, %v4057_v63 }
  0xea   :  { %2933 = vmatpush1.bf16.xpose.msra.mxu0 %v5760_v20  ;;  %v320_v61 = vrot.slane %v319_v44, 2  ;;  %v416_v56 = vrot.slane %v415_v15, 2  ;;  %v895_v55 = vadd.f32 %v894_v6, %v231_v0  ;;  %v991_v10 = vadd.f32 %v990_v38, %v247_v29 }
  0xeb   :  { %2934 = vmatprep.subr.bf16.mxu0 %v5761_v8  ;;  %2777 = vmatpush1.bf16.xpose.msra.mxu1 %v5762_v13  ;;  %v5763_v18 = vcombine.high %v4095_v43, %v4097_v27  ;;  %v512_v11 = vrot.slane %v511_v12, 2  ;;  %v608_v7 = vrot.slane %v607_v62, 2  ;;  %v704_v9 = vrot.slane %v703_v21, 2 }
  0xec   :  { %v800_v20 = vrot.slane %v799_v4, 2  ;;  %v321_v16 = vadd.f32 %v320_v61, %v319_v44  ;;  %v417_v24 = vadd.f32 %v416_v56, %v415_v15  ;;  %v896_v30 = vrot.slane %v895_v55, 2 }
  0xed   :  { %2778 = vmatprep.subr.bf16.mxu1 %v5763_v18  ;;  %v992_v39 = vrot.slane %v991_v10, 2  ;;  %v513_v49 = vadd.f32 %v512_v11, %v511_v12  ;;  %v609_v35 = vadd.f32 %v608_v7, %v607_v62  ;;  %v705_v17 = vadd.f32 %v704_v9, %v703_v21 }
  0xee   :  { %v801_v63 = vadd.f32 %v800_v20, %v799_v4  ;;  %v322_v13 = vrot.slane %v321_v16, 1  ;;  %v418_v57 = vrot.slane %v417_v24, 1  ;;  %v897_v0 = vadd.f32 %v896_v30, %v895_v55 }
  0xef   :  { %v993_v38 = vadd.f32 %v992_v39, %v991_v10  ;;  %v514_v29 = vrot.slane %v513_v49, 1  ;;  %v610_v37 = vrot.slane %v609_v35, 1  ;;  %v706_v6 = vrot.slane %v705_v17, 1 }
  0xf0   :  { %v802_v8 = vrot.slane %v801_v63, 1  ;;  %v5764_v18 = vcombine.low %v4044_v2, %v4046_v60  ;;  %v4242_v61 = vadd.f32 %v322_v13, %v321_v16  ;;  %v4244_v44 = vadd.f32 %v418_v57, %v417_v24 }
  0xf1   :  { %v898_v12 = vrot.slane %v897_v0, 1  ;;  %v994_v62 = vrot.slane %v993_v38, 1  ;;  %v5767_v4 = vcombine.high %v4059_v42, %v4067_v14  ;;  %v4249_v21 = vadd.f32 %v514_v29, %v513_v49  ;;  %v4291_v29 = vld [vmem:[#allocation5 + $0x70] sm:$0xff] }
  0xf2   :  { %2935 = vmatpush1.bf16.xpose.msra.mxu0 %v5764_v18  ;;  %5765 = vst [vmem:[#allocation29_spill] sm:$0xff] %v4242_v61  ;;  %5766 = vst [vmem:[#allocation30_spill] sm:$0xff] %v4244_v44  ;;  %v4251_v15 = vadd.f32 %v610_v37, %v609_v35  ;;  %v4253_v56 = vadd.f32 %v706_v6, %v705_v17  ;;  %v4255_v55 = vadd.f32 %v802_v8, %v801_v63 }
  0xf3   :  { %2936 = vmatprep.subr.bf16.mxu0 %v5767_v4  ;;  %5768 = vst [vmem:[#allocation31_spill] sm:$0xff] %v4249_v21  ;;  %v5772_v2 = vcombine.low %v4095_v43, %v4097_v27  ;;  %v134_v10 = vunpack.c.l.bf16 %v4169_v52  ;;  %v4263_v11 = vadd.f32 %v898_v12, %v897_v0  ;;  %v4265_v7 = vadd.f32 %v994_v62, %v993_v38  ;;  %v4289_v38 = vld [vmem:[#allocation5 + $0x30] sm:$0xff] }
  0xf4   :  { %5769 = vst [vmem:[#allocation32_spill] sm:$0xff] %v4251_v15  ;;  %5770 = vst [vmem:[#allocation33_spill] sm:$0xff] %v4253_v56  ;;  %v150_v9 = vunpack.c.l.bf16 %v4171_v34  ;;  %v166_v20 = vunpack.c.l.bf16 %v4181_v41  ;;  %v182_v16 = vunpack.c.l.bf16 %v4183_v33  ;;  %v198_v24 = vunpack.c.l.bf16 %v4191_v54 }
  0xf5   :  { %5771 = vst [vmem:[#allocation34_spill] sm:$0xff] %v4255_v55  ;;  %2779 = vmatpush1.bf16.xpose.msra.mxu1 %v5772_v2  ;;  %5773 = vst [vmem:[#allocation35_spill] sm:$0xff] %v4263_v11  ;;  %v214_v43 = vunpack.c.l.bf16 %v4193_v53  ;;  %v1439_v30 = vpack.c.bf16 %v4242_v61, %v4242_v61  ;;  %v1455_v39 = vpack.c.bf16 %v4244_v44, %v4244_v44 }
  0xf6   :  { %5774 = vst [vmem:[#allocation36_spill] sm:$0xff] %v4265_v7  ;;  %2804 = vmatprep.subr.bf16.mxu1 %v3170_v59  ;;  %v1471_v59 = vpack.c.bf16 %v4249_v21, %v4249_v21  ;;  %v1487_v49 = vpack.c.bf16 %v4251_v15, %v4251_v15  ;;  %v1503_v35 = vpack.c.bf16 %v4253_v56, %v4253_v56 }
  0xf7   :  { %v1519_v17 = vpack.c.bf16 %v4255_v55, %v4255_v55  ;;  %v1535_v63 = vpack.c.bf16 %v4263_v11, %v4263_v11  ;;  %v1551_v13 = vpack.c.bf16 %v4265_v7, %v4265_v7  ;;  %v1823_v57 = vunpack.c.l.b16 %v1439_v30 }
  0xf8   :  { %v1839_v0 = vunpack.c.l.b16 %v1455_v39  ;;  %v1855_v6 = vunpack.c.l.b16 %v1471_v59  ;;  %v1871_v8 = vunpack.c.l.b16 %v1487_v49  ;;  %v1887_v18 = vunpack.c.l.b16 %v1503_v35 }
  0xf9   :  { %v5775_v12 = vcombine.low %v4059_v42, %v4067_v14  ;;  %v1903_v62 = vunpack.c.l.b16 %v1519_v17  ;;  %v1919_v4 = vunpack.c.l.b16 %v1535_v63  ;;  %v1935_v2 = vunpack.c.l.b16 %v1551_v13 }
  0xfa   :  { %v2017_v60 = vsel %vm1276_vm0, %v1839_v0, %v1823_v57  ;;  %v3178_v39 = vcombine.high %v4289_v38, %v4291_v29  ;;  %v264_v59 = vrot.slane %v126_v31, 4  ;;  %v5776_v42 = vunpack.c.l.bf16 %v4071_v32 }
  0xfb   :  { %2937 = vmatpush1.bf16.xpose.msra.mxu0 %v5775_v12  ;;  %v2018_v30 = vsel %vm1278_vm1, %v1855_v6, %v2017_v60  ;;  %v5777_v35 = vunpack.c.l.bf16 %v4081_v5  ;;  %v5778_v63 = vunpack.c.l.bf16 %v4083_v36 }
  0xfc   :  { %2938 = vmatprep.subr.bf16.mxu0 %v3288_v25  ;;  %v360_v14 = vrot.slane %v5776_v42, 4  ;;  %v2019_v49 = vsel %vm1280_vm2, %v1871_v8, %v2018_v30  ;;  %v5779_v25 = vunpack.c.l.bf16 %v4085_v28  ;;  %v265_v0 = vadd.f32 %v264_v59, %v126_v31 }
  0xfd   :  { %v456_v17 = vrot.slane %v5777_v35, 4  ;;  %v552_v13 = vrot.slane %v5778_v63, 4  ;;  %v2020_v57 = vsel %vm1282_vm3, %v1887_v18, %v2019_v49  ;;  %v5780_v6 = vmov %v5776_v42 }
  0xfe   :  { %v648_v60 = vrot.slane %v5779_v25, 4  ;;  %v361_v12 = vadd.f32 %v360_v14, %v5780_v6  ;;  %v5781_v42 = vunpack.c.l.bf16 %v4099_v26  ;;  %v2021_v30 = vsel %vm1284_vm4, %v1903_v62, %v2020_v57 }
  0xff   :  { %v457_v37 = vadd.f32 %v456_v17, %v5777_v35  ;;  %v553_v27 = vadd.f32 %v552_v13, %v5778_v63  ;;  %v2022_v1 = vsel %vm1286_vm5, %v1919_v4, %v2021_v30  ;;  %v266_v31 = vrot.slane %v265_v0, 2 }
 0x100   :  { %v744_v8 = vrot.slane %v5781_v42, 4  ;;  %v649_v18 = vadd.f32 %v648_v60, %v5779_v25  ;;  %v362_v59 = vrot.slane %v361_v12, 2  ;;  %v5782_v32 = vmov %v5781_v42 }
 0x101   :  { %v2023_v49 = vsel %vm1288_vm6, %v1935_v2, %v2022_v1  ;;  %v458_v6 = vrot.slane %v457_v37, 2  ;;  %v554_v62 = vrot.slane %v553_v27, 2  ;;  %v267_v17 = vadd.f32 %v266_v31, %v265_v0 }
 0x102   :  { %v745_v14 = vadd.f32 %v744_v8, %v5782_v32  ;;  %v650_v57 = vrot.slane %v649_v18, 2  ;;  %v2063_v5 = vpack.c.b16 %v2023_v49, %v2023_v49  ;;  %v363_v42 = vadd.f32 %v362_v59, %v361_v12 }
 0x103   :  { %v5783_v28 = vcombine.low %v4107_v50, %v4109_v51  ;;  %v459_v13 = vadd.f32 %v458_v6, %v457_v37  ;;  %v555_v4 = vadd.f32 %v554_v62, %v553_v27  ;;  %v5784_v30 = vunpack.c.l.bf16 %v4111_v40 }
 0x104   :  { %v746_v36 = vrot.slane %v745_v14, 2  ;;  %v651_v60 = vadd.f32 %v650_v57, %v649_v18  ;;  %2956 = vmatprep.mubr.bf16.mxu0 %v2063_v5  ;;  %v268_v2 = vrot.slane %v267_v17, 1  ;;  %v364_v8 = vrot.slane %v363_v42, 1 }
 0x105   :  { %2939 = vmatpush1.bf16.xpose.msra.mxu0 %v5783_v28  ;;  %v840_v26 = vrot.slane %v5784_v30, 4  ;;  %v5785_v63 = vunpack.c.l.bf16 %v4118_v45  ;;  %v460_v12 = vrot.slane %v459_v13, 1  ;;  %v556_v25 = vrot.slane %v555_v4, 1 }
 0x106   :  { %2964 = vmatprep.subr.bf16.mxu0 %v3178_v39  ;;  %v747_v35 = vadd.f32 %v746_v36, %v745_v14  ;;  %v652_v1 = vrot.slane %v651_v60, 1  ;;  %v5786_v50 = vmov %v5784_v30  ;;  %v269_v37 = vadd.f32 %v268_v2, %v267_v17 }
 0x107   :  { %v936_v0 = vrot.slane %v5785_v63, 4  ;;  %v841_v51 = vadd.f32 %v840_v26, %v5786_v50  ;;  %v365_v27 = vadd.f32 %v364_v8, %v363_v42  ;;  %v5787_v31 = vmov %v5785_v63 }
 0x108   :  { %v748_v18 = vrot.slane %v747_v35, 1  ;;  %v461_v32 = vadd.f32 %v460_v12, %v459_v13  ;;  %v557_v39 = vadd.f32 %v556_v25, %v555_v4  ;;  %v653_v49 = vadd.f32 %v652_v1, %v651_v60 }
 0x109   :  { %v937_v59 = vadd.f32 %v936_v0, %v5787_v31  ;;  %v842_v6 = vrot.slane %v841_v51, 2  ;;  %v1022_v57 = vmul.f32 %v269_v37, %v269_v37  ;;  %v1038_v5 = vmul.f32 %v365_v27, %v365_v27 }
 0x10a   :  { %v749_v14 = vadd.f32 %v748_v18, %v747_v35  ;;  %v1054_v28 = vmul.f32 %v461_v32, %v461_v32  ;;  %v1070_v30 = vmul.f32 %v557_v39, %v557_v39  ;;  %v1086_v63 = vmul.f32 %v653_v49, %v653_v49 }
 0x10b   :  { %v938_v62 = vrot.slane %v937_v59, 2  ;;  %v843_v36 = vadd.f32 %v842_v6, %v841_v51  ;;  %v1297_v17 = vsel %vm1276_vm0, %v1038_v5, %v1022_v57  ;;  %v1430_v42 = vpack.c.bf16 %v269_v37, %v269_v37 }
 0x10c   :  { %v1102_v26 = vmul.f32 %v749_v14, %v749_v14  ;;  %v1298_v45 = vsel %vm1278_vm1, %v1054_v28, %v1297_v17  ;;  %v1446_v13 = vpack.c.bf16 %v365_v27, %v365_v27  ;;  %v1462_v4 = vpack.c.bf16 %v461_v32, %v461_v32 }
 0x10d   :  { %v939_v40 = vadd.f32 %v938_v62, %v937_v59  ;;  %v844_v2 = vrot.slane %v843_v36, 1  ;;  %v1299_v8 = vsel %vm1280_vm2, %v1070_v30, %v1298_v45  ;;  %v1478_v35 = vpack.c.bf16 %v557_v39, %v557_v39 }
 0x10e   :  { %v1494_v0 = vpack.c.bf16 %v653_v49, %v653_v49  ;;  %v1300_v25 = vsel %vm1282_vm3, %v1086_v63, %v1299_v8  ;;  %v1510_v1 = vpack.c.bf16 %v749_v14, %v749_v14  ;;  %v1814_v50 = vunpack.c.l.b16 %v1430_v42 }
 0x10f   :  { %v940_v60 = vrot.slane %v939_v40, 1  ;;  %v845_v12 = vadd.f32 %v844_v2, %v843_v36  ;;  %v1301_v18 = vsel %vm1284_vm4, %v1102_v26, %v1300_v25  ;;  %v1830_v31 = vunpack.c.l.b16 %v1446_v13 }
 0x110   :  { %v1846_v37 = vunpack.c.l.b16 %v1462_v4  ;;  %v1862_v62 = vunpack.c.l.b16 %v1478_v35  ;;  %v1878_v27 = vunpack.c.l.b16 %v1494_v0  ;;  %v1894_v5 = vunpack.c.l.b16 %v1510_v1 }
 0x111   :  { %v941_v51 = vadd.f32 %v940_v60, %v939_v40  ;;  %v1118_v59 = vmul.f32 %v845_v12, %v845_v12  ;;  %v1526_v6 = vpack.c.bf16 %v845_v12, %v845_v12  ;;  %v1954_v39 = vsel %vm1276_vm0, %v1830_v31, %v1814_v50 }
 0x112   :  { %v1955_v14 = vsel %vm1278_vm1, %v1846_v37, %v1954_v39  ;;  %v312_v28 = vrot.slane %v134_v10, 4  ;;  %v408_v26 = vrot.slane %v150_v9, 4  ;;  %v504_v45 = vrot.slane %v166_v20, 4 }
 0x113   :  { %v1134_v32 = vmul.f32 %v941_v51, %v941_v51  ;;  %v1542_v57 = vpack.c.bf16 %v941_v51, %v941_v51  ;;  %v1302_v49 = vsel %vm1286_vm5, %v1118_v59, %v1301_v18  ;;  %v1910_v36 = vunpack.c.l.b16 %v1526_v6 }
 0x114   :  { %v1956_v40 = vsel %vm1280_vm2, %v1862_v62, %v1955_v14  ;;  %v313_v2 = vadd.f32 %v312_v28, %v134_v10  ;;  %v409_v4 = vadd.f32 %v408_v26, %v150_v9  ;;  %v600_v60 = vrot.slane %v182_v16, 4 }
 0x115   :  { %v1303_v30 = vsel %vm1288_vm6, %v1134_v32, %v1302_v49  ;;  %v1926_v63 = vunpack.c.l.b16 %v1542_v57  ;;  %v1957_v42 = vsel %vm1282_vm3, %v1878_v27, %v1956_v40  ;;  %v505_v52 = vadd.f32 %v504_v45, %v166_v20  ;;  %v1574_v45 = vld [vmem:[#allocation5 + $0x90] sm:$0xff] }
 0x116   :  { %v4359_v17 = vadd.f32 %v3936_v19, %v1303_v30  ;;  %v1958_v13 = vsel %vm1284_vm4, %v1894_v5, %v1957_v42  ;;  %v696_v19 = vrot.slane %v198_v24, 4  ;;  %v314_v35 = vrot.slane %v313_v2, 2 }
 0x117   :  { %v1959_v8 = vsel %vm1286_vm5, %v1910_v36, %v1958_v13  ;;  %v792_v10 = vrot.slane %v214_v43, 4  ;;  %v410_v12 = vrot.slane %v409_v4, 2  ;;  %v601_v34 = vadd.f32 %v600_v60, %v182_v16  ;;  %v1582_v13 = vld [vmem:[#allocation5 + $0xd0] sm:$0xff] }
 0x118   :  { %5788 = vst [vmem:[#allocation37_spill] sm:$0xff] %v4359_v17  ;;  %v1960_v0 = vsel %vm1288_vm6, %v1926_v63, %v1959_v8  ;;  %v697_v9 = vadd.f32 %v696_v19, %v198_v24  ;;  %v315_v1 = vadd.f32 %v314_v35, %v313_v2  ;;  %v506_v50 = vrot.slane %v505_v52, 2 }
 0x119   :  { %v2054_v25 = vpack.c.b16 %v1960_v0, %v1960_v0  ;;  %v793_v51 = vadd.f32 %v792_v10, %v214_v43  ;;  %v411_v41 = vadd.f32 %v410_v12, %v409_v4  ;;  %v602_v20 = vrot.slane %v601_v34, 2 }
 0x11a   :  { %v698_v18 = vrot.slane %v697_v9, 2  ;;  %v5789_v31 = vunpack.c.l.bf16 %v4204_v22  ;;  %v316_v59 = vrot.slane %v315_v1, 1  ;;  %v507_v6 = vadd.f32 %v506_v50, %v505_v52  ;;  %v4422_v50 = vld [vmem:[#allocation5 + $0xf0] sm:$0xff] }
 0x11b   :  { %2797 = vmatmul.mubr.bf16.vlgmr.msra.gmra.mrb[0].mxu1 %v2054_v25  ;;  %v794_v33 = vrot.slane %v793_v51, 2  ;;  %v5790_v16 = vunpack.c.l.bf16 %v4213_v58  ;;  %v5791_v24 = vcombine.low %v4200_v46, %v4202_v47  ;;  %v412_v62 = vrot.slane %v411_v41, 1 }
 0x11c   :  { %v888_v37 = vrot.slane %v5789_v31, 4  ;;  %v603_v53 = vadd.f32 %v602_v20, %v601_v34  ;;  %v699_v43 = vadd.f32 %v698_v18, %v697_v9  ;;  %v5792_v27 = vmov %v5789_v31  ;;  %v4427_v31 = vld [vmem:[#allocation5 + $0x110] sm:$0xff] }
 0x11d   :  { %v984_v54 = vrot.slane %v5790_v16, 4  ;;  %2805 = vmatpush1.bf16.xpose.msra.mxu1 %v5791_v24  ;;  %v4394_v57 = vadd.f32 %v316_v59, %v315_v1  ;;  %v508_v5 = vrot.slane %v507_v6, 1  ;;  %v795_v39 = vadd.f32 %v794_v33, %v793_v51  ;;  %v4420_v1 = vld [vmem:[#allocation5 + $0xb0] sm:$0xff] }
 0x11e   :  { %v889_v32 = vadd.f32 %v888_v37, %v5792_v27  ;;  %v5794_v49 = vmov %v5790_v16  ;;  %v4398_v14 = vadd.f32 %v412_v62, %v411_v41  ;;  %v604_v28 = vrot.slane %v603_v53, 1  ;;  %v4429_v37 = vld [vmem:[#allocation5 + $0x150] sm:$0xff] }
 0x11f   :  { %5793 = vst [vmem:[#allocation38_spill] sm:$0xff] %v4394_v57  ;;  %v985_v36 = vadd.f32 %v984_v54, %v5794_v49  ;;  %v700_v30 = vrot.slane %v699_v43, 1  ;;  %v4400_v46 = vadd.f32 %v508_v5, %v507_v6  ;;  %v796_v47 = vrot.slane %v795_v39, 1  ;;  %v4431_v59 = vld [vmem:[#allocation5 + $0x130] sm:$0xff] }
 0x120   :  { %5795 = vst [vmem:[#allocation39_spill] sm:$0xff] %v4398_v14  ;;  %v890_v63 = vrot.slane %v889_v32, 2  ;;  %v1438_v22 = vpack.c.bf16 %v4394_v57, %v4394_v57  ;;  %v4404_v26 = vadd.f32 %v604_v28, %v603_v53  ;;  %v1454_v58 = vpack.c.bf16 %v4398_v14, %v4398_v14  ;;  %v4436_v24 = vld [vmem:[#allocation5 + $0x170] sm:$0xff] }
 0x121   :  { %5796 = vst [vmem:[#allocation40_spill] sm:$0xff] %v4400_v46  ;;  %v986_v40 = vrot.slane %v985_v36, 2  ;;  %v4406_v42 = vadd.f32 %v700_v30, %v699_v43  ;;  %v4410_v4 = vadd.f32 %v796_v47, %v795_v39  ;;  %v1470_v19 = vpack.c.bf16 %v4400_v46, %v4400_v46  ;;  %v4438_v62 = vld [vmem:[#allocation5 + $0x190] sm:$0xff] }
 0x122   :  { %5797 = vst [vmem:[#allocation41_spill] sm:$0xff] %v4404_v26  ;;  %v891_v2 = vadd.f32 %v890_v63, %v889_v32  ;;  %v1822_v8 = vunpack.c.l.b16 %v1438_v22  ;;  %v1486_v52 = vpack.c.bf16 %v4404_v26, %v4404_v26  ;;  %v1838_v0 = vunpack.c.l.b16 %v1454_v58  ;;  %v4440_v53 = vld [vmem:[#allocation5 + $0x1d0] sm:$0xff] }
 0x123   :  { %5798 = vst [vmem:[#allocation42_spill] sm:$0xff] %v4406_v42  ;;  %5799 = vst [vmem:[#allocation43_spill] sm:$0xff] %v4410_v4  ;;  %v987_v60 = vadd.f32 %v986_v40, %v985_v36  ;;  %v1502_v10 = vpack.c.bf16 %v4406_v42, %v4406_v42  ;;  %v1518_v34 = vpack.c.bf16 %v4410_v4, %v4410_v4  ;;  %v1854_v9 = vunpack.c.l.b16 %v1470_v19  ;;  %v4449_v39 = vld [vmem:[#allocation5 + $0x1b0] sm:$0xff] }
 0x124   :  { %v892_v35 = vrot.slane %v891_v2, 1  ;;  %v3185_v25 = vcombine.low %v1574_v45, %v1582_v13  ;;  %v1870_v41 = vunpack.c.l.b16 %v1486_v52  ;;  %v2010_v18 = vsel %vm1276_vm0, %v1838_v0, %v1822_v8  ;;  %v4451_v49 = vld [vmem:[#allocation5 + $0x1f0] sm:$0xff] }
 0x125   :  { %v988_v12 = vrot.slane %v987_v60, 1  ;;  %v1886_v20 = vunpack.c.l.b16 %v1502_v10  ;;  %v1902_v33 = vunpack.c.l.b16 %v1518_v34  ;;  %v2011_v16 = vsel %vm1278_vm1, %v1854_v9, %v2010_v18  ;;  %v4453_v36 = vld [vmem:[#allocation5 + $0x210] sm:$0xff] }
 0x126   :  { %v4424_v51 = vadd.f32 %v892_v35, %v891_v2  ;;  %v3186_v54 = vcombine.high %v1574_v45, %v1582_v13  ;;  %v3177_v43 = vcombine.low %v4289_v38, %v4291_v29  ;;  %v2012_v32 = vsel %vm1280_vm2, %v1870_v41, %v2011_v16  ;;  %v4462_v40 = vld [vmem:[#allocation5 + $0x250] sm:$0xff] }
 0x127   :  { %v4433_v6 = vadd.f32 %v988_v12, %v987_v60  ;;  %v2013_v30 = vsel %vm1282_vm3, %v1886_v20, %v2012_v32  ;;  %v3194_v63 = vcombine.high %v4420_v1, %v4422_v50  ;;  %v3202_v47 = vcombine.high %v4427_v31, %v4429_v37  ;;  %v4464_v22 = vld [vmem:[#allocation5 + $0x230] sm:$0xff] }
 0x128   :  { %5800 = vst [vmem:[#allocation44_spill] sm:$0xff] %v4424_v51  ;;  %v1534_v27 = vpack.c.bf16 %v4424_v51, %v4424_v51  ;;  %2806 = vmatprep.subr.bf16.mxu1 %v3186_v54  ;;  %v4466_v2 = vld [vmem:[#allocation5 + $0x270] sm:$0xff]  ;;  %v2014_v45 = vsel %vm1284_vm4, %v1902_v33, %v2013_v30  ;;  %v3201_v13 = vcombine.low %v4427_v31, %v4429_v37 }
 0x129   :  { %5801 = vst [vmem:[#allocation45_spill] sm:$0xff] %v4433_v6  ;;  %v1550_v28 = vpack.c.bf16 %v4433_v6, %v4433_v6  ;;  %2807 = vmatpush1.bf16.xpose.msra.mxu1 %v3185_v25  ;;  %v4473_v19 = vld [vmem:[#allocation5 + $0x290] sm:$0xff]  ;;  %v3218_v12 = vcombine.high %v4438_v62, %v4440_v53  ;;  %v5802_v55 = vcombine.low %v4420_v1, %v4422_v50 }
 0x12a   :  { %v1918_v58 = vunpack.c.l.b16 %v1534_v27  ;;  %v4475_v8 = vld [vmem:[#allocation5 + $0x2d0] sm:$0xff]  ;;  %2808 = vmatprep.subr.bf16.mxu1 %v3202_v47  ;;  %v5803_v61 = vcombine.high %v4431_v59, %v4436_v24  ;;  %v5805_v1 = vcombine.high %v4453_v36, %v4462_v40 }
 0x12b   :  { %v4477_v35 = vld [vmem:[#allocation5 + $0x2b0] sm:$0xff]  ;;  %v1934_v52 = vunpack.c.l.b16 %v1550_v28 }
 0x12c   :  { %v4485_v34 = vld [vmem:[#allocation5 + $0x2f0] sm:$0xff]  ;;  %v2015_v41 = vsel %vm1286_vm5, %v1918_v58, %v2014_v45 }
 0x12d   :  { %v4487_v9 = vld [vmem:[#allocation5 + $0x310] sm:$0xff]  ;;  %v2016_v54 = vsel %vm1288_vm6, %v1934_v52, %v2015_v41 }
 0x12e   :  { %v4489_v25 = vld [vmem:[#allocation5 + $0x350] sm:$0xff]  ;;  %v2062_v45 = vpack.c.b16 %v2016_v54, %v2016_v54 }
 0x12f   :  { %v4498_v37 = vld [vmem:[#allocation5 + $0x330] sm:$0xff] }
 0x130   :  { %v4500_v33 = vld [vmem:[#allocation5 + $0x370] sm:$0xff]  ;;  %2957 = vmatmul.mubr.bf16.vlgmr.msra.gmra.mrb[0].mxu0 %v2062_v45 }
 0x131   :  { %v4502_v16 = vld [vmem:[#allocation5 + $0x390] sm:$0xff]  ;;  %2965 = vmatpush1.bf16.xpose.msra.mxu0 %v3177_v43  ;;  %2809 = vmatpush1.bf16.xpose.msra.mxu1 %v3201_v13 }
 0x132   :  { %v4511_v30 = vld [vmem:[#allocation5 + $0x3d0] sm:$0xff]  ;;  %2966 = vmatprep.subr.bf16.mxu0 %v3194_v63  ;;  %2810 = vmatprep.subr.bf16.mxu1 %v3218_v12 }
 0x133   :  { %v4513_v47 = vld [vmem:[#allocation5 + $0x3b0] sm:$0xff] }
 0x134   :  { %v4515_v58 = vld [vmem:[#allocation5 + $0x3f0] sm:$0xff] }
 0x135   :  { %v4523_v32 = vld [vmem:[#allocation2 + $0x10] sm:$0xff] }
 0x136   :  { %v4525_v31 = vld [vmem:[#allocation2 + $0x50] sm:$0xff]  ;;  %v129_v0 = vunpack.c.h.bf16 %v4523_v32 }
 0x137   :  { %v4535_v52 = vld [vmem:[#allocation2 + $0x90] sm:$0xff]  ;;  %v145_v54 = vunpack.c.h.bf16 %v4525_v31 }
 0x138   :  { %v4537_v60 = vld [vmem:[#allocation2 + $0xd0] sm:$0xff]  ;;  %v161_v29 = vunpack.c.h.bf16 %v4535_v52  ;;  %v282_v51 = vrot.slane %v129_v0, 4 }
 0x139   :  { %v4547_v27 = vld [vmem:[#allocation2 + $0x110] sm:$0xff]  ;;  %v177_v43 = vunpack.c.h.bf16 %v4537_v60  ;;  %v378_v17 = vrot.slane %v145_v54, 4  ;;  %2967 = vmatpush1.bf16.xpose.msra.mxu0 %v5802_v55 }
 0x13a   :  { %v4549_v20 = vld [vmem:[#allocation2 + $0x150] sm:$0xff]  ;;  %v193_v18 = vunpack.c.h.bf16 %v4547_v27  ;;  %v474_v23 = vrot.slane %v161_v29, 4  ;;  %v283_v26 = vadd.f32 %v282_v51, %v129_v0  ;;  %2968 = vmatprep.subr.bf16.mxu0 %v5803_v61 }
 0x13b   :  { %v4556_v41 = vld [vmem:[#allocation2 + $0x190] sm:$0xff]  ;;  %v209_v6 = vunpack.c.h.bf16 %v4549_v20  ;;  %v570_v12 = vrot.slane %v177_v43, 4  ;;  %v379_v46 = vadd.f32 %v378_v17, %v145_v54 }
 0x13c   :  { %v4558_v28 = vld [vmem:[#allocation2 + $0x1d0] sm:$0xff]  ;;  %v225_v10 = vunpack.c.h.bf16 %v4556_v41  ;;  %v666_v4 = vrot.slane %v193_v18, 4  ;;  %v475_v14 = vadd.f32 %v474_v23, %v161_v29  ;;  %v284_v56 = vrot.slane %v283_v26, 2 }
 0x13d   :  { %v241_v38 = vunpack.c.h.bf16 %v4558_v28  ;;  %v762_v45 = vrot.slane %v209_v6, 4  ;;  %v571_v57 = vadd.f32 %v570_v12, %v177_v43  ;;  %v380_v15 = vrot.slane %v379_v46, 2 }
 0x13e   :  { %v858_v42 = vrot.slane %v225_v10, 4  ;;  %v667_v7 = vadd.f32 %v666_v4, %v193_v18  ;;  %v476_v21 = vrot.slane %v475_v14, 2  ;;  %v5804_v23 = vcombine.low %v4438_v62, %v4440_v53 }
 0x13f   :  { %v954_v5 = vrot.slane %v241_v38, 4  ;;  %v763_v63 = vadd.f32 %v762_v45, %v209_v6  ;;  %v572_v44 = vrot.slane %v571_v57, 2  ;;  %v285_v55 = vadd.f32 %v284_v56, %v283_v26 }
 0x140   :  { %v859_v11 = vadd.f32 %v858_v42, %v225_v10  ;;  %2811 = vmatpush1.bf16.xpose.msra.mxu1 %v5804_v23  ;;  %v668_v17 = vrot.slane %v667_v7, 2  ;;  %v381_v50 = vadd.f32 %v380_v15, %v379_v46  ;;  %v477_v6 = vadd.f32 %v476_v21, %v475_v14 }
 0x141   :  { %v955_v13 = vadd.f32 %v954_v5, %v241_v38  ;;  %v764_v4 = vrot.slane %v763_v63, 2  ;;  %2812 = vmatprep.subr.bf16.mxu1 %v5805_v1  ;;  %v573_v5 = vadd.f32 %v572_v44, %v571_v57  ;;  %v286_v54 = vrot.slane %v285_v55, 1 }
 0x142   :  { %v860_v42 = vrot.slane %v859_v11, 2  ;;  %v669_v10 = vadd.f32 %v668_v17, %v667_v7  ;;  %v382_v45 = vrot.slane %v381_v50, 1  ;;  %v478_v62 = vrot.slane %v477_v6, 1 }
 0x143   :  { %v956_v51 = vrot.slane %v955_v13, 2  ;;  %v765_v0 = vadd.f32 %v764_v4, %v763_v63  ;;  %v574_v53 = vrot.slane %v573_v5, 1  ;;  %v287_v23 = vadd.f32 %v286_v54, %v285_v55 }
 0x144   :  { %v861_v18 = vadd.f32 %v860_v42, %v859_v11  ;;  %v670_v38 = vrot.slane %v669_v10, 1  ;;  %v383_v3 = vadd.f32 %v382_v45, %v381_v50  ;;  %v479_v48 = vadd.f32 %v478_v62, %v477_v6 }
 0x145   :  { %v957_v61 = vadd.f32 %v956_v51, %v955_v13  ;;  %v766_v29 = vrot.slane %v765_v0, 1  ;;  %v575_v1 = vadd.f32 %v574_v53, %v573_v5  ;;  %v5806_v11 = vcombine.low %v4431_v59, %v4436_v24 }
 0x146   :  { %v862_v43 = vrot.slane %v861_v18, 1  ;;  %v671_v56 = vadd.f32 %v670_v38, %v669_v10  ;;  %v1025_v7 = vmul.f32 %v287_v23, %v287_v23  ;;  %v1041_v57 = vmul.f32 %v383_v3, %v383_v3 }
 0x147   :  { %v958_v12 = vrot.slane %v957_v61, 1  ;;  %v767_v15 = vadd.f32 %v766_v29, %v765_v0  ;;  %2969 = vmatpush1.bf16.xpose.msra.mxu0 %v5806_v11  ;;  %v1057_v14 = vmul.f32 %v479_v48, %v479_v48  ;;  %v1073_v46 = vmul.f32 %v575_v1, %v575_v1  ;;  %v4606_v29 = vld [vmem:[#allocation5 + $0x18] sm:$0xff]  ;;  %v4616_v11 = vld [vmem:[#allocation2 + $0xb0] sm:$0xff] }
 0x148   :  { %v863_v21 = vadd.f32 %v862_v43, %v861_v18  ;;  %v5807_v26 = vcombine.high %v4449_v39, %v4451_v49  ;;  %v5808_v63 = vcombine.low %v4453_v36, %v4462_v40  ;;  %v240_v13 = vunpack.c.l.bf16 %v4558_v28  ;;  %v4602_v40 = vld [vmem:[#allocation2 + $0x30] sm:$0xff] }
 0x149   :  { %v959_v44 = vadd.f32 %v958_v12, %v957_v61  ;;  %v1089_v17 = vmul.f32 %v671_v56, %v671_v56  ;;  %v1105_v4 = vmul.f32 %v767_v15, %v767_v15  ;;  %v5809_v59 = vcombine.high %v4473_v19, %v4475_v8 }
 0x14a   :  { %2970 = vmatprep.subr.bf16.mxu0 %v5807_v26  ;;  %2813 = vmatpush1.bf16.xpose.msra.mxu1 %v5808_v63  ;;  %v1121_v42 = vmul.f32 %v863_v21, %v863_v21  ;;  %v1318_v51 = vsel %vm1276_vm0, %v1041_v57, %v1025_v7  ;;  %v1433_v55 = vpack.c.bf16 %v287_v23, %v287_v23  ;;  %v4611_v23 = vld [vmem:[#allocation2 + $0x70] sm:$0xff] }
 0x14b   :  { %2814 = vmatprep.subr.bf16.mxu1 %v5809_v59  ;;  %v1137_v24 = vmul.f32 %v959_v44, %v959_v44  ;;  %v1449_v50 = vpack.c.bf16 %v383_v3, %v383_v3  ;;  %v1319_v6 = vsel %vm1278_vm1, %v1057_v14, %v1318_v51  ;;  %v1465_v5 = vpack.c.bf16 %v479_v48, %v479_v48  ;;  %v4608_v3 = vld [vmem:[#allocation5 + $0x58] sm:$0xff]  ;;  %v4627_v63 = vld [vmem:[#allocation2 + $0xf0] sm:$0xff] }
 0x14c   :  { %v1481_v10 = vpack.c.bf16 %v575_v1, %v575_v1  ;;  %v1497_v36 = vpack.c.bf16 %v671_v56, %v671_v56  ;;  %v1320_v0 = vsel %vm1280_vm2, %v1073_v46, %v1319_v6  ;;  %v1513_v18 = vpack.c.bf16 %v767_v15, %v767_v15  ;;  %v4640_v59 = vld [vmem:[#allocation2 + $0x170] sm:$0xff] }
 0x14d   :  { %v1529_v61 = vpack.c.bf16 %v863_v21, %v863_v21  ;;  %v1545_v54 = vpack.c.bf16 %v959_v44, %v959_v44  ;;  %v1321_v45 = vsel %vm1282_vm3, %v1089_v17, %v1320_v0  ;;  %v1817_v62 = vunpack.c.l.b16 %v1433_v55  ;;  %v4629_v17 = vld [vmem:[#allocation2 + $0x130] sm:$0xff] }
 0x14e   :  { %v1833_v53 = vunpack.c.l.b16 %v1449_v50  ;;  %v1849_v38 = vunpack.c.l.b16 %v1465_v5  ;;  %v1322_v48 = vsel %vm1284_vm4, %v1105_v4, %v1321_v45  ;;  %v1865_v43 = vunpack.c.l.b16 %v1481_v10  ;;  %v4648_v6 = vld [vmem:[#allocation2 + $0x1b0] sm:$0xff] }
 0x14f   :  { %v1881_v12 = vunpack.c.l.b16 %v1497_v36  ;;  %v136_v1 = vunpack.c.l.bf16 %v4602_v40  ;;  %v1323_v56 = vsel %vm1286_vm5, %v1121_v42, %v1322_v48  ;;  %v1897_v15 = vunpack.c.l.b16 %v1513_v18 }
 0x150   :  { %v1913_v21 = vunpack.c.l.b16 %v1529_v61  ;;  %v1975_v44 = vsel %vm1276_vm0, %v1833_v53, %v1817_v62  ;;  %v5810_v7 = vcombine.low %v4449_v39, %v4451_v49  ;;  %v4622_v57 = vsel %vm1288_vm6, %v1137_v24, %v1323_v56 }
 0x151   :  { %5811 = vst [vmem:[#allocation46_spill] sm:$0xff] %v4622_v57  ;;  %v1929_v14 = vunpack.c.l.b16 %v1545_v54  ;;  %v1976_v46 = vsel %vm1278_vm1, %v1849_v38, %v1975_v44  ;;  %v5812_v4 = vcombine.high %v4464_v22, %v4466_v2  ;;  %v5813_v39 = vcombine.low %v4473_v19, %v4475_v8  ;;  %v4650_v19 = vld [vmem:[#allocation2 + $0x1f0] sm:$0xff] }
 0x152   :  { %2971 = vmatpush1.bf16.xpose.msra.mxu0 %v5810_v7  ;;  %v1977_v49 = vsel %vm1280_vm2, %v1865_v43, %v1976_v46  ;;  %v3172_v42 = vcombine.high %v4606_v29, %v4608_v3  ;;  %v137_v24 = vunpack.c.h.bf16 %v4602_v40  ;;  %v5814_v55 = vcombine.high %v4487_v9, %v4489_v25 }
 0x153   :  { %2972 = vmatprep.subr.bf16.mxu0 %v5812_v4  ;;  %2815 = vmatpush1.bf16.xpose.msra.mxu1 %v5813_v39  ;;  %v1978_v50 = vsel %vm1282_vm3, %v1881_v12, %v1977_v49  ;;  %v153_v8 = vunpack.c.h.bf16 %v4611_v23  ;;  %v169_v10 = vunpack.c.h.bf16 %v4616_v11  ;;  %v185_v18 = vunpack.c.h.bf16 %v4627_v63 }
 0x154   :  { %2816 = vmatprep.subr.bf16.mxu1 %v5814_v55  ;;  %v1979_v36 = vsel %vm1284_vm4, %v1897_v15, %v1978_v50  ;;  %v201_v61 = vunpack.c.h.bf16 %v4629_v17  ;;  %v217_v53 = vunpack.c.h.bf16 %v4640_v59  ;;  %v233_v43 = vunpack.c.h.bf16 %v4648_v6 }
 0x155   :  { %v1980_v54 = vsel %vm1286_vm5, %v1913_v21, %v1979_v36  ;;  %v249_v12 = vunpack.c.h.bf16 %v4650_v19  ;;  %v330_v15 = vrot.slane %v137_v24, 4  ;;  %v426_v44 = vrot.slane %v153_v8, 4 }
 0x156   :  { %v1981_v38 = vsel %vm1288_vm6, %v1929_v14, %v1980_v54  ;;  %v522_v7 = vrot.slane %v169_v10, 4  ;;  %v618_v46 = vrot.slane %v185_v18, 4  ;;  %v714_v21 = vrot.slane %v201_v61, 4 }
 0x157   :  { %v2057_v56 = vpack.c.b16 %v1981_v38, %v1981_v38  ;;  %v810_v4 = vrot.slane %v217_v53, 4  ;;  %v906_v39 = vrot.slane %v233_v43, 4  ;;  %v5815_v49 = vcombine.low %v4464_v22, %v4466_v2 }
 0x158   :  { %v331_v14 = vadd.f32 %v330_v15, %v137_v24  ;;  %v427_v55 = vadd.f32 %v426_v44, %v153_v8  ;;  %v523_v50 = vadd.f32 %v522_v7, %v169_v10  ;;  %v1002_v36 = vrot.slane %v249_v12, 4 }
 0x159   :  { %2836 = vmatprep.mubr.bf16.mxu1 %v2057_v56  ;;  %v5816_v54 = vcombine.high %v4477_v35, %v4485_v34  ;;  %v5817_v38 = vcombine.low %v4487_v9, %v4489_v25  ;;  %v619_v26 = vadd.f32 %v618_v46, %v185_v18  ;;  %v715_v48 = vadd.f32 %v714_v21, %v201_v61 }
 0x15a   :  { %2973 = vmatpush1.bf16.xpose.msra.mxu0 %v5815_v49  ;;  %v811_v62 = vadd.f32 %v810_v4, %v217_v53  ;;  %v5818_v45 = vunpack.c.l.bf16 %v4523_v32  ;;  %v5819_v2 = vcombine.high %v4502_v16, %v4511_v30  ;;  %v332_v24 = vrot.slane %v331_v14, 2 }
 0x15b   :  { %2974 = vmatprep.subr.bf16.mxu0 %v5816_v54  ;;  %2817 = vmatpush1.bf16.xpose.msra.mxu1 %v5817_v38  ;;  %v428_v8 = vrot.slane %v427_v55, 2  ;;  %v524_v10 = vrot.slane %v523_v50, 2  ;;  %v907_v56 = vadd.f32 %v906_v39, %v233_v43  ;;  %v620_v15 = vrot.slane %v619_v26, 2 }
 0x15c   :  { %v4678_v22 = vrot.slane %v5818_v45, 4  ;;  %2818 = vmatprep.subr.bf16.mxu1 %v5819_v2  ;;  %v716_v44 = vrot.slane %v715_v48, 2  ;;  %v812_v7 = vrot.slane %v811_v62, 2  ;;  %v1003_v9 = vadd.f32 %v1002_v36, %v249_v12 }
 0x15d   :  { %v333_v25 = vadd.f32 %v332_v24, %v331_v14  ;;  %v429_v18 = vadd.f32 %v428_v8, %v427_v55  ;;  %v525_v61 = vadd.f32 %v524_v10, %v523_v50  ;;  %v908_v53 = vrot.slane %v907_v56, 2  ;;  %v4723_v10 = vld [vmem:[#allocation5 + $0x38] sm:$0xff] }
 0x15e   :  { %v621_v46 = vadd.f32 %v620_v15, %v619_v26  ;;  %v717_v21 = vadd.f32 %v716_v44, %v715_v48  ;;  %v813_v45 = vadd.f32 %v812_v7, %v811_v62  ;;  %v1004_v4 = vrot.slane %v1003_v9, 2 }
 0x15f   :  { %v334_v49 = vrot.slane %v333_v25, 1  ;;  %v430_v54 = vrot.slane %v429_v18, 1  ;;  %v526_v38 = vrot.slane %v525_v61, 1  ;;  %v909_v2 = vadd.f32 %v908_v53, %v907_v56  ;;  %v4725_v56 = vld [vmem:[#allocation5 + $0x78] sm:$0xff] }
 0x160   :  { %v622_v0 = vrot.slane %v621_v46, 1  ;;  %v718_v5 = vrot.slane %v717_v21, 1  ;;  %v814_v51 = vrot.slane %v813_v45, 1  ;;  %v1005_v43 = vadd.f32 %v1004_v4, %v1003_v9 }
 0x161   :  { %v5820_v39 = vcombine.low %v4477_v35, %v4485_v34  ;;  %v4686_v12 = vadd.f32 %v334_v49, %v333_v25  ;;  %v4688_v14 = vadd.f32 %v430_v54, %v429_v18  ;;  %v4690_v26 = vadd.f32 %v526_v38, %v525_v61 }
 0x162   :  { %v910_v62 = vrot.slane %v909_v2, 1  ;;  %v5824_v48 = vcombine.high %v4498_v37, %v4500_v33  ;;  %v5825_v55 = vcombine.low %v4502_v16, %v4511_v30  ;;  %v4698_v50 = vadd.f32 %v622_v0, %v621_v46 }
 0x163   :  { %2975 = vmatpush1.bf16.xpose.msra.mxu0 %v5820_v39  ;;  %5821 = vst [vmem:[#allocation47_spill] sm:$0xff] %v4686_v12  ;;  %5822 = vst [vmem:[#allocation48_spill] sm:$0xff] %v4688_v14  ;;  %v4700_v36 = vadd.f32 %v718_v5, %v717_v21  ;;  %v4702_v35 = vadd.f32 %v814_v51, %v813_v45  ;;  %v1006_v34 = vrot.slane %v1005_v43, 1  ;;  %v248_v25 = vunpack.c.l.bf16 %v4650_v19 }
 0x164   :  { %5823 = vst [vmem:[#allocation49_spill] sm:$0xff] %v4690_v26  ;;  %2976 = vmatprep.subr.bf16.mxu0 %v5824_v48  ;;  %2819 = vmatpush1.bf16.xpose.msra.mxu1 %v5825_v55  ;;  %5826 = vst [vmem:[#allocation50_spill] sm:$0xff] %v4698_v50  ;;  %v4707_v24 = vadd.f32 %v910_v62, %v909_v2  ;;  %v1441_v8 = vpack.c.bf16 %v4686_v12, %v4686_v12  ;;  %v5831_v38 = vunpack.c.l.bf16 %v4523_v32 }
 0x165   :  { %5827 = vst [vmem:[#allocation51_spill] sm:$0xff] %v4700_v36  ;;  %5828 = vst [vmem:[#allocation52_spill] sm:$0xff] %v4702_v35  ;;  %2844 = vmatprep.subr.bf16.mxu1 %v3172_v42  ;;  %v1457_v16 = vpack.c.bf16 %v4688_v14, %v4688_v14  ;;  %v1473_v30 = vpack.c.bf16 %v4690_v26, %v4690_v26  ;;  %v4715_v5 = vadd.f32 %v1006_v34, %v1005_v43 }
 0x166   :  { %5829 = vst [vmem:[#allocation53_spill] sm:$0xff] %v4707_v24  ;;  %v1489_v51 = vpack.c.bf16 %v4698_v50, %v4698_v50  ;;  %v1505_v0 = vpack.c.bf16 %v4700_v36, %v4700_v36  ;;  %v1521_v42 = vpack.c.bf16 %v4702_v35, %v4702_v35  ;;  %v1537_v15 = vpack.c.bf16 %v4707_v24, %v4707_v24 }
 0x167   :  { %5830 = vst [vmem:[#allocation54_spill] sm:$0xff] %v4715_v5  ;;  %v1825_v44 = vunpack.c.l.b16 %v1441_v8  ;;  %v1841_v7 = vunpack.c.l.b16 %v1457_v16  ;;  %v1857_v9 = vunpack.c.l.b16 %v1473_v30  ;;  %v1553_v18 = vpack.c.bf16 %v4715_v5, %v4715_v5 }
 0x168   :  { %v1873_v61 = vunpack.c.l.b16 %v1489_v51  ;;  %v1889_v53 = vunpack.c.l.b16 %v1505_v0  ;;  %v1905_v46 = vunpack.c.l.b16 %v1521_v42  ;;  %v1921_v21 = vunpack.c.l.b16 %v1537_v15 }
 0x169   :  { %v2031_v45 = vsel %vm1276_vm0, %v1841_v7, %v1825_v44  ;;  %v3180_v4 = vcombine.high %v4723_v10, %v4725_v56  ;;  %v1937_v49 = vunpack.c.l.b16 %v1553_v18  ;;  %v277_v2 = vadd.f32 %v4678_v22, %v5831_v38 }
 0x16a   :  { %v2032_v54 = vsel %vm1278_vm1, %v1857_v9, %v2031_v45  ;;  %v5832_v43 = vunpack.c.l.bf16 %v4525_v31  ;;  %v5833_v62 = vcombine.low %v4498_v37, %v4500_v33  ;;  %v5834_v55 = vunpack.c.l.bf16 %v4535_v52 }
 0x16b   :  { %v2033_v48 = vsel %vm1280_vm2, %v1873_v61, %v2032_v54  ;;  %v5835_v8 = vunpack.c.l.bf16 %v4537_v60  ;;  %v5836_v30 = vunpack.c.l.bf16 %v4547_v27  ;;  %v5837_v22 = vcombine.high %v4513_v47, %v4515_v58 }
 0x16c   :  { %v372_v39 = vrot.slane %v5832_v43, 4  ;;  %2977 = vmatpush1.bf16.xpose.msra.mxu0 %v5833_v62  ;;  %v468_v34 = vrot.slane %v5834_v55, 4  ;;  %v2034_v51 = vsel %vm1282_vm3, %v1889_v53, %v2033_v48  ;;  %v278_v0 = vrot.slane %v277_v2, 2 }
 0x16d   :  { %v564_v16 = vrot.slane %v5835_v8, 4  ;;  %v660_v32 = vrot.slane %v5836_v30, 4  ;;  %2978 = vmatprep.subr.bf16.mxu0 %v5837_v22  ;;  %v5838_v37 = vmov %v5832_v43  ;;  %v5839_v42 = vunpack.c.l.bf16 %v4549_v20 }
 0x16e   :  { %v373_v33 = vadd.f32 %v372_v39, %v5838_v37  ;;  %v2035_v44 = vsel %vm1284_vm4, %v1905_v46, %v2034_v51  ;;  %v5840_v7 = vmov %v5834_v55  ;;  %v5841_v18 = vmov %v5835_v8 }
 0x16f   :  { %v756_v15 = vrot.slane %v5839_v42, 4  ;;  %v469_v9 = vadd.f32 %v468_v34, %v5840_v7  ;;  %v565_v61 = vadd.f32 %v564_v16, %v5841_v18  ;;  %v5842_v45 = vmov %v5836_v30 }
 0x170   :  { %v661_v54 = vadd.f32 %v660_v32, %v5842_v45  ;;  %v2036_v53 = vsel %vm1286_vm5, %v1921_v21, %v2035_v44  ;;  %v279_v38 = vadd.f32 %v278_v0, %v277_v2  ;;  %v374_v43 = vrot.slane %v373_v33, 2 }
 0x171   :  { %v5843_v31 = vmov %v5839_v42  ;;  %v2037_v62 = vsel %vm1288_vm6, %v1937_v49, %v2036_v53  ;;  %v470_v48 = vrot.slane %v469_v9, 2  ;;  %v566_v46 = vrot.slane %v565_v61, 2 }
 0x172   :  { %v757_v39 = vadd.f32 %v756_v15, %v5843_v31  ;;  %v662_v55 = vrot.slane %v661_v54, 2  ;;  %v2065_v52 = vpack.c.b16 %v2037_v62, %v2037_v62  ;;  %v280_v34 = vrot.slane %v279_v38, 1 }
 0x173   :  { %v375_v8 = vadd.f32 %v374_v43, %v373_v33  ;;  %v471_v16 = vadd.f32 %v470_v48, %v469_v9  ;;  %v567_v30 = vadd.f32 %v566_v46, %v565_v61  ;;  %v5844_v32 = vunpack.c.l.bf16 %v4556_v41 }
 0x174   :  { %v758_v60 = vrot.slane %v757_v39, 2  ;;  %v663_v27 = vadd.f32 %v662_v55, %v661_v54  ;;  %2996 = vmatprep.mubr.bf16.mxu0 %v2065_v52  ;;  %v281_v2 = vadd.f32 %v280_v34, %v279_v38  ;;  %v948_v49 = vrot.slane %v240_v13, 4 }
 0x175   :  { %v852_v21 = vrot.slane %v5844_v32, 4  ;;  %v376_v22 = vrot.slane %v375_v8, 1  ;;  %v5845_v51 = vcombine.low %v4513_v47, %v4515_v58  ;;  %v472_v0 = vrot.slane %v471_v16, 1 }
 0x176   :  { %v759_v20 = vadd.f32 %v758_v60, %v757_v39  ;;  %v568_v37 = vrot.slane %v567_v30, 1  ;;  %v664_v33 = vrot.slane %v663_v27, 1  ;;  %v5846_v42 = vmov %v5844_v32 }
 0x177   :  { %2979 = vmatpush1.bf16.xpose.msra.mxu0 %v5845_v51  ;;  %v853_v15 = vadd.f32 %v852_v21, %v5846_v42  ;;  %v377_v44 = vadd.f32 %v376_v22, %v375_v8  ;;  %v949_v9 = vadd.f32 %v948_v49, %v240_v13  ;;  %v1024_v18 = vmul.f32 %v281_v2, %v281_v2 }
 0x178   :  { %3004 = vmatprep.subr.bf16.mxu0 %v3180_v4  ;;  %v760_v7 = vrot.slane %v759_v20, 1  ;;  %v473_v61 = vadd.f32 %v472_v0, %v471_v16  ;;  %v569_v45 = vadd.f32 %v568_v37, %v567_v30  ;;  %v665_v54 = vadd.f32 %v664_v33, %v663_v27 }
 0x179   :  { %v854_v53 = vrot.slane %v853_v15, 2  ;;  %v950_v47 = vrot.slane %v949_v9, 2  ;;  %v1040_v58 = vmul.f32 %v377_v44, %v377_v44  ;;  %v1432_v43 = vpack.c.bf16 %v281_v2, %v281_v2 }
 0x17a   :  { %v761_v38 = vadd.f32 %v760_v7, %v759_v20  ;;  %v1056_v39 = vmul.f32 %v473_v61, %v473_v61  ;;  %v1072_v62 = vmul.f32 %v569_v45, %v569_v45  ;;  %v1088_v41 = vmul.f32 %v665_v54, %v665_v54 }
 0x17b   :  { %v855_v31 = vadd.f32 %v854_v53, %v853_v15  ;;  %v951_v48 = vadd.f32 %v950_v47, %v949_v9  ;;  %v1311_v46 = vsel %vm1276_vm0, %v1040_v58, %v1024_v18  ;;  %v1448_v55 = vpack.c.bf16 %v377_v44, %v377_v44 }
 0x17c   :  { %v1104_v4 = vmul.f32 %v761_v38, %v761_v38  ;;  %v1312_v13 = vsel %vm1278_vm1, %v1056_v39, %v1311_v46  ;;  %v1464_v52 = vpack.c.bf16 %v473_v61, %v473_v61  ;;  %v1480_v34 = vpack.c.bf16 %v569_v45, %v569_v45 }
 0x17d   :  { %v856_v28 = vrot.slane %v855_v31, 1  ;;  %v952_v8 = vrot.slane %v951_v48, 1  ;;  %v1313_v60 = vsel %vm1280_vm2, %v1072_v62, %v1312_v13  ;;  %v1496_v16 = vpack.c.bf16 %v665_v54, %v665_v54 }
 0x17e   :  { %v1512_v30 = vpack.c.bf16 %v761_v38, %v761_v38  ;;  %v1314_v32 = vsel %vm1282_vm3, %v1088_v41, %v1313_v60  ;;  %v1816_v21 = vunpack.c.l.b16 %v1432_v43  ;;  %v1832_v2 = vunpack.c.l.b16 %v1448_v55 }
 0x17f   :  { %v857_v27 = vadd.f32 %v856_v28, %v855_v31  ;;  %v953_v22 = vadd.f32 %v952_v8, %v951_v48  ;;  %v1315_v20 = vsel %vm1284_vm4, %v1104_v4, %v1314_v32  ;;  %v1848_v49 = vunpack.c.l.b16 %v1464_v52 }
 0x180   :  { %v1864_v51 = vunpack.c.l.b16 %v1480_v34  ;;  %v1880_v33 = vunpack.c.l.b16 %v1496_v16  ;;  %v1896_v42 = vunpack.c.l.b16 %v1512_v30  ;;  %v1968_v7 = vsel %vm1276_vm0, %v1832_v2, %v1816_v21 }
 0x181   :  { %v1120_v0 = vmul.f32 %v857_v27, %v857_v27  ;;  %v1528_v37 = vpack.c.bf16 %v857_v27, %v857_v27  ;;  %v1136_v15 = vmul.f32 %v953_v22, %v953_v22  ;;  %v1544_v44 = vpack.c.bf16 %v953_v22, %v953_v22 }
 0x182   :  { %v324_v9 = vrot.slane %v136_v1, 4  ;;  %v1969_v45 = vsel %vm1278_vm1, %v1848_v49, %v1968_v7  ;;  %v5847_v54 = vunpack.c.l.bf16 %v4611_v23  ;;  %v5850_v41 = vunpack.c.l.bf16 %v4616_v11 }
 0x183   :  { %v1316_v18 = vsel %vm1286_vm5, %v1120_v0, %v1315_v20  ;;  %v1912_v61 = vunpack.c.l.b16 %v1528_v37  ;;  %v1928_v47 = vunpack.c.l.b16 %v1544_v44  ;;  %v1970_v58 = vsel %vm1280_vm2, %v1864_v51, %v1969_v45 }
 0x184   :  { %v420_v53 = vrot.slane %v5847_v54, 4  ;;  %v4794_v38 = vsel %vm1288_vm6, %v1136_v15, %v1316_v18  ;;  %v325_v43 = vadd.f32 %v324_v9, %v136_v1  ;;  %v1971_v31 = vsel %vm1282_vm3, %v1880_v33, %v1970_v58 }
 0x185   :  { %5848 = vst [vmem:[#allocation55_spill] sm:$0xff] %v4794_v38  ;;  %v5849_v39 = vmov %v5847_v54  ;;  %v516_v48 = vrot.slane %v5850_v41, 4  ;;  %v5851_v4 = vunpack.c.l.bf16 %v4627_v63  ;;  %v1972_v55 = vsel %vm1284_vm4, %v1896_v42, %v1971_v31 }
 0x186   :  { %v421_v62 = vadd.f32 %v420_v53, %v5849_v39  ;;  %v326_v28 = vrot.slane %v325_v43, 2  ;;  %v5852_v13 = vunpack.c.l.bf16 %v4629_v17  ;;  %v5853_v40 = vunpack.c.l.bf16 %v4640_v59 }
 0x187   :  { %v612_v46 = vrot.slane %v5851_v4, 4  ;;  %v1973_v34 = vsel %vm1286_vm5, %v1912_v61, %v1972_v55  ;;  %v5854_v23 = vmov %v5850_v41  ;;  %v5855_v16 = vmov %v5851_v4  ;;  %v1583_v55 = vld [vmem:[#allocation5 + $0xd8] sm:$0xff] }
 0x188   :  { %v708_v52 = vrot.slane %v5852_v13, 4  ;;  %v804_v1 = vrot.slane %v5853_v40, 4  ;;  %v422_v8 = vrot.slane %v421_v62, 2  ;;  %v517_v60 = vadd.f32 %v516_v48, %v5854_v23 }
 0x189   :  { %v613_v30 = vadd.f32 %v612_v46, %v5855_v16  ;;  %v1974_v27 = vsel %vm1288_vm6, %v1928_v47, %v1973_v34  ;;  %v327_v32 = vadd.f32 %v326_v28, %v325_v43  ;;  %v5856_v21 = vmov %v5852_v13  ;;  %v1575_v46 = vld [vmem:[#allocation5 + $0x98] sm:$0xff] }
 0x18a   :  { %v709_v2 = vadd.f32 %v708_v52, %v5856_v21  ;;  %v5857_v22 = vmov %v5853_v40  ;;  %v2056_v49 = vpack.c.b16 %v1974_v27, %v1974_v27  ;;  %v423_v51 = vadd.f32 %v422_v8, %v421_v62 }
 0x18b   :  { %v805_v20 = vadd.f32 %v804_v1, %v5857_v22  ;;  %v518_v0 = vrot.slane %v517_v60, 2  ;;  %v614_v37 = vrot.slane %v613_v30, 2  ;;  %v328_v33 = vrot.slane %v327_v32, 1  ;;  %v4859_v22 = vld [vmem:[#allocation5 + $0x158] sm:$0xff] }
 0x18c   :  { %v710_v42 = vrot.slane %v709_v2, 2  ;;  %v5858_v15 = vunpack.c.l.bf16 %v4648_v6  ;;  %2837 = vmatmul.mubr.bf16.vlgmr.msra.gmra.mrb[0].mxu1 %v2056_v49  ;;  %v424_v44 = vrot.slane %v423_v51, 1  ;;  %v996_v17 = vrot.slane %v248_v25, 4 }
 0x18d   :  { %v806_v11 = vrot.slane %v805_v20, 2  ;;  %v519_v7 = vadd.f32 %v518_v0, %v517_v60  ;;  %v615_v9 = vadd.f32 %v614_v37, %v613_v30  ;;  %v5859_v59 = vcombine.low %v4606_v29, %v4608_v3 }
 0x18e   :  { %v900_v63 = vrot.slane %v5858_v15, 4  ;;  %v4828_v18 = vadd.f32 %v328_v33, %v327_v32  ;;  %v711_v61 = vadd.f32 %v710_v42, %v709_v2  ;;  %v5861_v54 = vmov %v5858_v15  ;;  %v4857_v2 = vld [vmem:[#allocation5 + $0x118] sm:$0xff] }
 0x18f   :  { %2845 = vmatpush1.bf16.xpose.msra.mxu1 %v5859_v59  ;;  %v807_v45 = vadd.f32 %v806_v11, %v805_v20  ;;  %v4832_v47 = vadd.f32 %v424_v44, %v423_v51  ;;  %v520_v58 = vrot.slane %v519_v7, 1  ;;  %v616_v43 = vrot.slane %v615_v9, 1 }
 0x190   :  { %5860 = vst [vmem:[#allocation56_spill] sm:$0xff] %v4828_v18  ;;  %v901_v53 = vadd.f32 %v900_v63, %v5861_v54  ;;  %v997_v31 = vadd.f32 %v996_v17, %v248_v25  ;;  %v712_v39 = vrot.slane %v711_v61, 1  ;;  %v1440_v29 = vpack.c.bf16 %v4828_v18, %v4828_v18  ;;  %v5869_v17 = vld [vmem:[#allocation12_spill] sm:$0xff] }
 0x191   :  { %5862 = vst [vmem:[#allocation57_spill] sm:$0xff] %v4832_v47  ;;  %v808_v62 = vrot.slane %v807_v45, 1  ;;  %v4838_v3 = vadd.f32 %v520_v58, %v519_v7  ;;  %v4840_v48 = vadd.f32 %v616_v43, %v615_v9  ;;  %v1456_v6 = vpack.c.bf16 %v4832_v47, %v4832_v47  ;;  %v4874_v7 = vld [vmem:[#allocation5 + $0xb8] sm:$0xff] }
 0x192   :  { %v902_v41 = vrot.slane %v901_v53, 2  ;;  %v998_v4 = vrot.slane %v997_v31, 2  ;;  %v4844_v28 = vadd.f32 %v712_v39, %v711_v61  ;;  %v1824_v13 = vunpack.c.l.b16 %v1440_v29  ;;  %v4876_v9 = vld [vmem:[#allocation5 + $0xf8] sm:$0xff]  ;;  %v5871_v61 = vld [vmem:[#allocation13_spill] sm:$0xff] }
 0x193   :  { %5863 = vst [vmem:[#allocation58_spill] sm:$0xff] %v4838_v3  ;;  %5864 = vst [vmem:[#allocation59_spill] sm:$0xff] %v4840_v48  ;;  %v4846_v19 = vadd.f32 %v808_v62, %v807_v45  ;;  %v1472_v40 = vpack.c.bf16 %v4838_v3, %v4838_v3  ;;  %v1488_v1 = vpack.c.bf16 %v4840_v48, %v4840_v48  ;;  %v1840_v34 = vunpack.c.l.b16 %v1456_v6  ;;  %v4887_v58 = vld [vmem:[#allocation5 + $0x138] sm:$0xff] }
 0x194   :  { %5865 = vst [vmem:[#allocation60_spill] sm:$0xff] %v4844_v28  ;;  %v903_v25 = vadd.f32 %v902_v41, %v901_v53  ;;  %v999_v52 = vadd.f32 %v998_v4, %v997_v31  ;;  %v1504_v23 = vpack.c.bf16 %v4844_v28, %v4844_v28  ;;  %v3187_v16 = vcombine.low %v1575_v46, %v1583_v55  ;;  %v4889_v43 = vld [vmem:[#allocation5 + $0x178] sm:$0xff]  ;;  %v5875_v41 = vld [vmem:[#allocation15_spill] sm:$0xff]  ;;  %v5877_v4 = vld [vmem:[#allocation16_spill] sm:$0xff] }
 0x195   :  { %5866 = vst [vmem:[#allocation61_spill] sm:$0xff] %v4846_v19  ;;  %v1520_v60 = vpack.c.bf16 %v4846_v19, %v4846_v19  ;;  %v1856_v27 = vunpack.c.l.b16 %v1472_v40  ;;  %v1872_v32 = vunpack.c.l.b16 %v1488_v1  ;;  %v2024_v21 = vsel %vm1276_vm0, %v1840_v34, %v1824_v13  ;;  %v4891_v31 = vld [vmem:[#allocation5 + $0x198] sm:$0xff] }
 0x196   :  { %v904_v8 = vrot.slane %v903_v25, 1  ;;  %v1000_v30 = vrot.slane %v999_v52, 1  ;;  %v1888_v49 = vunpack.c.l.b16 %v1504_v23  ;;  %v3188_v0 = vcombine.high %v1575_v46, %v1583_v55  ;;  %v5873_v39 = vld [vmem:[#allocation14_spill] sm:$0xff] }
 0x197   :  { %v1904_v51 = vunpack.c.l.b16 %v1520_v60  ;;  %v2025_v33 = vsel %vm1278_vm1, %v1856_v27, %v2024_v21  ;;  %v3204_v15 = vcombine.high %v4857_v2, %v4859_v22  ;;  %v4880_v59 = vmul.f32 %v5869_v17, %v5869_v17  ;;  %v4905_v55 = vld [vmem:[#allocation5 + $0x1d8] sm:$0xff] }
 0x198   :  { %v4861_v20 = vadd.f32 %v904_v8, %v903_v25  ;;  %v4863_v37 = vadd.f32 %v1000_v30, %v999_v52  ;;  %v2026_v11 = vsel %vm1280_vm2, %v1872_v32, %v2025_v33  ;;  %2846 = vmatprep.subr.bf16.mxu1 %v3188_v0  ;;  %v4884_v45 = vmul.f32 %v5871_v61, %v5871_v61  ;;  %v4907_v25 = vld [vmem:[#allocation5 + $0x1b8] sm:$0xff]  ;;  %v5879_v52 = vld [vmem:[#allocation17_spill] sm:$0xff]  ;;  %v5883_v8 = vld [vmem:[#allocation19_spill] sm:$0xff] }
 0x199   :  { %v2027_v44 = vsel %vm1282_vm3, %v1888_v49, %v2026_v11  ;;  %2847 = vmatpush1.bf16.xpose.msra.mxu1 %v3187_v16  ;;  %5870 = vst [vmem:[#allocation12_spill] sm:$0xff] %v4880_v59  ;;  %v4895_v62 = vmul.f32 %v5873_v39, %v5873_v39  ;;  %v4899_v29 = vmul.f32 %v5875_v41, %v5875_v41  ;;  %v4909_v13 = vld [vmem:[#allocation5 + $0x1f8] sm:$0xff]  ;;  %v5885_v32 = vld [vmem:[#allocation20_spill] sm:$0xff] }
 0x19a   :  { %5867 = vst [vmem:[#allocation62_spill] sm:$0xff] %v4861_v20  ;;  %5868 = vst [vmem:[#allocation63_spill] sm:$0xff] %v4863_v37  ;;  %v1536_v42 = vpack.c.bf16 %v4861_v20, %v4861_v20  ;;  %v1552_v63 = vpack.c.bf16 %v4863_v37, %v4863_v37  ;;  %v2028_v53 = vsel %vm1284_vm4, %v1904_v51, %v2027_v44  ;;  %2848 = vmatprep.subr.bf16.mxu1 %v3204_v15  ;;  %v5881_v1 = vld [vmem:[#allocation18_spill] sm:$0xff] }
 0x19b   :  { %5872 = vst [vmem:[#allocation13_spill] sm:$0xff] %v4884_v45  ;;  %5874 = vst [vmem:[#allocation14_spill] sm:$0xff] %v4895_v62  ;;  %v4903_v6 = vmul.f32 %v5877_v4, %v5877_v4  ;;  %v4913_v40 = vmul.f32 %v5879_v52, %v5879_v52  ;;  %v4917_v34 = vmul.f32 %v5881_v1, %v5881_v1  ;;  %v4924_v16 = vld [vmem:[#allocation5 + $0x218] sm:$0xff] }
 0x19c   :  { %v1920_v54 = vunpack.c.l.b16 %v1536_v42  ;;  %5876 = vst [vmem:[#allocation15_spill] sm:$0xff] %v4899_v29  ;;  %v1936_v46 = vunpack.c.l.b16 %v1552_v63  ;;  %v4921_v23 = vmul.f32 %v5883_v8, %v5883_v8  ;;  %v4926_v30 = vld [vmem:[#allocation5 + $0x258] sm:$0xff]  ;;  %v4932_v21 = vmul.f32 %v5885_v32, %v5885_v32 }
 0x19d   :  { %5878 = vst [vmem:[#allocation16_spill] sm:$0xff] %v4903_v6  ;;  %5880 = vst [vmem:[#allocation17_spill] sm:$0xff] %v4913_v40  ;;  %v4928_v27 = vld [vmem:[#allocation5 + $0x238] sm:$0xff]  ;;  %v3179_v49 = vcombine.low %v4723_v10, %v4725_v56  ;;  %v3203_v0 = vcombine.low %v4857_v2, %v4859_v22  ;;  %v3195_v63 = vcombine.low %v4874_v7, %v4876_v9 }
 0x19e   :  { %5882 = vst [vmem:[#allocation18_spill] sm:$0xff] %v4917_v34  ;;  %5884 = vst [vmem:[#allocation19_spill] sm:$0xff] %v4921_v23  ;;  %v2029_v60 = vsel %vm1286_vm5, %v1920_v54, %v2028_v53  ;;  %v4939_v33 = vld [vmem:[#allocation5 + $0x278] sm:$0xff]  ;;  %v3196_v44 = vcombine.high %v4874_v7, %v4876_v9  ;;  %v3220_v10 = vcombine.high %v4891_v31, %v4905_v55 }
 0x19f   :  { %5886 = vst [vmem:[#allocation20_spill] sm:$0xff] %v4932_v21  ;;  %v2030_v51 = vsel %vm1288_vm6, %v1936_v46, %v2029_v60  ;;  %v4941_v42 = vld [vmem:[#allocation5 + $0x298] sm:$0xff]  ;;  %v3212_v61 = vcombine.high %v4887_v58, %v4889_v43  ;;  %v3219_v54 = vcombine.low %v4891_v31, %v4905_v55  ;;  %v3236_v46 = vcombine.high %v4924_v16, %v4926_v30 }
 0x1a0   :  { %v4943_v11 = vld [vmem:[#allocation2 + $0x18] sm:$0xff]  ;;  %v2064_v15 = vpack.c.b16 %v2030_v51, %v2030_v51  ;;  %v5896_v62 = vcombine.high %v4928_v27, %v4939_v33 }
 0x1a1   :  { %v4951_v56 = vld [vmem:[#allocation5 + $0x2d8] sm:$0xff]  ;;  %v131_v1 = vunpack.c.h.bf16 %v4943_v11  ;;  %2849 = vmatpush1.bf16.xpose.msra.mxu1 %v3203_v0 }
 0x1a2   :  { %v4953_v17 = vld [vmem:[#allocation2 + $0x58] sm:$0xff]  ;;  %2997 = vmatmul.mubr.bf16.vlgmr.msra.gmra.mrb[0].mxu0 %v2064_v15  ;;  %2850 = vmatprep.subr.bf16.mxu1 %v3220_v10 }
 0x1a3   :  { %v4955_v2 = vld [vmem:[#allocation2 + $0x98] sm:$0xff]  ;;  %3005 = vmatpush1.bf16.xpose.msra.mxu0 %v3179_v49  ;;  %v147_v7 = vunpack.c.h.bf16 %v4953_v17  ;;  %v294_v0 = vrot.slane %v131_v1, 4 }
 0x1a4   :  { %v4965_v9 = vld [vmem:[#allocation5 + $0x2b8] sm:$0xff]  ;;  %v163_v41 = vunpack.c.h.bf16 %v4955_v2  ;;  %3006 = vmatprep.subr.bf16.mxu0 %v3196_v44 }
 0x1a5   :  { %v4967_v53 = vld [vmem:[#allocation2 + $0xd8] sm:$0xff]  ;;  %v390_v37 = vrot.slane %v147_v7, 4  ;;  %v295_v57 = vadd.f32 %v294_v0, %v131_v1 }
 0x1a6   :  { %v4969_v39 = vld [vmem:[#allocation2 + $0x118] sm:$0xff]  ;;  %v179_v8 = vunpack.c.h.bf16 %v4967_v53  ;;  %v486_v24 = vrot.slane %v163_v41, 4 }
 0x1a7   :  { %v4977_v31 = vld [vmem:[#allocation5 + $0x2f8] sm:$0xff]  ;;  %v195_v60 = vunpack.c.h.bf16 %v4969_v39  ;;  %v391_v4 = vadd.f32 %v390_v37, %v147_v7  ;;  %v296_v23 = vrot.slane %v295_v57, 2 }
 0x1a8   :  { %v4979_v55 = vld [vmem:[#allocation2 + $0x158] sm:$0xff]  ;;  %v582_v20 = vrot.slane %v179_v8, 4  ;;  %v487_v22 = vadd.f32 %v486_v24, %v163_v41 }
 0x1a9   :  { %v4981_v52 = vld [vmem:[#allocation2 + $0x198] sm:$0xff]  ;;  %v211_v5 = vunpack.c.h.bf16 %v4979_v55  ;;  %v678_v35 = vrot.slane %v195_v60, 4  ;;  %v392_v34 = vrot.slane %v391_v4, 2  ;;  %2851 = vmatpush1.bf16.xpose.msra.mxu1 %v3219_v54  ;;  %v297_v1 = vadd.f32 %v296_v23, %v295_v57 }
 0x1aa   :  { %v4988_v32 = vld [vmem:[#allocation5 + $0x318] sm:$0xff]  ;;  %v227_v44 = vunpack.c.h.bf16 %v4981_v52  ;;  %v583_v28 = vadd.f32 %v582_v20, %v179_v8  ;;  %v488_v40 = vrot.slane %v487_v22, 2  ;;  %2852 = vmatprep.subr.bf16.mxu1 %v3236_v46 }
 0x1ab   :  { %v4990_v51 = vld [vmem:[#allocation5 + $0x358] sm:$0xff]  ;;  %v774_v19 = vrot.slane %v211_v5, 4  ;;  %v679_v50 = vadd.f32 %v678_v35, %v195_v60  ;;  %3007 = vmatpush1.bf16.xpose.msra.mxu0 %v3195_v63  ;;  %v393_v37 = vadd.f32 %v392_v34, %v391_v4  ;;  %v298_v20 = vrot.slane %v297_v1, 1 }
 0x1ac   :  { %v4992_v15 = vld [vmem:[#allocation2 + $0x1d8] sm:$0xff]  ;;  %v870_v38 = vrot.slane %v227_v44, 4  ;;  %v584_v6 = vrot.slane %v583_v28, 2  ;;  %3008 = vmatprep.subr.bf16.mxu0 %v3212_v61  ;;  %v5897_v45 = vcombine.high %v4988_v32, %v4990_v51 }
 0x1ad   :  { %v243_v49 = vunpack.c.h.bf16 %v4992_v15  ;;  %v775_v48 = vadd.f32 %v774_v19, %v211_v5  ;;  %v680_v3 = vrot.slane %v679_v50, 2  ;;  %v5011_v24 = vld [vmem:[#allocation5 + $0x338] sm:$0xff]  ;;  %v489_v5 = vadd.f32 %v488_v40, %v487_v22 }
 0x1ae   :  { %v871_v26 = vadd.f32 %v870_v38, %v227_v44  ;;  %v5013_v35 = vld [vmem:[#allocation5 + $0x378] sm:$0xff]  ;;  %v585_v19 = vadd.f32 %v584_v6, %v583_v28  ;;  %v394_v63 = vrot.slane %v393_v37, 1  ;;  %v5027_v28 = vadd.f32 %v298_v20, %v297_v1 }
 0x1af   :  { %v966_v36 = vrot.slane %v243_v49, 4  ;;  %v776_v29 = vrot.slane %v775_v48, 2  ;;  %v681_v38 = vadd.f32 %v680_v3, %v679_v50  ;;  %v490_v8 = vrot.slane %v489_v5, 1  ;;  %v5019_v23 = vld [vmem:[#allocation5 + $0x398] sm:$0xff] }
 0x1b0   :  { %v872_v7 = vrot.slane %v871_v26, 2  ;;  %v586_v60 = vrot.slane %v585_v19, 1  ;;  %v5021_v40 = vld [vmem:[#allocation5 + $0x3d8] sm:$0xff]  ;;  %v5891_v1 = vcombine.low %v4924_v16, %v4926_v30 }
 0x1b1   :  { %v967_v10 = vadd.f32 %v966_v36, %v243_v49  ;;  %v777_v36 = vadd.f32 %v776_v29, %v775_v48  ;;  %v682_v61 = vrot.slane %v681_v38, 1  ;;  %v5023_v48 = vld [vmem:[#allocation5 + $0x3b8] sm:$0xff]  ;;  %v5029_v29 = vadd.f32 %v394_v63, %v393_v37 }
 0x1b2   :  { %v873_v54 = vadd.f32 %v872_v7, %v871_v26  ;;  %v5025_v26 = vld [vmem:[#allocation5 + $0x3f8] sm:$0xff]  ;;  %v5031_v6 = vadd.f32 %v490_v8, %v489_v5  ;;  %v5033_v22 = vadd.f32 %v586_v60, %v585_v19  ;;  %v5890_v7 = vcombine.low %v4887_v58, %v4889_v43  ;;  %2853 = vmatpush1.bf16.xpose.msra.mxu1 %v5891_v1 }
 0x1b3   :  { %v968_v0 = vrot.slane %v967_v10, 2  ;;  %v778_v46 = vrot.slane %v777_v36, 1  ;;  %v5035_v4 = vadd.f32 %v682_v61, %v681_v38  ;;  %v5892_v19 = vcombine.high %v4907_v25, %v4909_v13  ;;  %v5089_v43 = vld [vmem:[#allocation2 + $0xf8] sm:$0xff] }
 0x1b4   :  { %v874_v50 = vrot.slane %v873_v54, 1  ;;  %3009 = vmatpush1.bf16.xpose.msra.mxu0 %v5890_v7  ;;  %v5893_v58 = vcombine.high %v4941_v42, %v4951_v56  ;;  %v1451_v20 = vpack.c.bf16 %v5029_v29, %v5029_v29  ;;  %v1467_v63 = vpack.c.bf16 %v5031_v6, %v5031_v6  ;;  %v5101_v57 = vld [vmem:[#allocation2 + $0x1b8] sm:$0xff] }
 0x1b5   :  { %v969_v41 = vadd.f32 %v968_v0, %v967_v10  ;;  %v5037_v49 = vadd.f32 %v778_v46, %v777_v36  ;;  %3010 = vmatprep.subr.bf16.mxu0 %v5892_v19  ;;  %v1435_v36 = vpack.c.bf16 %v5027_v28, %v5027_v28  ;;  %v5083_v46 = vld [vmem:[#allocation2 + $0x38] sm:$0xff]  ;;  %v187_v38 = vunpack.c.h.bf16 %v5089_v43 }
 0x1b6   :  { %v5039_v44 = vadd.f32 %v874_v50, %v873_v54  ;;  %2854 = vmatprep.subr.bf16.mxu1 %v5893_v58  ;;  %v1483_v54 = vpack.c.bf16 %v5033_v22, %v5033_v22  ;;  %v1851_v7 = vunpack.c.l.b16 %v1467_v63  ;;  %v5085_v19 = vld [vmem:[#allocation2 + $0x78] sm:$0xff] }
 0x1b7   :  { %v970_v3 = vrot.slane %v969_v41, 1  ;;  %5887 = vst [vmem:[#allocation64_spill] sm:$0xff] %v5037_v49  ;;  %v1515_v8 = vpack.c.bf16 %v5037_v49, %v5037_v49  ;;  %v1819_v50 = vunpack.c.l.b16 %v1435_v36  ;;  %v5087_v58 = vld [vmem:[#allocation2 + $0xb8] sm:$0xff]  ;;  %v155_v34 = vunpack.c.h.bf16 %v5085_v19 }
 0x1b8   :  { %5888 = vst [vmem:[#allocation65_spill] sm:$0xff] %v5039_v44  ;;  %v1531_v60 = vpack.c.bf16 %v5039_v44, %v5039_v44  ;;  %v1867_v1 = vunpack.c.l.b16 %v1483_v54  ;;  %v5094_v0 = vld [vmem:[#allocation2 + $0x138] sm:$0xff]  ;;  %v139_v54 = vunpack.c.h.bf16 %v5083_v46  ;;  %v5898_v49 = vcombine.low %v4928_v27, %v4939_v33 }
 0x1b9   :  { %v5041_v10 = vadd.f32 %v970_v3, %v969_v41  ;;  %v1499_v41 = vpack.c.bf16 %v5035_v4, %v5035_v4  ;;  %v1835_v3 = vunpack.c.l.b16 %v1451_v20  ;;  %v1899_v30 = vunpack.c.l.b16 %v1515_v8  ;;  %v5097_v63 = vld [vmem:[#allocation2 + $0x178] sm:$0xff] }
 0x1ba   :  { %v1915_v36 = vunpack.c.l.b16 %v1531_v60  ;;  %v5103_v16 = vld [vmem:[#allocation2 + $0x1f8] sm:$0xff]  ;;  %v5894_v8 = vcombine.low %v4907_v25, %v4909_v13  ;;  %v5895_v60 = vcombine.low %v4941_v42, %v4951_v56  ;;  %v219_v56 = vunpack.c.h.bf16 %v5097_v63 }
 0x1bb   :  { %5889 = vst [vmem:[#allocation66_spill] sm:$0xff] %v5041_v10  ;;  %v1547_v61 = vpack.c.bf16 %v5041_v10, %v5041_v10  ;;  %v1883_v37 = vunpack.c.l.b16 %v1499_v41  ;;  %v1989_v20 = vsel %vm1276_vm0, %v1835_v3, %v1819_v50  ;;  %v171_v41 = vunpack.c.h.bf16 %v5087_v58 }
 0x1bc   :  { %v1990_v5 = vsel %vm1278_vm1, %v1851_v7, %v1989_v20  ;;  %3011 = vmatpush1.bf16.xpose.msra.mxu0 %v5894_v8  ;;  %2855 = vmatpush1.bf16.xpose.msra.mxu1 %v5895_v60  ;;  %v203_v20 = vunpack.c.h.bf16 %v5094_v0  ;;  %v342_v8 = vrot.slane %v139_v54, 4  ;;  %v438_v60 = vrot.slane %v155_v34, 4 }
 0x1bd   :  { %v1931_v3 = vunpack.c.l.b16 %v1547_v61  ;;  %v1991_v7 = vsel %vm1280_vm2, %v1867_v1, %v1990_v5  ;;  %3012 = vmatprep.subr.bf16.mxu0 %v5896_v62  ;;  %2856 = vmatprep.subr.bf16.mxu1 %v5897_v45  ;;  %v235_v61 = vunpack.c.h.bf16 %v5101_v57  ;;  %v251_v1 = vunpack.c.h.bf16 %v5103_v16 }
 0x1be   :  { %v1992_v42 = vsel %vm1282_vm3, %v1883_v37, %v1991_v7  ;;  %v534_v50 = vrot.slane %v171_v41, 4  ;;  %v630_v45 = vrot.slane %v187_v38, 4  ;;  %v343_v59 = vadd.f32 %v342_v8, %v139_v54 }
 0x1bf   :  { %v1993_v5 = vsel %vm1284_vm4, %v1899_v30, %v1992_v42  ;;  %v726_v13 = vrot.slane %v203_v20, 4  ;;  %v822_v21 = vrot.slane %v219_v56, 4  ;;  %v439_v7 = vadd.f32 %v438_v60, %v155_v34 }
 0x1c0   :  { %v1994_v62 = vsel %vm1286_vm5, %v1915_v36, %v1993_v5  ;;  %v535_v14 = vadd.f32 %v534_v50, %v171_v41  ;;  %v631_v47 = vadd.f32 %v630_v45, %v187_v38  ;;  %v344_v30 = vrot.slane %v343_v59, 2 }
 0x1c1   :  { %v1995_v25 = vsel %vm1288_vm6, %v1931_v3, %v1994_v62  ;;  %v727_v42 = vadd.f32 %v726_v13, %v203_v20  ;;  %v823_v12 = vadd.f32 %v822_v21, %v219_v56  ;;  %v918_v18 = vrot.slane %v235_v61, 4 }
 0x1c2   :  { %v2059_v37 = vpack.c.b16 %v1995_v25, %v1995_v25  ;;  %v440_v10 = vrot.slane %v439_v7, 2  ;;  %v536_v44 = vrot.slane %v535_v14, 2  ;;  %v632_v36 = vrot.slane %v631_v47, 2 }
 0x1c3   :  { %v1014_v5 = vrot.slane %v251_v1, 4  ;;  %v5899_v54 = vcombine.low %v4988_v32, %v4990_v51  ;;  %v345_v34 = vadd.f32 %v344_v30, %v343_v59  ;;  %v728_v41 = vrot.slane %v727_v42, 2 }
 0x1c4   :  { %2876 = vmatprep.mubr.bf16.mxu1 %v2059_v37  ;;  %3013 = vmatpush1.bf16.xpose.msra.mxu0 %v5898_v49  ;;  %v824_v38 = vrot.slane %v823_v12, 2  ;;  %v919_v50 = vadd.f32 %v918_v18, %v235_v61  ;;  %v5900_v21 = vcombine.high %v4965_v9, %v4977_v31  ;;  %v5901_v3 = vcombine.high %v5019_v23, %v5021_v40 }
 0x1c5   :  { %2857 = vmatpush1.bf16.xpose.msra.mxu1 %v5899_v54  ;;  %v441_v20 = vadd.f32 %v440_v10, %v439_v7  ;;  %v537_v25 = vadd.f32 %v536_v44, %v535_v14  ;;  %v633_v27 = vadd.f32 %v632_v36, %v631_v47  ;;  %v5902_v33 = vunpack.c.l.bf16 %v4943_v11 }
 0x1c6   :  { %3014 = vmatprep.subr.bf16.mxu0 %v5900_v21  ;;  %2858 = vmatprep.subr.bf16.mxu1 %v5901_v3  ;;  %v346_v32 = vrot.slane %v345_v34, 1  ;;  %v729_v51 = vadd.f32 %v728_v41, %v727_v42  ;;  %v825_v59 = vadd.f32 %v824_v38, %v823_v12  ;;  %v920_v13 = vrot.slane %v919_v50, 2 }
 0x1c7   :  { %v288_v49 = vrot.slane %v5902_v33, 4  ;;  %v442_v56 = vrot.slane %v441_v20, 1  ;;  %v538_v18 = vrot.slane %v537_v25, 1  ;;  %v634_v61 = vrot.slane %v633_v27, 1 }
 0x1c8   :  { %v1015_v8 = vadd.f32 %v1014_v5, %v251_v1  ;;  %v5146_v62 = vadd.f32 %v346_v32, %v345_v34  ;;  %v730_v60 = vrot.slane %v729_v51, 1  ;;  %v826_v45 = vrot.slane %v825_v59, 1 }
 0x1c9   :  { %v921_v37 = vadd.f32 %v920_v13, %v919_v50  ;;  %v5148_v30 = vadd.f32 %v442_v56, %v441_v20  ;;  %v5150_v14 = vadd.f32 %v538_v18, %v537_v25  ;;  %v5152_v47 = vadd.f32 %v634_v61, %v633_v27 }
 0x1ca   :  { %v1016_v44 = vrot.slane %v1015_v8, 2  ;;  %v5154_v10 = vadd.f32 %v730_v60, %v729_v51  ;;  %v5156_v12 = vadd.f32 %v826_v45, %v825_v59  ;;  %v1443_v1 = vpack.c.bf16 %v5146_v62, %v5146_v62 }
 0x1cb   :  { %v922_v7 = vrot.slane %v921_v37, 1  ;;  %v1459_v36 = vpack.c.bf16 %v5148_v30, %v5148_v30  ;;  %v1475_v5 = vpack.c.bf16 %v5150_v14, %v5150_v14  ;;  %v1491_v54 = vpack.c.bf16 %v5152_v47, %v5152_v47 }
 0x1cc   :  { %v1017_v42 = vadd.f32 %v1016_v44, %v1015_v8  ;;  %v5903_v34 = vcombine.low %v4965_v9, %v4977_v31  ;;  %v5904_v41 = vcombine.low %v5019_v23, %v5021_v40  ;;  %v1507_v50 = vpack.c.bf16 %v5154_v10, %v5154_v10 }
 0x1cd   :  { %v5172_v38 = vadd.f32 %v922_v7, %v921_v37  ;;  %v1523_v21 = vpack.c.bf16 %v5156_v12, %v5156_v12  ;;  %v1827_v3 = vunpack.c.l.b16 %v1443_v1  ;;  %v5905_v20 = vcombine.high %v5011_v24, %v5013_v35 }
 0x1ce   :  { %3015 = vmatpush1.bf16.xpose.msra.mxu0 %v5903_v34  ;;  %2859 = vmatpush1.bf16.xpose.msra.mxu1 %v5904_v41  ;;  %v1018_v25 = vrot.slane %v1017_v42, 1  ;;  %v1843_v9 = vunpack.c.l.b16 %v1459_v36  ;;  %v1859_v31 = vunpack.c.l.b16 %v1475_v5  ;;  %v1875_v27 = vunpack.c.l.b16 %v1491_v54 }
 0x1cf   :  { %3016 = vmatprep.subr.bf16.mxu0 %v5905_v20  ;;  %v1539_v23 = vpack.c.bf16 %v5172_v38, %v5172_v38  ;;  %v1891_v40 = vunpack.c.l.b16 %v1507_v50  ;;  %v1907_v33 = vunpack.c.l.b16 %v1523_v21  ;;  %v5906_v32 = vunpack.c.l.bf16 %v4943_v11 }
 0x1d0   :  { %v5185_v59 = vadd.f32 %v1018_v25, %v1017_v42  ;;  %v2045_v13 = vsel %vm1276_vm0, %v1843_v9, %v1827_v3  ;;  %v5907_v56 = vunpack.c.l.bf16 %v4953_v17  ;;  %v5908_v61 = vunpack.c.l.bf16 %v4955_v2 }
 0x1d1   :  { %v289_v51 = vadd.f32 %v288_v49, %v5906_v32  ;;  %v1923_v60 = vunpack.c.l.b16 %v1539_v23  ;;  %v2046_v45 = vsel %vm1278_vm1, %v1859_v31, %v2045_v13  ;;  %v5909_v44 = vunpack.c.l.bf16 %v4967_v53 }
 0x1d2   :  { %v384_v18 = vrot.slane %v5907_v56, 4  ;;  %v480_v8 = vrot.slane %v5908_v61, 4  ;;  %v1555_v11 = vpack.c.bf16 %v5185_v59, %v5185_v59  ;;  %v2047_v49 = vsel %vm1280_vm2, %v1875_v27, %v2046_v45 }
 0x1d3   :  { %v290_v37 = vrot.slane %v289_v51, 2  ;;  %v576_v7 = vrot.slane %v5909_v44, 4  ;;  %v5910_v1 = vmov %v5907_v56  ;;  %v5911_v36 = vmov %v5908_v61 }
 0x1d4   :  { %v385_v42 = vadd.f32 %v384_v18, %v5910_v1  ;;  %v481_v5 = vadd.f32 %v480_v8, %v5911_v36  ;;  %v2048_v54 = vsel %vm1282_vm3, %v1891_v40, %v2047_v49  ;;  %v5912_v41 = vmov %v5909_v44 }
 0x1d5   :  { %v291_v34 = vadd.f32 %v290_v37, %v289_v51  ;;  %v577_v50 = vadd.f32 %v576_v7, %v5912_v41  ;;  %v5913_v21 = vunpack.c.l.bf16 %v4969_v39  ;;  %v1939_v20 = vunpack.c.l.b16 %v1555_v11 }
 0x1d6   :  { %v2049_v25 = vsel %vm1284_vm4, %v1907_v33, %v2048_v54  ;;  %v386_v9 = vrot.slane %v385_v42, 2  ;;  %v482_v31 = vrot.slane %v481_v5, 2  ;;  %v5914_v17 = vcombine.low %v5011_v24, %v5013_v35 }
 0x1d7   :  { %v672_v3 = vrot.slane %v5913_v21, 4  ;;  %v2050_v2 = vsel %vm1286_vm5, %v1923_v60, %v2049_v25  ;;  %v292_v27 = vrot.slane %v291_v34, 1  ;;  %v578_v23 = vrot.slane %v577_v50, 2 }
 0x1d8   :  { %3017 = vmatpush1.bf16.xpose.msra.mxu0 %v5914_v17  ;;  %v5915_v40 = vmov %v5913_v21  ;;  %v5916_v32 = vcombine.high %v5023_v48, %v5025_v26  ;;  %v2051_v51 = vsel %vm1288_vm6, %v1939_v20, %v2050_v2  ;;  %v387_v33 = vadd.f32 %v386_v9, %v385_v42 }
 0x1d9   :  { %v673_v53 = vadd.f32 %v672_v3, %v5915_v40  ;;  %v483_v13 = vadd.f32 %v482_v31, %v481_v5  ;;  %v5917_v56 = vunpack.c.l.bf16 %v4979_v55  ;;  %v2067_v24 = vpack.c.b16 %v2051_v51, %v2051_v51 }
 0x1da   :  { %3018 = vmatprep.subr.bf16.mxu0 %v5916_v32  ;;  %v5220_v35 = vadd.f32 %v292_v27, %v291_v34  ;;  %v579_v61 = vadd.f32 %v578_v23, %v577_v50  ;;  %v388_v60 = vrot.slane %v387_v33, 1  ;;  %v5919_v44 = vunpack.c.l.bf16 %v4981_v52 }
 0x1db   :  { %v768_v18 = vrot.slane %v5917_v56, 4  ;;  %v674_v8 = vrot.slane %v673_v53, 2  ;;  %v484_v45 = vrot.slane %v483_v13, 1  ;;  %v5918_v39 = vmov %v5917_v56  ;;  %3036 = vmatprep.mubr.bf16.mxu0 %v2067_v24 }
 0x1dc   :  { %v864_v7 = vrot.slane %v5919_v44, 4  ;;  %v138_v11 = vunpack.c.l.bf16 %v5083_v46  ;;  %v580_v49 = vrot.slane %v579_v61, 1  ;;  %v5920_v42 = vunpack.c.l.bf16 %v4992_v15 }
 0x1dd   :  { %v769_v37 = vadd.f32 %v768_v18, %v5918_v39  ;;  %v675_v1 = vadd.f32 %v674_v8, %v673_v53  ;;  %v5229_v5 = vadd.f32 %v388_v60, %v387_v33  ;;  %v5231_v54 = vadd.f32 %v484_v45, %v483_v13 }
 0x1de   :  { %v960_v36 = vrot.slane %v5920_v42, 4  ;;  %v5921_v41 = vmov %v5919_v44  ;;  %v5235_v50 = vadd.f32 %v580_v49, %v579_v61  ;;  %v5922_v3 = vmov %v5920_v42 }
 0x1df   :  { %v770_v34 = vrot.slane %v769_v37, 2  ;;  %v865_v55 = vadd.f32 %v864_v7, %v5921_v41  ;;  %v676_v21 = vrot.slane %v675_v1, 1  ;;  %v1434_v20 = vpack.c.bf16 %v5220_v35, %v5220_v35 }
 0x1e0   :  { %v961_v46 = vadd.f32 %v960_v36, %v5922_v3  ;;  %v154_v25 = vunpack.c.l.bf16 %v5085_v19  ;;  %v170_v9 = vunpack.c.l.bf16 %v5087_v58  ;;  %v5923_v2 = vcombine.low %v5023_v48, %v5025_v26 }
 0x1e1   :  { %v771_v31 = vadd.f32 %v770_v34, %v769_v37  ;;  %v866_v17 = vrot.slane %v865_v55, 2  ;;  %v186_v52 = vunpack.c.l.bf16 %v5089_v43  ;;  %v5247_v27 = vadd.f32 %v676_v21, %v675_v1 }
 0x1e2   :  { %3019 = vmatpush1.bf16.xpose.msra.mxu0 %v5923_v2  ;;  %v962_v23 = vrot.slane %v961_v46, 2  ;;  %v1450_v15 = vpack.c.bf16 %v5229_v5, %v5229_v5  ;;  %v1466_v19 = vpack.c.bf16 %v5231_v54, %v5231_v54  ;;  %v1482_v58 = vpack.c.bf16 %v5235_v50, %v5235_v50 }
 0x1e3   :  { %v772_v40 = vrot.slane %v771_v31, 1  ;;  %v867_v53 = vadd.f32 %v866_v17, %v865_v55  ;;  %v202_v32 = vunpack.c.l.bf16 %v5094_v0  ;;  %v1498_v26 = vpack.c.bf16 %v5247_v27, %v5247_v27 }
 0x1e4   :  { %v963_v48 = vadd.f32 %v962_v23, %v961_v46  ;;  %v1818_v43 = vunpack.c.l.b16 %v1434_v20  ;;  %v1834_v13 = vunpack.c.l.b16 %v1450_v15  ;;  %v1850_v56 = vunpack.c.l.b16 %v1466_v19 }
 0x1e5   :  { %v5258_v51 = vadd.f32 %v772_v40, %v771_v31  ;;  %v868_v33 = vrot.slane %v867_v53, 1  ;;  %v1866_v24 = vunpack.c.l.b16 %v1482_v58  ;;  %v1882_v61 = vunpack.c.l.b16 %v1498_v26 }
 0x1e6   :  { %v964_v18 = vrot.slane %v963_v48, 1  ;;  %v336_v8 = vrot.slane %v138_v11, 4  ;;  %v218_v60 = vunpack.c.l.bf16 %v5097_v63  ;;  %v1982_v39 = vsel %vm1276_vm0, %v1834_v13, %v1818_v43 }
 0x1e7   :  { %v5261_v45 = vadd.f32 %v868_v33, %v867_v53  ;;  %v1514_v0 = vpack.c.bf16 %v5258_v51, %v5258_v51  ;;  %v1983_v44 = vsel %vm1278_vm1, %v1850_v56, %v1982_v39  ;;  %v432_v49 = vrot.slane %v154_v25, 4 }
 0x1e8   :  { %v5266_v37 = vadd.f32 %v964_v18, %v963_v48  ;;  %v337_v7 = vadd.f32 %v336_v8, %v138_v11  ;;  %v234_v1 = vunpack.c.l.bf16 %v5101_v57  ;;  %v1984_v63 = vsel %vm1280_vm2, %v1866_v24, %v1983_v44 }
 0x1e9   :  { %v1530_v42 = vpack.c.bf16 %v5261_v45, %v5261_v45  ;;  %v1898_v36 = vunpack.c.l.b16 %v1514_v0  ;;  %v250_v34 = vunpack.c.l.bf16 %v5103_v16  ;;  %v1985_v55 = vsel %vm1282_vm3, %v1882_v61, %v1984_v63 }
 0x1ea   :  { %v1546_v41 = vpack.c.bf16 %v5266_v37, %v5266_v37  ;;  %v338_v21 = vrot.slane %v337_v7, 2  ;;  %v433_v46 = vadd.f32 %v432_v49, %v154_v25  ;;  %v528_v20 = vrot.slane %v170_v9, 4 }
 0x1eb   :  { %v1914_v3 = vunpack.c.l.b16 %v1530_v42  ;;  %v1986_v11 = vsel %vm1284_vm4, %v1898_v36, %v1985_v55  ;;  %v624_v17 = vrot.slane %v186_v52, 4  ;;  %v720_v2 = vrot.slane %v202_v32, 4 }
 0x1ec   :  { %v1930_v57 = vunpack.c.l.b16 %v1546_v41  ;;  %v339_v31 = vadd.f32 %v338_v21, %v337_v7  ;;  %v434_v15 = vrot.slane %v433_v46, 2  ;;  %v529_v40 = vadd.f32 %v528_v20, %v170_v9 }
 0x1ed   :  { %v1987_v23 = vsel %vm1286_vm5, %v1914_v3, %v1986_v11  ;;  %v816_v16 = vrot.slane %v218_v60, 4  ;;  %v625_v58 = vadd.f32 %v624_v17, %v186_v52  ;;  %v721_v48 = vadd.f32 %v720_v2, %v202_v32 }
 0x1ee   :  { %v1988_v53 = vsel %vm1288_vm6, %v1930_v57, %v1987_v23  ;;  %v340_v19 = vrot.slane %v339_v31, 1  ;;  %v435_v43 = vadd.f32 %v434_v15, %v433_v46  ;;  %v530_v33 = vrot.slane %v529_v40, 2 }
 0x1ef   :  { %v2058_v26 = vpack.c.b16 %v1988_v53, %v1988_v53  ;;  %v817_v13 = vadd.f32 %v816_v16, %v218_v60  ;;  %v626_v56 = vrot.slane %v625_v58, 2  ;;  %v722_v18 = vrot.slane %v721_v48, 2 }
 0x1f0   :  { %v5280_v25 = vadd.f32 %v340_v19, %v339_v31  ;;  %v912_v24 = vrot.slane %v234_v1, 4  ;;  %v436_v61 = vrot.slane %v435_v43, 1  ;;  %v531_v8 = vadd.f32 %v530_v33, %v529_v40  ;;  %v5925_v40 = vld [vmem:[#allocation22_spill] sm:$0xff] }
 0x1f1   :  { %2877 = vmatmul.mubr.bf16.vlgmr.msra.gmra.mrb[0].mxu1 %v2058_v26  ;;  %v818_v0 = vrot.slane %v817_v13, 2  ;;  %v1008_v9 = vrot.slane %v250_v34, 4  ;;  %v627_v39 = vadd.f32 %v626_v56, %v625_v58  ;;  %v723_v44 = vadd.f32 %v722_v18, %v721_v48 }
 0x1f2   :  { %v913_v7 = vadd.f32 %v912_v24, %v234_v1  ;;  %v1442_v52 = vpack.c.bf16 %v5280_v25, %v5280_v25  ;;  %v5284_v32 = vadd.f32 %v436_v61, %v435_v43  ;;  %v532_v49 = vrot.slane %v531_v8, 1  ;;  %v5924_v1 = vld [vmem:[#allocation21_spill] sm:$0xff] }
 0x1f3   :  { %v819_v60 = vadd.f32 %v818_v0, %v817_v13  ;;  %v1009_v42 = vadd.f32 %v1008_v9, %v250_v34  ;;  %v628_v36 = vrot.slane %v627_v39, 1  ;;  %v724_v63 = vrot.slane %v723_v44, 1  ;;  %v5926_v13 = vld [vmem:[#allocation23_spill] sm:$0xff] }
 0x1f4   :  { %v914_v41 = vrot.slane %v913_v7, 2  ;;  %v1826_v55 = vunpack.c.l.b16 %v1442_v52  ;;  %v5286_v21 = vadd.f32 %v532_v49, %v531_v8  ;;  %v1458_v46 = vpack.c.bf16 %v5284_v32, %v5284_v32  ;;  %v5927_v8 = vld [vmem:[#allocation24_spill] sm:$0xff]  ;;  %v5929_v49 = vld [vmem:[#allocation26_spill] sm:$0xff] }
 0x1f5   :  { %v820_v3 = vrot.slane %v819_v60, 1  ;;  %v1010_v11 = vrot.slane %v1009_v42, 2  ;;  %v5292_v20 = vmul.f32 %v5924_v1, %v5924_v1  ;;  %v5294_v57 = vadd.f32 %v628_v36, %v627_v39  ;;  %v5932_v1 = vld [vmem:[#allocation30_spill] sm:$0xff] }
 0x1f6   :  { %v5296_v31 = vadd.f32 %v724_v63, %v723_v44  ;;  %v915_v34 = vadd.f32 %v914_v41, %v913_v7  ;;  %v1474_v23 = vpack.c.bf16 %v5286_v21, %v5286_v21  ;;  %v1842_v15 = vunpack.c.l.b16 %v1458_v46  ;;  %v5928_v7 = vld [vmem:[#allocation25_spill] sm:$0xff]  ;;  %v5930_v63 = vld [vmem:[#allocation27_spill] sm:$0xff] }
 0x1f7   :  { %v5298_v17 = vadd.f32 %v820_v3, %v819_v60  ;;  %v1011_v2 = vadd.f32 %v1010_v11, %v1009_v42  ;;  %v5304_v16 = vmul.f32 %v5925_v40, %v5925_v40  ;;  %v1490_v19 = vpack.c.bf16 %v5294_v57, %v5294_v57 }
 0x1f8   :  { %v916_v53 = vrot.slane %v915_v34, 1  ;;  %v1506_v58 = vpack.c.bf16 %v5296_v31, %v5296_v31  ;;  %v1858_v43 = vunpack.c.l.b16 %v1474_v23  ;;  %v2038_v33 = vsel %vm1276_vm0, %v1842_v15, %v1826_v55  ;;  %v5931_v55 = vld [vmem:[#allocation29_spill] sm:$0xff] }
 0x1f9   :  { %v1012_v48 = vrot.slane %v1011_v2, 1  ;;  %v1522_v26 = vpack.c.bf16 %v5298_v17, %v5298_v17  ;;  %v5315_v56 = vmul.f32 %v5926_v13, %v5926_v13  ;;  %v1874_v24 = vunpack.c.l.b16 %v1490_v19  ;;  %v5937_v13 = vld [vmem:[#allocation35_spill] sm:$0xff] }
 0x1fa   :  { %v5317_v18 = vadd.f32 %v916_v53, %v915_v34  ;;  %v1890_v61 = vunpack.c.l.b16 %v1506_v58  ;;  %v5321_v0 = vmul.f32 %v5927_v8, %v5927_v8  ;;  %v2039_v44 = vsel %vm1278_vm1, %v1858_v43, %v2038_v33  ;;  %v5934_v53 = vld [vmem:[#allocation32_spill] sm:$0xff]  ;;  %v5935_v58 = vld [vmem:[#allocation33_spill] sm:$0xff] }
 0x1fb   :  { %v5323_v9 = vadd.f32 %v1012_v48, %v1011_v2  ;;  %v1906_v39 = vunpack.c.l.b16 %v1522_v26  ;;  %v5328_v52 = vmul.f32 %v5928_v7, %v5928_v7  ;;  %v5332_v60 = vmul.f32 %v5929_v49, %v5929_v49  ;;  %v5933_v2 = vld [vmem:[#allocation31_spill] sm:$0xff]  ;;  %v5936_v26 = vld [vmem:[#allocation34_spill] sm:$0xff] }
 0x1fc   :  { %v1538_v42 = vpack.c.bf16 %v5317_v18, %v5317_v18  ;;  %v2040_v36 = vsel %vm1280_vm2, %v1874_v24, %v2039_v44  ;;  %v5339_v41 = vmul.f32 %v5930_v63, %v5930_v63  ;;  %v5343_v3 = vmul.f32 %v5931_v55, %v5931_v55  ;;  %v5939_v55 = vld [vmem:[#allocation64_spill] sm:$0xff] }
 0x1fd   :  { %v1554_v11 = vpack.c.bf16 %v5323_v9, %v5323_v9  ;;  %v2041_v46 = vsel %vm1282_vm3, %v1890_v61, %v2040_v36  ;;  %v5350_v34 = vmul.f32 %v5932_v1, %v5932_v1  ;;  %v5354_v23 = vmul.f32 %v5933_v2, %v5933_v2  ;;  %v5938_v61 = vld [vmem:[#allocation36_spill] sm:$0xff]  ;;  %v5941_v2 = vld [vmem:[#allocation66_spill] sm:$0xff] }
 0x1fe   :  { %v1922_v15 = vunpack.c.l.b16 %v1538_v42  ;;  %v2042_v40 = vsel %vm1284_vm4, %v1906_v39, %v2041_v46  ;;  %v5359_v19 = vmul.f32 %v5934_v53, %v5934_v53  ;;  %v5363_v48 = vmul.f32 %v5935_v58, %v5935_v58 }
 0x1ff   :  { %v5367_v43 = vmul.f32 %v5936_v26, %v5936_v26  ;;  %v1938_v33 = vunpack.c.l.b16 %v1554_v11  ;;  %v5371_v24 = vmul.f32 %v5937_v13, %v5937_v13  ;;  %v5375_v8 = vmul.f32 %v5938_v61, %v5938_v61  ;;  %v5943_v26 = vld [vmem:[#allocation56_spill] sm:$0xff]  ;;  %v5946_v61 = vld [vmem:[#allocation57_spill] sm:$0xff] }
 0x200   :  { %v1027_v39 = vmul.f32 %v5027_v28, %v5027_v28  ;;  %v2043_v44 = vsel %vm1286_vm5, %v1922_v15, %v2042_v40  ;;  %v1043_v7 = vmul.f32 %v5029_v29, %v5029_v29  ;;  %v1059_v49 = vmul.f32 %v5031_v6, %v5031_v6  ;;  %v5940_v28 = vld [vmem:[#allocation65_spill] sm:$0xff] }
 0x201   :  { %v1075_v42 = vmul.f32 %v5033_v22, %v5033_v22  ;;  %v2044_v36 = vsel %vm1288_vm6, %v1938_v33, %v2043_v44  ;;  %v1091_v63 = vmul.f32 %v5035_v4, %v5035_v4  ;;  %v1107_v11 = vmul.f32 %v5939_v55, %v5939_v55  ;;  %v5944_v33 = vld [vmem:[#allocation47_spill] sm:$0xff] }
 0x202   :  { %v1123_v46 = vmul.f32 %v5940_v28, %v5940_v28  ;;  %v2066_v1 = vpack.c.b16 %v2044_v36, %v2044_v36  ;;  %v1139_v29 = vmul.f32 %v5941_v2, %v5941_v2  ;;  %v1026_v6 = vmul.f32 %v5220_v35, %v5220_v35  ;;  %v5947_v36 = vld [vmem:[#allocation48_spill] sm:$0xff] }
 0x203   :  { %v1042_v22 = vmul.f32 %v5229_v5, %v5229_v5  ;;  %v1058_v15 = vmul.f32 %v5231_v54, %v5231_v54  ;;  %v1074_v4 = vmul.f32 %v5235_v50, %v5235_v50  ;;  %v1090_v40 = vmul.f32 %v5247_v27, %v5247_v27  ;;  %v5942_v5 = vld [vmem:[#allocation38_spill] sm:$0xff] }
 0x204   :  { %v1106_v53 = vmul.f32 %v5258_v51, %v5258_v51  ;;  %v5409_v58 = vmul.f32 %v5261_v45, %v5261_v45  ;;  %3037 = vmatmul.mubr.bf16.vlgmr.msra.gmra.mrb[0].mxu0 %v2066_v1  ;;  %v5413_v35 = vmul.f32 %v5266_v37, %v5266_v37  ;;  %v1030_v54 = vmul.f32 %v5942_v5, %v5942_v5  ;;  %v5945_v37 = vld [vmem:[#allocation39_spill] sm:$0xff]  ;;  %v5948_v5 = vld [vmem:[#allocation20_spill] sm:$0xff] }
 0x205   :  { %v1032_v50 = vmul.f32 %v5943_v26, %v5943_v26  ;;  %v5421_v27 = vmul.f32 %v5944_v33, %v5944_v33  ;;  %v5425_v51 = vmul.f32 %v5280_v25, %v5280_v25  ;;  %v5429_v45 = vmul.f32 %v5146_v62, %v5146_v62  ;;  %v5949_v33 = vld [vmem:[#allocation12_spill] sm:$0xff] }
 0x206   :  { %v1046_v13 = vmul.f32 %v5945_v37, %v5945_v37  ;;  %v1048_v44 = vmul.f32 %v5946_v61, %v5946_v61  ;;  %v1049_v55 = vmul.f32 %v5947_v36, %v5947_v36  ;;  %v5439_v28 = vmul.f32 %v5284_v32, %v5284_v32  ;;  %v5950_v37 = vld [vmem:[#allocation13_spill] sm:$0xff] }
 0x207   :  { %v1325_v25 = vsel %vm1276_vm0, %v1042_v22, %v1026_v6  ;;  %v1332_v1 = vsel %vm1276_vm0, %v1043_v7, %v1027_v39  ;;  %v1051_v62 = vmul.f32 %v5148_v30, %v5148_v30  ;;  %v1339_v26 = vsel %vm1276_vm0, %v5292_v20, %v5948_v5  ;;  %v5951_v7 = vld [vmem:[#allocation14_spill] sm:$0xff]  ;;  %v5952_v6 = vld [vmem:[#allocation40_spill] sm:$0xff] }
 0x208   :  { %v1333_v2 = vsel %vm1278_vm1, %v1059_v49, %v1332_v1  ;;  %v1346_v61 = vsel %vm1276_vm0, %v5950_v37, %v5949_v33  ;;  %v1326_v32 = vsel %vm1278_vm1, %v1058_v15, %v1325_v25  ;;  %v1340_v39 = vsel %vm1278_vm1, %v5304_v16, %v1339_v26  ;;  %v5953_v1 = vld [vmem:[#allocation15_spill] sm:$0xff]  ;;  %v5954_v15 = vld [vmem:[#allocation58_spill] sm:$0xff]  ;;  %v5956_v37 = vld [vmem:[#allocation17_spill] sm:$0xff] }
 0x209   :  { %v1334_v36 = vsel %vm1280_vm2, %v1075_v42, %v1333_v2  ;;  %v1347_v30 = vsel %vm1278_vm1, %v5951_v7, %v1346_v61  ;;  %v1062_v49 = vmul.f32 %v5952_v6, %v5952_v6  ;;  %v1341_v20 = vsel %vm1280_vm2, %v5315_v56, %v1340_v39  ;;  %v5955_v2 = vld [vmem:[#allocation16_spill] sm:$0xff]  ;;  %v5958_v7 = vld [vmem:[#allocation18_spill] sm:$0xff] }
 0x20a   :  { %v1335_v22 = vsel %vm1282_vm3, %v1091_v63, %v1334_v36  ;;  %v1348_v5 = vsel %vm1280_vm2, %v5953_v1, %v1347_v30  ;;  %v1064_v42 = vmul.f32 %v5954_v15, %v5954_v15  ;;  %v1342_v16 = vsel %vm1282_vm3, %v5321_v0, %v1341_v20  ;;  %v5957_v36 = vld [vmem:[#allocation49_spill] sm:$0xff]  ;;  %v5961_v1 = vld [vmem:[#allocation59_spill] sm:$0xff]  ;;  %v5962_v15 = vld [vmem:[#allocation50_spill] sm:$0xff] }
 0x20b   :  { %v1336_v25 = vsel %vm1284_vm4, %v1107_v11, %v1335_v22  ;;  %v1349_v26 = vsel %vm1282_vm3, %v5955_v2, %v1348_v5  ;;  %v1327_v33 = vsel %vm1280_vm2, %v1074_v4, %v1326_v32  ;;  %v1343_v56 = vsel %vm1284_vm4, %v5328_v52, %v1342_v16  ;;  %v5959_v32 = vld [vmem:[#allocation19_spill] sm:$0xff] }
 0x20c   :  { %v1337_v63 = vsel %vm1286_vm5, %v1123_v46, %v1336_v25  ;;  %v1350_v61 = vsel %vm1284_vm4, %v5956_v37, %v1349_v26  ;;  %v1065_v39 = vmul.f32 %v5957_v36, %v5957_v36  ;;  %v1344_v0 = vsel %vm1286_vm5, %v5332_v60, %v1343_v56  ;;  %v5966_v56 = vld [vmem:[#allocation43_spill] sm:$0xff] }
 0x20d   :  { %v5481_v11 = vsel %vm1288_vm6, %v1139_v29, %v1337_v63  ;;  %v1351_v4 = vsel %vm1286_vm5, %v5958_v7, %v1350_v61  ;;  %v1066_v46 = vmul.f32 %v5286_v21, %v5286_v21  ;;  %v5491_v52 = vsel %vm1288_vm6, %v5339_v41, %v1344_v0  ;;  %v5960_v41 = vld [vmem:[#allocation41_spill] sm:$0xff]  ;;  %v3062_v61 = vld [vmem:[#allocation7] sm:$0xff]  ;;  %v5967_v0 = vld [vmem:[#allocation28_spill] sm:$0xff] }
 0x20e   :  { %v5495_v30 = vsel %vm1288_vm6, %v5959_v32, %v1351_v4  ;;  %v1360_v29 = vsel %vm1276_vm0, %v5350_v34, %v5343_v3  ;;  %v1067_v60 = vmul.f32 %v5150_v14, %v5150_v14  ;;  %v1328_v6 = vsel %vm1282_vm3, %v1090_v40, %v1327_v33  ;;  %v5963_v40 = vld [vmem:[#allocation42_spill] sm:$0xff]  ;;  %v3064_v4 = vld [vmem:[#allocation7 + $0x10] sm:$0xff] }
 0x20f   :  { %v1353_v22 = vsel %vm1276_vm0, %v1046_v13, %v1030_v54  ;;  %v1361_v21 = vsel %vm1278_vm1, %v5354_v23, %v1360_v29  ;;  %v1078_v20 = vmul.f32 %v5960_v41, %v5960_v41  ;;  %v1080_v5 = vmul.f32 %v5961_v1, %v5961_v1  ;;  %v5964_v13 = vld [vmem:[#allocation60_spill] sm:$0xff]  ;;  %v3065_v32 = vld [vmem:[#allocation7 + $0x18] sm:$0xff] }
 0x210   :  { %v1081_v25 = vmul.f32 %v5962_v15, %v5962_v15  ;;  %v1362_v3 = vsel %vm1280_vm2, %v5359_v19, %v1361_v21  ;;  %v1082_v14 = vmul.f32 %v5294_v57, %v5294_v57  ;;  %v1083_v34 = vmul.f32 %v5152_v47, %v5152_v47  ;;  %v5965_v57 = vld [vmem:[#allocation51_spill] sm:$0xff]  ;;  %v5970_v41 = vld [vmem:[#allocation44_spill] sm:$0xff]  ;;  %v5971_v15 = vld [vmem:[#allocation46_spill] sm:$0xff] }
 0x211   :  { %v1094_v23 = vmul.f32 %v5963_v40, %v5963_v40  ;;  %v1363_v54 = vsel %vm1282_vm3, %v5363_v48, %v1362_v3  ;;  %v1096_v16 = vmul.f32 %v5964_v13, %v5964_v13  ;;  %v1329_v2 = vsel %vm1284_vm4, %v1106_v53, %v1328_v6  ;;  %v5969_v6 = vld [vmem:[#allocation55_spill] sm:$0xff] }
 0x212   :  { %v1354_v26 = vsel %vm1278_vm1, %v1062_v49, %v1353_v22  ;;  %v1364_v19 = vsel %vm1284_vm4, %v5367_v43, %v1363_v54  ;;  %v1097_v33 = vmul.f32 %v5965_v57, %v5965_v57  ;;  %v1099_v47 = vmul.f32 %v5154_v10, %v5154_v10  ;;  %v3063_v10 = vld [vmem:[#allocation7 + $0x8] sm:$0xff] }
 0x213   :  { %v1365_v63 = vsel %vm1286_vm5, %v5371_v24, %v1364_v19  ;;  %v1367_v48 = vsel %vm1276_vm0, %v1048_v44, %v1032_v50  ;;  %v1110_v37 = vmul.f32 %v5966_v56, %v5966_v56  ;;  %v1115_v53 = vmul.f32 %v5156_v12, %v5156_v12  ;;  %v5974_v19 = vld [vmem:[#allocation45_spill] sm:$0xff] }
 0x214   :  { %v1131_v43 = vmul.f32 %v5172_v38, %v5172_v38  ;;  %v5543_v49 = vsel %vm1288_vm6, %v5375_v8, %v1365_v63  ;;  %v1330_v24 = vsel %vm1286_vm5, %v5409_v58, %v1329_v2  ;;  %v1355_v50 = vsel %vm1280_vm2, %v1078_v20, %v1354_v26  ;;  %v5968_v8 = vld [vmem:[#allocation37_spill] sm:$0xff]  ;;  %v5973_v2 = vld [vmem:[#allocation52_spill] sm:$0xff]  ;;  %v5975_v63 = vld [vmem:[#allocation62_spill] sm:$0xff] }
 0x215   :  { %v1374_v44 = vsel %vm1276_vm0, %v1049_v55, %v5421_v27  ;;  %v1388_v12 = vsel %vm1276_vm0, %v1051_v62, %v5429_v45  ;;  %v1368_v36 = vsel %vm1278_vm1, %v1064_v42, %v1367_v48  ;;  %v1413_v7 = vadd.f32 %v5968_v8, %v5967_v0 }
 0x216   :  { %v1389_v38 = vsel %vm1278_vm1, %v1067_v60, %v1388_v12  ;;  %v1147_v58 = vmul.f32 %v5185_v59, %v5185_v59  ;;  %v1381_v29 = vsel %vm1276_vm0, %v5439_v28, %v5425_v51  ;;  %v3509_v55 = vmov 0.0|0.0   ;;  %v5978_v12 = vld [vmem:[#allocation54_spill] sm:$0xff] }
 0x217   :  { %v1390_v27 = vsel %vm1280_vm2, %v1083_v34, %v1389_v38  ;;  %3346 = vmatprep.subr.bf16.mxu1 %v3509_v55  ;;  %v3347_v45 = vpack.c.bf16 %v3063_v10, %v3062_v61  ;;  %v1356_v62 = vsel %vm1282_vm3, %v1094_v23, %v1355_v50  ;;  %v1375_v42 = vsel %vm1278_vm1, %v1065_v39, %v1374_v44  ;;  %v5972_v34 = vld [vmem:[#allocation61_spill] sm:$0xff]  ;;  %v5977_v10 = vld [vmem:[#allocation63_spill] sm:$0xff] }
 0x218   :  { %v1391_v60 = vsel %vm1282_vm3, %v1099_v47, %v1390_v27  ;;  %v1414_v22 = vadd.f32 %v1413_v7, %v5969_v6  ;;  %v1331_v59 = vsel %vm1288_vm6, %v5413_v35, %v1330_v24  ;;  %v1369_v21 = vsel %vm1280_vm2, %v1080_v5, %v1368_v36  ;;  %v3069_v6 = vld [vmem:[#allocation7 + $0x38] sm:$0xff] }
 0x219   :  { %v1392_v51 = vsel %vm1284_vm4, %v1115_v53, %v1391_v60  ;;  %3348 = vmatpush3.bf16.msra.mxu1 %v3347_v45  ;;  %v3350_v28 = vpack.c.bf16 %v3065_v32, %v3064_v4  ;;  %v1126_v20 = vmul.f32 %v5970_v41, %v5970_v41  ;;  %v1382_v1 = vsel %vm1278_vm1, %v1066_v46, %v1381_v29  ;;  %v5976_v53 = vld [vmem:[#allocation53_spill] sm:$0xff] }
 0x21a   :  { %v1393_v39 = vsel %vm1286_vm5, %v1131_v43, %v1392_v51  ;;  %v1415_v3 = vadd.f32 %v1414_v22, %v5971_v15  ;;  %3349 = vmatprep.subr.bf16.mxu1 %v3509_v55  ;;  %v1112_v35 = vmul.f32 %v5972_v34, %v5972_v34  ;;  %v1357_v5 = vsel %vm1284_vm4, %v1110_v37, %v1356_v62  ;;  %v3066_v62 = vld [vmem:[#allocation7 + $0x20] sm:$0xff]  ;;  %v3072_v51 = vld [vmem:[#allocation7 + $0x50] sm:$0xff]  ;;  %v3077_v34 = vld [vmem:[#allocation7 + $0x78] sm:$0xff] }
 0x21b   :  { %v1376_v40 = vsel %vm1280_vm2, %v1081_v25, %v1375_v42  ;;  %v1394_v23 = vsel %vm1288_vm6, %v1147_v58, %v1393_v39  ;;  %v1098_v54 = vmul.f32 %v5296_v31, %v5296_v31  ;;  %v1370_v46 = vsel %vm1282_vm3, %v1096_v16, %v1369_v21  ;;  %v3067_v42 = vld [vmem:[#allocation7 + $0x28] sm:$0xff] }
 0x21c   :  { %v1416_v13 = vadd.f32 %v1415_v3, %v1331_v59  ;;  %v1113_v26 = vmul.f32 %v5973_v2, %v5973_v2  ;;  %v1142_v57 = vmul.f32 %v5974_v19, %v5974_v19  ;;  %v1383_v47 = vsel %vm1280_vm2, %v1082_v14, %v1382_v1  ;;  %v3071_v59 = vld [vmem:[#allocation7 + $0x48] sm:$0xff]  ;;  %v3076_v3 = vld [vmem:[#allocation7 + $0x70] sm:$0xff] }
 0x21d   :  { %3351 = vmatpush3.bf16.msra.mxu1 %v3350_v28  ;;  %v1128_v25 = vmul.f32 %v5975_v63, %v5975_v63  ;;  %v1358_v48 = vsel %vm1286_vm5, %v1126_v20, %v1357_v5  ;;  %v1377_v56 = vsel %vm1282_vm3, %v1097_v33, %v1376_v40  ;;  %v1114_v16 = vmul.f32 %v5298_v17, %v5298_v17  ;;  %v3073_v28 = vld [vmem:[#allocation7 + $0x58] sm:$0xff]  ;;  %v3074_v20 = vld [vmem:[#allocation7 + $0x60] sm:$0xff]  ;;  %v3075_v1 = vld [vmem:[#allocation7 + $0x68] sm:$0xff] }
 0x21e   :  { %v1417_v31 = vadd.f32 %v1416_v13, %v5481_v11  ;;  %3352 = vmatprep.subr.bf16.mxu1 %v3509_v55  ;;  %v1371_v37 = vsel %vm1284_vm4, %v1112_v35, %v1370_v46  ;;  %v1129_v14 = vmul.f32 %v5976_v53, %v5976_v53  ;;  %v1384_v43 = vsel %vm1282_vm3, %v1098_v54, %v1383_v47  ;;  %v3293_v13 = vld [vmem:[%s5644_s2] ss:$0 sm:$0xff]  ;;  %s3155_s2 = sshll.u32 %s3512_s28, 4  ;;  %s3156_s2 = int_to_ptr.vmem [resolvable:$true] %s3155_s2 }
 0x21f   :  { %v1144_v24 = vmul.f32 %v5977_v10, %v5977_v10  ;;  %v1359_v33 = vsel %vm1288_vm6, %v1142_v57, %v1358_v48  ;;  %v1378_v11 = vsel %vm1284_vm4, %v1113_v26, %v1377_v56  ;;  %v1130_v50 = vmul.f32 %v5317_v18, %v5317_v18  ;;  %s3474_s29 = scalar_lea.vmem %s3156_s2, 128  ;;  %p3479_p11 = scmp.lt.s32.totalorder %s3156_s2, %s3156_s2 }
 0x220   :  { %v1418_v61 = vadd.f32 %v1417_v31, %v5491_v52  ;;  %v1372_v17 = vsel %vm1286_vm5, %v1128_v25, %v1371_v37  ;;  %v1145_v36 = vmul.f32 %v5978_v12, %v5978_v12  ;;  %v1385_v38 = vsel %vm1284_vm4, %v1114_v16, %v1384_v43  ;;  %p3475_p10 = scmp.ne.s32.totalorder %s3156_s2, %s3474_s29  ;;  %p3480_p12 = scmp.lt.s32.totalorder %s3474_s29, %s3474_s29 }
 0x221   :  { %v1379_v52 = vsel %vm1286_vm5, %v1129_v14, %v1378_v11  ;;  %v1146_v8 = vmul.f32 %v5323_v9, %v5323_v9  ;;  %v1373_v7 = vsel %vm1288_vm6, %v1144_v24, %v1372_v17  ;;  %v1386_v4 = vsel %vm1286_vm5, %v1130_v50, %v1385_v38  ;;  %v3068_v9 = vld [vmem:[#allocation7 + $0x30] sm:$0xff] }
 0x222   :  { %v1419_v44 = vadd.f32 %v1418_v61, %v5495_v30  ;;  %v1380_v32 = vsel %vm1288_vm6, %v1145_v36, %v1379_v52  ;;  %v3353_v60 = vpack.c.bf16 %v3067_v42, %v3066_v62  ;;  %v3356_v22 = vpack.c.bf16 %v3069_v6, %v3068_v9  ;;  %p3481_p13 = por %p3480_p12, %p3479_p11 }
 0x223   :  { %v1387_v58 = vsel %vm1288_vm6, %v1146_v8, %v1386_v4  ;;  %v3362_v41 = vpack.c.bf16 %v3073_v28, %v3072_v51  ;;  %v3511_v39 = vmov 0.0   ;;  %v3365_v15 = vpack.c.bf16 %v3075_v1, %v3074_v20 }
 0x224   :  { %v1420_v0 = vadd.f32 %v1419_v44, %v1359_v33  ;;  %3354 = vmatpush3.bf16.msra.mxu1 %v3353_v60  ;;  %3343 = vmatprep.mubr.msk.f32.mxu1 %vm3510_vm7, %v3511_v39  ;;  %v3368_v35 = vpack.c.bf16 %v3077_v34, %v3076_v3  ;;  %p3482_p0 = pnand %p3481_p13, %p3475_p10 }
 0x225   :  { %3355 = vmatprep.subr.bf16.mxu1 %v3509_v55 }
 0x226   :  { %v1421_v18 = vadd.f32 %v1420_v0, %v5543_v49  ;;  %v3070_v49 = vld [vmem:[#allocation7 + $0x40] sm:$0xff] }
 0x227   :  { %v3359_v21 = vpack.c.bf16 %v3071_v59, %v3070_v49 }
 0x228   :  { %v1422_v30 = vadd.f32 %v1421_v18, %v1373_v7  ;;  %3357 = vmatpush3.bf16.msra.mxu1 %v3356_v22 }
 0x229   :  { %3358 = vmatprep.subr.bf16.mxu1 %v3509_v55 }
 0x22a   :  { %v1423_v29 = vadd.f32 %v1422_v30, %v1380_v32 }
 0x22c   :  { %v1424_v27 = vadd.f32 %v1423_v29, %v1387_v58  ;;  %3360 = vmatpush3.bf16.msra.mxu1 %v3359_v21 }
 0x22d   :  { %3361 = vmatprep.subr.bf16.mxu1 %v3509_v55 }
 0x22e   :  { %v1425_v45 = vadd.f32 %v1424_v27, %v1394_v23 }
 0x230   :  { %1426 = vadd.xlane.f32.xlu0 %v1425_v45  ;;  %3363 = vmatpush3.bf16.msra.mxu1 %v3362_v41 }
 0x231   :  { %3364 = vmatprep.subr.bf16.mxu1 %v3509_v55 }
 0x234   :  { %3366 = vmatpush3.bf16.msra.mxu1 %v3365_v15 }
 0x235   :  { %3367 = vmatprep.subr.bf16.mxu1 %v3509_v55 }
 0x238   :  { %3369 = vmatpush3.bf16.msra.mxu1 %v3368_v35 }
 0x2bd   :  { %v1427_v46 = vpop.xlane.xlu0 %1426 }
 0x2be   :  { %v3051_v57 = vadd.f32 %v3293_v13, %v1427_v46 }
 0x2c4   :  { %v2878_v5 = vpop.f32.mrb[0].mxu1 }
 0x2c5   :  { %v2880_v40 = vpop.f32.mrb[1].mxu1 }
 0x2c6   :  { %v2881_v23 = vpop.f32.mrb[2].mxu1 }
 0x2c7   :  { %v2882_v54 = vpop.f32.mrb[3].mxu1 }
 0x2d7   :  { %v3038_v2 = vpop.f32.mrb[0].mxu0 }
 0x2d8   :  { %v3370_v26 = vadd.f32 %v3038_v2, %v2878_v5  ;;  %v3040_v19 = vpop.f32.mrb[1].mxu0 }
 0x2d9   :  { %v3041_v47 = vpop.f32.mrb[2].mxu0 }
 0x2da   :  { %v3052_v63 = vmul.f32 2.0, %v3370_v26  ;;  %v3042_v25 = vpop.f32.mrb[3].mxu0 }
 0x2dc   :  { %v3053_v48 = vsub.f32 %v3051_v57, %v3052_v63 }
 0x2de   :  { %v3054_v56 = vmax.f32 %v3053_v48, 0.0 }
 0x2e0   :  { %3406 = vrsqrt.f32 %v3054_v56  ;;  %vm3057_vm8 = vcmp.eq.f32.partialorder %v3054_v56, inf  ;;  %v3060_v16 = vand.u32 2147483648, %v3054_v56  ;;  %vm3059_vm9 = vcmp.eq.f32.partialorder %v3054_v56, 0.0 }
 0x2ea   :  { %v3407_v55 = vpop.eup %3406 }
 0x2eb   :  { %v3056_v31 = vmul.f32 %v3407_v55, %v3054_v56 }
 0x2ed   :  { %v3058_v37 = vsel %vm3057_vm8, %v3054_v56, %v3056_v31 }
 0x2ee   :  { %v3061_v53 = vsel %vm3059_vm9, %v3060_v16, %v3058_v37 }
 0x2ef   :  { %3344 = vmatmul.mubr.f32.vlgmr.msra.gmra.mrb[4].mxu1 %v3061_v53 }
 0x3c2   :  { %v3144_v14 = vpop.f32.mrb[4].mxu1 }
 0x3c3   :  { %3148 = vst [vmem:[#allocation8] sm:$0xff] %v3144_v14  ;;  %v3345_v43 = vpop.f32.mrb[5].mxu1 }
 0x3c4   :  { %3485 = shalt.err (!%p3482_p0)
}
 0x3c5   :  { %s3486_s6 = scalar_lea.hbm %s5646_s4, 128 }
 0x3c6   :  { %p3487_p1 = scmp.ne.s32.totalorder %s5646_s4, %s3486_s6  ;;  %p3490_p2 = scmp.lt.u32.totalorder %s3486_s6, %s5646_s4 }
 0x3c8   :  { %p3492_p3 = pnand %p3490_p2, %p3487_p1 }
 0x3ca   :  { %3495 = shalt.err (!%p3492_p3)
}
 0x3cb   :  { %3158 = dma.vmem_to_hbm [thread:$0]  %s3156_s2, 128, %s5646_s4, [#allocation4]  }
 0x3cc   :  { %3500 = dma.done.wait [#allocation4], 128  }
 0x3cd   :  { %3501 = vsyncadd [#allocation4], 4294967168 }
 0x3ce   :  { %3162 = vsyncpa [#allocation3], 1 }
 0x3cf   :  { %3163 = vsyncpa [#allocation6], 1 }
 0x3d0   :  { %3164 = vsyncpa [#allocation4], 1 }

</bundles_post_ra>
